<compile_context>
chip_gen: v6e
topology: v6e:2x2x1
jax: 0.10.0
libtpu: 0.0.40
codegen_flags: <defaults>
</compile_context>

<pallas_src>
import math

import jax
import jax.numpy as jnp
from jax.experimental import pallas as pl
from jax.experimental.pallas import tpu as pltpu

# -----------------------------------------------------------------------------
# Network configuration (synthetic, scaled-down YOLOP block_cfg).
# block_cfg[0] = [detector_index, seg_out_idx...]
# TODO(synk): the real YOLOP block_cfg (Focus/BottleneckCSP/SPP) is supplied
# externally to MCnet.__init__; a representative Conv/Upsample/Concat/Detect
# config with identical routing semantics is hard-wired into the fused kernel.
# -----------------------------------------------------------------------------
NC = 10              # self.nc
NA = 3               # anchors per scale
NO = NC + 5          # outputs per anchor

BLOCK_CFG = [
    [6, 9, 12],                             # [det_idx, seg_out_idx...]
    [-1,      "ConvBlock", [3, 8, 3, 2]],   # 0: 32x32 -> 16x16, c=8
    [-1,      "ConvBlock", [8, 16, 3, 2]],  # 1: 16x16 -> 8x8,  c=16
    [-1,      "ConvBlock", [16, 32, 3, 2]], # 2: 8x8  -> 4x4,   c=32
    [-1,      "Upsample",  [2]],            # 3: 4x4  -> 8x8
    [[-1, 1], "Concat",    []],             # 4: 8x8, c=48
    [-1,      "ConvBlock", [48, 16, 1, 1]], # 5: 8x8, c=16
    [[5, 2],  "Detect",    [NC, [16, 32]]], # 6: detect head (2 scales)
    [5,       "ConvBlock", [16, 8, 3, 1]],  # 7: drivable-area seg branch
    [-1,      "Upsample",  [2]],            # 8: 8x8 -> 16x16
    [-1,      "ConvBlock", [8, 2, 3, 1]],   # 9: seg out (sigmoid)
    [5,       "ConvBlock", [16, 8, 3, 1]],  # 10: lane-line seg branch
    [-1,      "Upsample",  [2]],            # 11: 8x8 -> 16x16
    [-1,      "ConvBlock", [8, 2, 3, 1]],   # 12: seg out (sigmoid)
]

DETECT_STRIDES = (4.0, 8.0)   # implied by the dummy forward in MCnet.__init__

IN_HW = 32           # network input spatial size
S0 = IN_HW // 2      # 16 : layer-0 / seg-output resolution
S1 = S0 // 2         # 8  : neck / detect-scale-0 resolution
S2 = S1 // 2         # 4  : detect-scale-1 resolution


# -----------------------------------------------------------------------------
# Constant 0/1 spatial-selection matrices (right-multiplication on the
# lane-dense (C, H*W) layout).  Built once; ~136 KB total, DMA'd to VMEM once.
# -----------------------------------------------------------------------------
def _downsample_matrix(h, w):
    """(h*w, (h//2)*(w//2)): picks every 2nd row/col, i.e. turns a stride-1
    'same' conv result into the stride-2 conv result."""
    ho, wo = h // 2, w // 2
    fo = jnp.arange(ho * wo)
    src = 2 * (fo // wo) * w + 2 * (fo % wo)
    return (jnp.arange(h * w)[:, None] == src[None, :]).astype(jnp.float32)


def _upsample_matrix(h, w):
    """(h*w, (2h)*(2w)): nearest-neighbour 2x upsample as a selection matmul."""
    wo = 2 * w
    fo = jnp.arange(2 * h * wo)
    src = ((fo // wo) // 2) * w + ((fo % wo) // 2)
    return (jnp.arange(h * w)[:, None] == src[None, :]).astype(jnp.float32)


_D_16_TO_8 = _downsample_matrix(S0, S0)    # (256, 64)
_D_8_TO_4 = _downsample_matrix(S1, S1)     # (64, 16)
_U_4_TO_8 = _upsample_matrix(S2, S2)       # (16, 64)
_U_8_TO_16 = _upsample_matrix(S1, S1)      # (64, 256)


# -----------------------------------------------------------------------------
# The fused Pallas kernel: one grid step == the full forward for ONE image.
# -----------------------------------------------------------------------------
def _mcnet_fused_kernel(
    # inputs ------------------------------------------------------------------
    p0_ref,                      # (1, 27, 256)  layer-0 im2col patches
    w0_ref, b0_ref,              # (8, 27), (8, 1)
    w1_ref, b1_ref,              # (9, 16, 8), (16, 1)
    w2_ref, b2_ref,              # (9, 32, 16), (32, 1)
    w5_ref, b5_ref,              # (16, 48), (16, 1)
    wd0_ref, bd0_ref,            # (45, 16), (45, 1)   detect scale 0
    wd1_ref, bd1_ref,            # (45, 32), (45, 1)   detect scale 1
    w710_ref, b710_ref,          # (9, 16, 16), (16, 1)  layers 7+10 merged
    w912_ref, b912_ref,          # (9, 4, 16),  (4, 1)   layers 9+12 merged
    d16_ref, d8_ref,             # stride-2 subsample matrices
    u4_ref, u8_ref,              # nearest-2x upsample matrices
    # outputs -----------------------------------------------------------------
    det0_ref,                    # (1, 45, 64)
    det1_ref,                    # (1, 45, 16)
    seg_ref,                     # (1, 4, 256)  rows 0:2 layer-9, rows 2:4 layer-12
    # scratch -----------------------------------------------------------------
    pad_ref,                     # (16, S0*S0 + 2*(S0+1)) zero-padded staging buffer
):
    f32 = jnp.float32

    def sigmoid(v):                       # exact divide for the seg outputs
        return 1.0 / (1.0 + jnp.exp(-v))

    def silu(v):                          # exp + approx reciprocal -> EUP slot
        return v * pl.reciprocal(1.0 + jnp.exp(-v), approx=True)

    def conv3x3(x, w_ref, side):
        """3x3 / stride-1 / pad-1 conv, (Cin, side*side) -> (Cout, side*side).

        In-kernel im2col: the input is staged once into a zero-padded VMEM
        row buffer; each of the 9 taps is a shifted slice (border-masked) fed
        to the MXU as a (Cout,Cin) x (Cin,HW) matmul, accumulated in f32.
        """
        cin, hw = x.shape
        cout = w_ref.shape[1]
        off = side + 1                    # covers every shift in [-(side+1), side+1]
        pad_ref[0:cin, 0:off] = jnp.zeros((cin, off), f32)
        pad_ref[0:cin, off:off + hw] = x
        pad_ref[0:cin, off + hw:off + hw + off] = jnp.zeros((cin, off), f32)

        lane = jax.lax.broadcasted_iota(jnp.int32, (1, hw), 1)
        col = lane & (side - 1)           # side is a power of two
        row = lane >> (side.bit_length() - 1)

        acc = jnp.zeros((cout, hw), f32)
        for kh in range(3):
            dh = kh - 1
            for kw in range(3):
                dw = kw - 1
                start = off + dh * side + dw
                tap = pad_ref[0:cin, start:start + hw]
                conds = []
                if dh < 0:
                    conds.append(row >= -dh)
                if dh > 0:
                    conds.append(row < side - dh)
                if dw < 0:
                    conds.append(col >= -dw)
                if dw > 0:
                    conds.append(col < side - dw)
                if conds:
                    m = conds[0]
                    for c in conds[1:]:
                        m = m & c
                    tap = tap * m.astype(f32)
                acc = acc + jnp.dot(w_ref[kh * 3 + kw], tap,
                                    preferred_element_type=f32)
        return acc

    # --- layer 0: Conv(3->8, k3, s2).  im2col of the (HBM-resident) network
    #     input was done in the wrapper, so in-kernel it is one lane-dense matmul.
    a0 = silu(jnp.dot(w0_ref[...], p0_ref[0], preferred_element_type=f32)
              + b0_ref[...])                                          # (8, 256)

    # --- layer 1: Conv(8->16, k3, s2) = stride-1 conv at 16x16 + 2x subsample.
    a1 = silu(jnp.dot(conv3x3(a0, w1_ref, S0), d16_ref[...],
                      preferred_element_type=f32) + b1_ref[...])      # (16, 64)

    # --- layer 2: Conv(16->32, k3, s2): 8x8 -> 4x4.
    a2 = silu(jnp.dot(conv3x3(a1, w2_ref, S1), d8_ref[...],
                      preferred_element_type=f32) + b2_ref[...])      # (32, 16)

    # --- layer 3: nearest-2x upsample 4x4 -> 8x8 (selection matmul).
    a3 = jnp.dot(a2, u4_ref[...], preferred_element_type=f32)         # (32, 64)

    # --- layer 4: channel concat [layer3, layer1].
    a4 = jnp.concatenate([a3, a1], axis=0)                            # (48, 64)

    # --- layer 5: Conv(48->16, k1, s1).
    a5 = silu(jnp.dot(w5_ref[...], a4, preferred_element_type=f32)
              + b5_ref[...])                                          # (16, 64)

    # --- layer 6: Detect (training mode): one 1x1 conv per scale, no activation.
    det0_ref[0] = (jnp.dot(wd0_ref[...], a5, preferred_element_type=f32)
                   + bd0_ref[...])                                    # (45, 64)
    det1_ref[0] = (jnp.dot(wd1_ref[...], a2, preferred_element_type=f32)
                   + bd1_ref[...])                                    # (45, 16)

    # --- layers 7 & 10 (merged): two Conv(16->8, k3, s1) heads on layer-5 out.
    a710 = silu(conv3x3(a5, w710_ref, S1) + b710_ref[...])            # (16, 64)

    # --- layers 8 & 11 (merged): nearest-2x upsample 8x8 -> 16x16.
    a811 = jnp.dot(a710, u8_ref[...], preferred_element_type=f32)     # (16, 256)

    # --- layers 9 & 12 (merged, block-diagonal Conv(8->2, k3, s1)) + the
    #     nn.Sigmoid() MCnet.forward applies to both segmentation outputs.
    seg = conv3x3(a811, w912_ref, S0) + b912_ref[...]                 # (4, 256)
    seg_ref[0] = sigmoid(seg)


# -----------------------------------------------------------------------------
# Wrapper-side glue: layer-0 im2col (its input already lives in HBM), parameter
# init (BatchNorm folded to identity -- initialize_weights only touches
# eps/momentum), and the output layout expected from the PyTorch module.
# -----------------------------------------------------------------------------
def _im2col_layer0(x_nchw):
    """3x3 / stride-2 / pad-1 im2col of the raw NCHW input -> (N, 27, 256).
    K-axis order is (kh, kw, c_in); trailing axis is the flattened 16x16 grid."""
    n, c, h, w = x_nchw.shape
    k, s, p = 3, 2, 1
    ho = (h + 2 * p - k) // s + 1
    wo = (w + 2 * p - k) // s + 1
    xp = jnp.pad(x_nchw, ((0, 0), (0, 0), (p, p), (p, p)))
    taps = []
    for kh in range(k):
        for kw in range(k):
            sl = xp[:, :, kh:kh + (ho - 1) * s + 1:s, kw:kw + (wo - 1) * s + 1:s]
            taps.append(sl.reshape(n, c, ho * wo))
    return jnp.concatenate(taps, axis=1)


def _conv_w(key, c_out, c_in, k):
    """Per-tap conv weights, (k*k, c_out, c_in), 1/sqrt(fan_in) scale."""
    fan_in = c_in * k * k
    return jax.random.normal(key, (k * k, c_out, c_in), jnp.float32) / math.sqrt(fan_in)


def _detect_bias(stride):
    """MCnet._initialize_biases (cf=None branch)."""
    b = jnp.zeros((NA, NO), jnp.float32)
    b = b.at[:, 4].add(math.log(8.0 / (640.0 / stride) ** 2))
    b = b.at[:, 5:].add(math.log(0.6 / (NC - 0.99)))
    return b.reshape(-1)


def init_params(key):
    ks = jax.random.split(key, 10)
    p = {}
    # layer 0: weight pre-flattened to (Cout, k*k*Cin) with K order (kh, kw, cin)
    p["w0"] = _conv_w(ks[0], 8, 3, 3).transpose(1, 0, 2).reshape(8, 27)
    p["b0"] = jnp.zeros((8,), jnp.float32)
    p["w1"], p["b1"] = _conv_w(ks[1], 16, 8, 3), jnp.zeros((16,), jnp.float32)
    p["w2"], p["b2"] = _conv_w(ks[2], 32, 16, 3), jnp.zeros((32,), jnp.float32)
    p["w5"] = _conv_w(ks[3], 16, 48, 1)[0]             # (16, 48) 1x1 conv
    p["b5"] = jnp.zeros((16,), jnp.float32)
    # layer 6: Detect heads (1x1 convs) + _initialize_biases
    p["wd0"] = _conv_w(ks[4], NA * NO, 16, 1)[0]       # (45, 16)
    p["bd0"] = _detect_bias(DETECT_STRIDES[0])
    p["wd1"] = _conv_w(ks[5], NA * NO, 32, 1)[0]       # (45, 32)
    p["bd1"] = _detect_bias(DETECT_STRIDES[1])
    # layers 7 & 10: sibling Conv(16->8, k3) heads merged along Cout
    w7, w10 = _conv_w(ks[6], 8, 16, 3), _conv_w(ks[7], 8, 16, 3)
    p["w710"] = jnp.concatenate([w7, w10], axis=1)     # (9, 16, 16)
    p["b710"] = jnp.zeros((16,), jnp.float32)
    # layers 9 & 12: sibling Conv(8->2, k3) seg heads merged block-diagonally
    w9, w12 = _conv_w(ks[8], 2, 8, 3), _conv_w(ks[9], 2, 8, 3)
    z = jnp.zeros((9, 2, 8), jnp.float32)
    p["w912"] = jnp.concatenate(
        [jnp.concatenate([w9, z], axis=2), jnp.concatenate([z, w12], axis=2)],
        axis=1)                                        # (9, 4, 16)
    p["b912"] = jnp.zeros((4,), jnp.float32)
    return p


def mcnet_forward(x_nchw, params):
    """MCnet.forward: returns [ [det_scale0, det_scale1], da_seg, ll_seg ]."""
    x = x_nchw.astype(jnp.float32)
    n = x.shape[0]
    p0 = _im2col_layer0(x)                             # (N, 27, 256)

    def b2d(b):
        return b.reshape(-1, 1)

    const_inputs = (
        params["w0"], b2d(params["b0"]),
        params["w1"], b2d(params["b1"]),
        params["w2"], b2d(params["b2"]),
        params["w5"], b2d(params["b5"]),
        params["wd0"], b2d(params["bd0"]),
        params["wd1"], b2d(params["bd1"]),
        params["w710"], b2d(params["b710"]),
        params["w912"], b2d(params["b912"]),
        _D_16_TO_8, _D_8_TO_4, _U_4_TO_8, _U_8_TO_16,
    )

    def const_spec(a):
        zero = (0,) * a.ndim
        return pl.BlockSpec(a.shape, lambda b, _z=zero: _z)

    in_specs = [pl.BlockSpec((1,) + p0.shape[1:], lambda b: (b, 0, 0))]
    in_specs += [const_spec(a) for a in const_inputs]

    out_shape = (
        jax.ShapeDtypeStruct((n, NA * NO, S1 * S1), jnp.float32),   # detect 8x8
        jax.ShapeDtypeStruct((n, NA * NO, S2 * S2), jnp.float32),   # detect 4x4
        jax.ShapeDtypeStruct((n, 4, S0 * S0), jnp.float32),         # seg (da ++ ll)
    )
    out_specs = (
        pl.BlockSpec((1, NA * NO, S1 * S1), lambda b: (b, 0, 0)),
        pl.BlockSpec((1, NA * NO, S2 * S2), lambda b: (b, 0, 0)),
        pl.BlockSpec((1, 4, S0 * S0), lambda b: (b, 0, 0)),
    )

    det0, det1, seg = pl.pallas_call(
        _mcnet_fused_kernel,
        out_shape=out_shape,
        grid_spec=pltpu.PrefetchScalarGridSpec(
            num_scalar_prefetch=0,
            grid=(n,),                                  # one image per grid step
            in_specs=in_specs,
            out_specs=out_specs,
            scratch_shapes=[
                pltpu.VMEM((16, S0 * S0 + 2 * (S0 + 1)), jnp.float32)],
        ),
        compiler_params=pltpu.CompilerParams(
            dimension_semantics=("parallel",)),         # v7x: one image per TC
    )(p0, *const_inputs)

    # Detect heads: (N, na*no, ny*nx) -> (bs, na, ny, nx, no), matching
    # x.view(bs, na, no, ny, nx).permute(0, 1, 3, 4, 2) in PyTorch.
    def det_layout(d, ny, nx):
        return jnp.transpose(d.reshape(n, NA, NO, ny, nx), (0, 1, 3, 4, 2))

    det_out = [det_layout(det0, S1, S1), det_layout(det1, S2, S2)]
    da_seg = seg[:, 0:2, :].reshape(n, 2, S0, S0)       # NCHW, sigmoid already fused
    ll_seg = seg[:, 2:4, :].reshape(n, 2, S0, S0)
    return [det_out, da_seg, ll_seg]


# TODO(synk): Detect anchor rescaling / check_anchor_order have no effect on
# the training-mode forward pass reproduced here, so they are omitted.

if __name__ == "__main__":
    key = jax.random.PRNGKey(0)
    pkey, xkey = jax.random.split(key)
    params = init_params(pkey)
    x = jax.random.normal(xkey, (2, 3, IN_HW, IN_HW), jnp.float32)   # NCHW input

    fwd = jax.jit(mcnet_forward)
    outs = jax.block_until_ready(fwd(x, params))

    det_out, da_seg, ll_seg = outs
    assert det_out[0].shape == (2, NA, S1, S1, NO)
    assert det_out[1].shape == (2, NA, S2, S2, NO)
    assert da_seg.shape == (2, 2, S0, S0)
    assert ll_seg.shape == (2, 2, S0, S0)
    assert float(jnp.min(da_seg)) >= 0.0 and float(jnp.max(da_seg)) <= 1.0
    assert bool(jnp.all(jnp.isfinite(det_out[0])))
    assert bool(jnp.all(jnp.isfinite(det_out[1])))

    print("KERNEL_OK")
</pallas_src>

<mosaic_0001>
module attributes {stable_mosaic.version = 11 : i64} {
  func.func @_mcnet_fused_kernel(%arg0: i32, %arg1: memref<1x27x256xf32, #tpu.memory_space<vmem>>, %arg2: memref<8x27xf32, #tpu.memory_space<vmem>>, %arg3: memref<8x1xf32, #tpu.memory_space<vmem>>, %arg4: memref<9x16x8xf32, #tpu.memory_space<vmem>>, %arg5: memref<16x1xf32, #tpu.memory_space<vmem>>, %arg6: memref<9x32x16xf32, #tpu.memory_space<vmem>>, %arg7: memref<32x1xf32, #tpu.memory_space<vmem>>, %arg8: memref<16x48xf32, #tpu.memory_space<vmem>>, %arg9: memref<16x1xf32, #tpu.memory_space<vmem>>, %arg10: memref<45x16xf32, #tpu.memory_space<vmem>>, %arg11: memref<45x1xf32, #tpu.memory_space<vmem>>, %arg12: memref<45x32xf32, #tpu.memory_space<vmem>>, %arg13: memref<45x1xf32, #tpu.memory_space<vmem>>, %arg14: memref<9x16x16xf32, #tpu.memory_space<vmem>>, %arg15: memref<16x1xf32, #tpu.memory_space<vmem>>, %arg16: memref<9x4x16xf32, #tpu.memory_space<vmem>>, %arg17: memref<4x1xf32, #tpu.memory_space<vmem>>, %arg18: memref<256x64xf32, #tpu.memory_space<vmem>>, %arg19: memref<64x16xf32, #tpu.memory_space<vmem>>, %arg20: memref<16x64xf32, #tpu.memory_space<vmem>>, %arg21: memref<64x256xf32, #tpu.memory_space<vmem>>, %arg22: memref<1x45x64xf32, #tpu.memory_space<vmem>>, %arg23: memref<1x45x16xf32, #tpu.memory_space<vmem>>, %arg24: memref<1x4x256xf32, #tpu.memory_space<vmem>>, %arg25: memref<16x290xf32, #tpu.memory_space<vmem>>) attributes {dimension_semantics = [#tpu.dimension_semantics<parallel>], iteration_bounds = array<i64: 2>, scalar_prefetch = 0 : i64, scratch_operands = 1 : i64, tpu.core_type = #tpu.core_type<tc>, window_params = [{transform_indices = @transform_0, window_bounds = array<i64: 1, 27, 256>}, {pipeline_mode = #tpu.pipeline_mode<synchronous>, transform_indices = @transform_1, window_bounds = array<i64: 8, 27>}, {pipeline_mode = #tpu.pipeline_mode<synchronous>, transform_indices = @transform_2, window_bounds = array<i64: 8, 1>}, {pipeline_mode = #tpu.pipeline_mode<synchronous>, transform_indices = @transform_3, window_bounds = array<i64: 9, 16, 8>}, {pipeline_mode = #tpu.pipeline_mode<synchronous>, transform_indices = @transform_4, window_bounds = array<i64: 16, 1>}, {pipeline_mode = #tpu.pipeline_mode<synchronous>, transform_indices = @transform_5, window_bounds = array<i64: 9, 32, 16>}, {pipeline_mode = #tpu.pipeline_mode<synchronous>, transform_indices = @transform_6, window_bounds = array<i64: 32, 1>}, {pipeline_mode = #tpu.pipeline_mode<synchronous>, transform_indices = @transform_7, window_bounds = array<i64: 16, 48>}, {pipeline_mode = #tpu.pipeline_mode<synchronous>, transform_indices = @transform_8, window_bounds = array<i64: 16, 1>}, {pipeline_mode = #tpu.pipeline_mode<synchronous>, transform_indices = @transform_9, window_bounds = array<i64: 45, 16>}, {pipeline_mode = #tpu.pipeline_mode<synchronous>, transform_indices = @transform_10, window_bounds = array<i64: 45, 1>}, {pipeline_mode = #tpu.pipeline_mode<synchronous>, transform_indices = @transform_11, window_bounds = array<i64: 45, 32>}, {pipeline_mode = #tpu.pipeline_mode<synchronous>, transform_indices = @transform_12, window_bounds = array<i64: 45, 1>}, {pipeline_mode = #tpu.pipeline_mode<synchronous>, transform_indices = @transform_13, window_bounds = array<i64: 9, 16, 16>}, {pipeline_mode = #tpu.pipeline_mode<synchronous>, transform_indices = @transform_14, window_bounds = array<i64: 16, 1>}, {pipeline_mode = #tpu.pipeline_mode<synchronous>, transform_indices = @transform_15, window_bounds = array<i64: 9, 4, 16>}, {pipeline_mode = #tpu.pipeline_mode<synchronous>, transform_indices = @transform_16, window_bounds = array<i64: 4, 1>}, {pipeline_mode = #tpu.pipeline_mode<synchronous>, transform_indices = @transform_17, window_bounds = array<i64: 256, 64>}, {pipeline_mode = #tpu.pipeline_mode<synchronous>, transform_indices = @transform_18, window_bounds = array<i64: 64, 16>}, {pipeline_mode = #tpu.pipeline_mode<synchronous>, transform_indices = @transform_19, window_bounds = array<i64: 16, 64>}, {pipeline_mode = #tpu.pipeline_mode<synchronous>, transform_indices = @transform_20, window_bounds = array<i64: 64, 256>}, {transform_indices = @transform_21, window_bounds = array<i64: 1, 45, 64>}, {transform_indices = @transform_22, window_bounds = array<i64: 1, 45, 16>}, {transform_indices = @transform_23, window_bounds = array<i64: 1, 4, 256>}]} {
    %c0 = arith.constant 0 : index
    %c0_0 = arith.constant 0 : index
    %0 = vector.load %arg2[%c0, %c0_0] : memref<8x27xf32, #tpu.memory_space<vmem>>, vector<8x27xf32>
    %c0_1 = arith.constant 0 : index
    %c0_2 = arith.constant 0 : index
    %c0_3 = arith.constant 0 : index
    %1 = vector.load %arg1[%c0_1, %c0_2, %c0_3] : memref<1x27x256xf32, #tpu.memory_space<vmem>>, vector<1x27x256xf32>
    %2 = vector.shape_cast %1 : vector<1x27x256xf32> to vector<27x256xf32>
    %cst = arith.constant dense<0.000000e+00> : vector<8x256xf32>
    %3 = tpu.matmul %0, %2, %cst {dimension_numbers = #tpu.dot_dimension_numbers<[1], [0], [0], [1], [0, 0, 1, 1], [], []>} : vector<8x27xf32>, vector<27x256xf32>, vector<8x256xf32> -> vector<8x256xf32>
    %c0_4 = arith.constant 0 : index
    %c0_5 = arith.constant 0 : index
    %4 = vector.load %arg3[%c0_4, %c0_5] : memref<8x1xf32, #tpu.memory_space<vmem>>, vector<8x1xf32>
    %5 = vector.broadcast %4 : vector<8x1xf32> to vector<8x256xf32>
    %6 = arith.addf %3, %5 : vector<8x256xf32>
    %cst_6 = arith.constant 0.000000e+00 : f32
    %7 = vector.broadcast %cst_6 : f32 to vector<8x256xf32>
    %8 = arith.subf %7, %6 : vector<8x256xf32>
    %9 = math.exp %8 : vector<8x256xf32>
    %cst_7 = arith.constant 1.000000e+00 : f32
    %10 = vector.broadcast %cst_7 : f32 to vector<8x256xf32>
    %11 = arith.addf %10, %9 : vector<8x256xf32>
    %12 = tpu.reciprocal %11 {approx = true} : vector<8x256xf32> -> vector<8x256xf32>
    %13 = arith.mulf %6, %12 : vector<8x256xf32>
    %cst_8 = arith.constant 0.000000e+00 : f32
    %14 = vector.broadcast %cst_8 : f32 to vector<8x17xf32>
    %c0_9 = arith.constant 0 : index
    %c0_10 = arith.constant 0 : index
    %15 = vector.load %arg25[%c0_9, %c0_10] : memref<16x290xf32, #tpu.memory_space<vmem>>, vector<8x17xf32>
    tpu.vector_store %arg25[%c0_9, %c0_10], %14 {strides = array<i32>} : memref<16x290xf32, #tpu.memory_space<vmem>>, vector<8x17xf32>,
    %c0_11 = arith.constant 0 : index
    %c17 = arith.constant 17 : index
    %16 = vector.load %arg25[%c0_11, %c17] : memref<16x290xf32, #tpu.memory_space<vmem>>, vector<8x256xf32>
    tpu.vector_store %arg25[%c0_11, %c17], %13 {strides = array<i32>} : memref<16x290xf32, #tpu.memory_space<vmem>>, vector<8x256xf32>,
    %cst_12 = arith.constant 0.000000e+00 : f32
    %17 = vector.broadcast %cst_12 : f32 to vector<8x17xf32>
    %c0_13 = arith.constant 0 : index
    %c273 = arith.constant 273 : index
    %18 = vector.load %arg25[%c0_13, %c273] : memref<16x290xf32, #tpu.memory_space<vmem>>, vector<8x17xf32>
    tpu.vector_store %arg25[%c0_13, %c273], %17 {strides = array<i32>} : memref<16x290xf32, #tpu.memory_space<vmem>>, vector<8x17xf32>,
    %19 = tpu.iota {dimensions = array<i32: 1>} : vector<1x256xi32>
    %c15_i32 = arith.constant 15 : i32
    %20 = vector.broadcast %c15_i32 : i32 to vector<1x256xi32>
    %21 = arith.andi %19, %20 : vector<1x256xi32>
    %c4_i32 = arith.constant 4 : i32
    %22 = vector.broadcast %c4_i32 : i32 to vector<1x256xi32>
    %23 = arith.shrsi %19, %22 : vector<1x256xi32>
    %cst_14 = arith.constant 0.000000e+00 : f32
    %24 = vector.broadcast %cst_14 : f32 to vector<16x256xf32>
    %c0_15 = arith.constant 0 : index
    %c0_16 = arith.constant 0 : index
    %25 = vector.load %arg25[%c0_15, %c0_16] : memref<16x290xf32, #tpu.memory_space<vmem>>, vector<8x256xf32>
    %c1_i32 = arith.constant 1 : i32
    %26 = vector.broadcast %c1_i32 : i32 to vector<1x256xi32>
    %27 = arith.cmpi sge, %23, %26 : vector<1x256xi32>
    %c1_i32_17 = arith.constant 1 : i32
    %28 = vector.broadcast %c1_i32_17 : i32 to vector<1x256xi32>
    %29 = arith.cmpi sge, %21, %28 : vector<1x256xi32>
    %30 = arith.andi %27, %29 : vector<1x256xi1>
    %31 = arith.extui %30 : vector<1x256xi1> to vector<1x256xi32>
    %32 = arith.sitofp %31 : vector<1x256xi32> to vector<1x256xf32>
    %33 = vector.broadcast %32 : vector<1x256xf32> to vector<8x256xf32>
    %34 = arith.mulf %25, %33 : vector<8x256xf32>
    %c0_18 = arith.constant 0 : index
    %c0_19 = arith.constant 0 : index
    %c0_20 = arith.constant 0 : index
    %35 = vector.load %arg4[%c0_18, %c0_19, %c0_20] : memref<9x16x8xf32, #tpu.memory_space<vmem>>, vector<1x16x8xf32>
    %36 = vector.shape_cast %35 : vector<1x16x8xf32> to vector<16x8xf32>
    %cst_21 = arith.constant dense<0.000000e+00> : vector<16x256xf32>
    %37 = tpu.matmul %36, %34, %cst_21 {dimension_numbers = #tpu.dot_dimension_numbers<[1], [0], [0], [1], [0, 0, 1, 1], [], []>} : vector<16x8xf32>, vector<8x256xf32>, vector<16x256xf32> -> vector<16x256xf32>
    %38 = arith.addf %24, %37 : vector<16x256xf32>
    %c0_22 = arith.constant 0 : index
    %c1 = arith.constant 1 : index
    %39 = vector.load %arg25[%c0_22, %c1] : memref<16x290xf32, #tpu.memory_space<vmem>>, vector<8x256xf32>
    %c1_i32_23 = arith.constant 1 : i32
    %40 = vector.broadcast %c1_i32_23 : i32 to vector<1x256xi32>
    %41 = arith.cmpi sge, %23, %40 : vector<1x256xi32>
    %42 = arith.extui %41 : vector<1x256xi1> to vector<1x256xi32>
    %43 = arith.sitofp %42 : vector<1x256xi32> to vector<1x256xf32>
    %44 = vector.broadcast %43 : vector<1x256xf32> to vector<8x256xf32>
    %45 = arith.mulf %39, %44 : vector<8x256xf32>
    %c1_24 = arith.constant 1 : index
    %c0_25 = arith.constant 0 : index
    %c0_26 = arith.constant 0 : index
    %46 = vector.load %arg4[%c1_24, %c0_25, %c0_26] : memref<9x16x8xf32, #tpu.memory_space<vmem>>, vector<1x16x8xf32>
    %47 = vector.shape_cast %46 : vector<1x16x8xf32> to vector<16x8xf32>
    %cst_27 = arith.constant dense<0.000000e+00> : vector<16x256xf32>
    %48 = tpu.matmul %47, %45, %cst_27 {dimension_numbers = #tpu.dot_dimension_numbers<[1], [0], [0], [1], [0, 0, 1, 1], [], []>} : vector<16x8xf32>, vector<8x256xf32>, vector<16x256xf32> -> vector<16x256xf32>
    %49 = arith.addf %38, %48 : vector<16x256xf32>
    %c0_28 = arith.constant 0 : index
    %c2 = arith.constant 2 : index
    %50 = vector.load %arg25[%c0_28, %c2] : memref<16x290xf32, #tpu.memory_space<vmem>>, vector<8x256xf32>
    %c1_i32_29 = arith.constant 1 : i32
    %51 = vector.broadcast %c1_i32_29 : i32 to vector<1x256xi32>
    %52 = arith.cmpi sge, %23, %51 : vector<1x256xi32>
    %c15_i32_30 = arith.constant 15 : i32
    %53 = vector.broadcast %c15_i32_30 : i32 to vector<1x256xi32>
    %54 = arith.cmpi slt, %21, %53 : vector<1x256xi32>
    %55 = arith.andi %52, %54 : vector<1x256xi1>
    %56 = arith.extui %55 : vector<1x256xi1> to vector<1x256xi32>
    %57 = arith.sitofp %56 : vector<1x256xi32> to vector<1x256xf32>
    %58 = vector.broadcast %57 : vector<1x256xf32> to vector<8x256xf32>
    %59 = arith.mulf %50, %58 : vector<8x256xf32>
    %c2_31 = arith.constant 2 : index
    %c0_32 = arith.constant 0 : index
    %c0_33 = arith.constant 0 : index
    %60 = vector.load %arg4[%c2_31, %c0_32, %c0_33] : memref<9x16x8xf32, #tpu.memory_space<vmem>>, vector<1x16x8xf32>
    %61 = vector.shape_cast %60 : vector<1x16x8xf32> to vector<16x8xf32>
    %cst_34 = arith.constant dense<0.000000e+00> : vector<16x256xf32>
    %62 = tpu.matmul %61, %59, %cst_34 {dimension_numbers = #tpu.dot_dimension_numbers<[1], [0], [0], [1], [0, 0, 1, 1], [], []>} : vector<16x8xf32>, vector<8x256xf32>, vector<16x256xf32> -> vector<16x256xf32>
    %63 = arith.addf %49, %62 : vector<16x256xf32>
    %c0_35 = arith.constant 0 : index
    %c16 = arith.constant 16 : index
    %64 = vector.load %arg25[%c0_35, %c16] : memref<16x290xf32, #tpu.memory_space<vmem>>, vector<8x256xf32>
    %c1_i32_36 = arith.constant 1 : i32
    %65 = vector.broadcast %c1_i32_36 : i32 to vector<1x256xi32>
    %66 = arith.cmpi sge, %21, %65 : vector<1x256xi32>
    %67 = arith.extui %66 : vector<1x256xi1> to vector<1x256xi32>
    %68 = arith.sitofp %67 : vector<1x256xi32> to vector<1x256xf32>
    %69 = vector.broadcast %68 : vector<1x256xf32> to vector<8x256xf32>
    %70 = arith.mulf %64, %69 : vector<8x256xf32>
    %c3 = arith.constant 3 : index
    %c0_37 = arith.constant 0 : index
    %c0_38 = arith.constant 0 : index
    %71 = vector.load %arg4[%c3, %c0_37, %c0_38] : memref<9x16x8xf32, #tpu.memory_space<vmem>>, vector<1x16x8xf32>
    %72 = vector.shape_cast %71 : vector<1x16x8xf32> to vector<16x8xf32>
    %cst_39 = arith.constant dense<0.000000e+00> : vector<16x256xf32>
    %73 = tpu.matmul %72, %70, %cst_39 {dimension_numbers = #tpu.dot_dimension_numbers<[1], [0], [0], [1], [0, 0, 1, 1], [], []>} : vector<16x8xf32>, vector<8x256xf32>, vector<16x256xf32> -> vector<16x256xf32>
    %74 = arith.addf %63, %73 : vector<16x256xf32>
    %c0_40 = arith.constant 0 : index
    %c17_41 = arith.constant 17 : index
    %75 = vector.load %arg25[%c0_40, %c17_41] : memref<16x290xf32, #tpu.memory_space<vmem>>, vector<8x256xf32>
    %c4 = arith.constant 4 : index
    %c0_42 = arith.constant 0 : index
    %c0_43 = arith.constant 0 : index
    %76 = vector.load %arg4[%c4, %c0_42, %c0_43] : memref<9x16x8xf32, #tpu.memory_space<vmem>>, vector<1x16x8xf32>
    %77 = vector.shape_cast %76 : vector<1x16x8xf32> to vector<16x8xf32>
    %cst_44 = arith.constant dense<0.000000e+00> : vector<16x256xf32>
    %78 = tpu.matmul %77, %75, %cst_44 {dimension_numbers = #tpu.dot_dimension_numbers<[1], [0], [0], [1], [0, 0, 1, 1], [], []>} : vector<16x8xf32>, vector<8x256xf32>, vector<16x256xf32> -> vector<16x256xf32>
    %79 = arith.addf %74, %78 : vector<16x256xf32>
    %c0_45 = arith.constant 0 : index
    %c18 = arith.constant 18 : index
    %80 = vector.load %arg25[%c0_45, %c18] : memref<16x290xf32, #tpu.memory_space<vmem>>, vector<8x256xf32>
    %c15_i32_46 = arith.constant 15 : i32
    %81 = vector.broadcast %c15_i32_46 : i32 to vector<1x256xi32>
    %82 = arith.cmpi slt, %21, %81 : vector<1x256xi32>
    %83 = arith.extui %82 : vector<1x256xi1> to vector<1x256xi32>
    %84 = arith.sitofp %83 : vector<1x256xi32> to vector<1x256xf32>
    %85 = vector.broadcast %84 : vector<1x256xf32> to vector<8x256xf32>
    %86 = arith.mulf %80, %85 : vector<8x256xf32>
    %c5 = arith.constant 5 : index
    %c0_47 = arith.constant 0 : index
    %c0_48 = arith.constant 0 : index
    %87 = vector.load %arg4[%c5, %c0_47, %c0_48] : memref<9x16x8xf32, #tpu.memory_space<vmem>>, vector<1x16x8xf32>
    %88 = vector.shape_cast %87 : vector<1x16x8xf32> to vector<16x8xf32>
    %cst_49 = arith.constant dense<0.000000e+00> : vector<16x256xf32>
    %89 = tpu.matmul %88, %86, %cst_49 {dimension_numbers = #tpu.dot_dimension_numbers<[1], [0], [0], [1], [0, 0, 1, 1], [], []>} : vector<16x8xf32>, vector<8x256xf32>, vector<16x256xf32> -> vector<16x256xf32>
    %90 = arith.addf %79, %89 : vector<16x256xf32>
    %c0_50 = arith.constant 0 : index
    %c32 = arith.constant 32 : index
    %91 = vector.load %arg25[%c0_50, %c32] : memref<16x290xf32, #tpu.memory_space<vmem>>, vector<8x256xf32>
    %c15_i32_51 = arith.constant 15 : i32
    %92 = vector.broadcast %c15_i32_51 : i32 to vector<1x256xi32>
    %93 = arith.cmpi slt, %23, %92 : vector<1x256xi32>
    %c1_i32_52 = arith.constant 1 : i32
    %94 = vector.broadcast %c1_i32_52 : i32 to vector<1x256xi32>
    %95 = arith.cmpi sge, %21, %94 : vector<1x256xi32>
    %96 = arith.andi %93, %95 : vector<1x256xi1>
    %97 = arith.extui %96 : vector<1x256xi1> to vector<1x256xi32>
    %98 = arith.sitofp %97 : vector<1x256xi32> to vector<1x256xf32>
    %99 = vector.broadcast %98 : vector<1x256xf32> to vector<8x256xf32>
    %100 = arith.mulf %91, %99 : vector<8x256xf32>
    %c6 = arith.constant 6 : index
    %c0_53 = arith.constant 0 : index
    %c0_54 = arith.constant 0 : index
    %101 = vector.load %arg4[%c6, %c0_53, %c0_54] : memref<9x16x8xf32, #tpu.memory_space<vmem>>, vector<1x16x8xf32>
    %102 = vector.shape_cast %101 : vector<1x16x8xf32> to vector<16x8xf32>
    %cst_55 = arith.constant dense<0.000000e+00> : vector<16x256xf32>
    %103 = tpu.matmul %102, %100, %cst_55 {dimension_numbers = #tpu.dot_dimension_numbers<[1], [0], [0], [1], [0, 0, 1, 1], [], []>} : vector<16x8xf32>, vector<8x256xf32>, vector<16x256xf32> -> vector<16x256xf32>
    %104 = arith.addf %90, %103 : vector<16x256xf32>
    %c0_56 = arith.constant 0 : index
    %c33 = arith.constant 33 : index
    %105 = vector.load %arg25[%c0_56, %c33] : memref<16x290xf32, #tpu.memory_space<vmem>>, vector<8x256xf32>
    %c15_i32_57 = arith.constant 15 : i32
    %106 = vector.broadcast %c15_i32_57 : i32 to vector<1x256xi32>
    %107 = arith.cmpi slt, %23, %106 : vector<1x256xi32>
    %108 = arith.extui %107 : vector<1x256xi1> to vector<1x256xi32>
    %109 = arith.sitofp %108 : vector<1x256xi32> to vector<1x256xf32>
    %110 = vector.broadcast %109 : vector<1x256xf32> to vector<8x256xf32>
    %111 = arith.mulf %105, %110 : vector<8x256xf32>
    %c7 = arith.constant 7 : index
    %c0_58 = arith.constant 0 : index
    %c0_59 = arith.constant 0 : index
    %112 = vector.load %arg4[%c7, %c0_58, %c0_59] : memref<9x16x8xf32, #tpu.memory_space<vmem>>, vector<1x16x8xf32>
    %113 = vector.shape_cast %112 : vector<1x16x8xf32> to vector<16x8xf32>
    %cst_60 = arith.constant dense<0.000000e+00> : vector<16x256xf32>
    %114 = tpu.matmul %113, %111, %cst_60 {dimension_numbers = #tpu.dot_dimension_numbers<[1], [0], [0], [1], [0, 0, 1, 1], [], []>} : vector<16x8xf32>, vector<8x256xf32>, vector<16x256xf32> -> vector<16x256xf32>
    %115 = arith.addf %104, %114 : vector<16x256xf32>
    %c0_61 = arith.constant 0 : index
    %c34 = arith.constant 34 : index
    %116 = vector.load %arg25[%c0_61, %c34] : memref<16x290xf32, #tpu.memory_space<vmem>>, vector<8x256xf32>
    %c15_i32_62 = arith.constant 15 : i32
    %117 = vector.broadcast %c15_i32_62 : i32 to vector<1x256xi32>
    %118 = arith.cmpi slt, %23, %117 : vector<1x256xi32>
    %c15_i32_63 = arith.constant 15 : i32
    %119 = vector.broadcast %c15_i32_63 : i32 to vector<1x256xi32>
    %120 = arith.cmpi slt, %21, %119 : vector<1x256xi32>
    %121 = arith.andi %118, %120 : vector<1x256xi1>
    %122 = arith.extui %121 : vector<1x256xi1> to vector<1x256xi32>
    %123 = arith.sitofp %122 : vector<1x256xi32> to vector<1x256xf32>
    %124 = vector.broadcast %123 : vector<1x256xf32> to vector<8x256xf32>
    %125 = arith.mulf %116, %124 : vector<8x256xf32>
    %c8 = arith.constant 8 : index
    %c0_64 = arith.constant 0 : index
    %c0_65 = arith.constant 0 : index
    %126 = vector.load %arg4[%c8, %c0_64, %c0_65] : memref<9x16x8xf32, #tpu.memory_space<vmem>>, vector<1x16x8xf32>
    %127 = vector.shape_cast %126 : vector<1x16x8xf32> to vector<16x8xf32>
    %cst_66 = arith.constant dense<0.000000e+00> : vector<16x256xf32>
    %128 = tpu.matmul %127, %125, %cst_66 {dimension_numbers = #tpu.dot_dimension_numbers<[1], [0], [0], [1], [0, 0, 1, 1], [], []>} : vector<16x8xf32>, vector<8x256xf32>, vector<16x256xf32> -> vector<16x256xf32>
    %129 = arith.addf %115, %128 : vector<16x256xf32>
    %c0_67 = arith.constant 0 : index
    %c0_68 = arith.constant 0 : index
    %130 = vector.load %arg18[%c0_67, %c0_68] : memref<256x64xf32, #tpu.memory_space<vmem>>, vector<256x64xf32>
    %cst_69 = arith.constant dense<0.000000e+00> : vector<16x64xf32>
    %131 = tpu.matmul %129, %130, %cst_69 {dimension_numbers = #tpu.dot_dimension_numbers<[1], [0], [0], [1], [0, 0, 1, 1], [], []>} : vector<16x256xf32>, vector<256x64xf32>, vector<16x64xf32> -> vector<16x64xf32>
    %c0_70 = arith.constant 0 : index
    %c0_71 = arith.constant 0 : index
    %132 = vector.load %arg5[%c0_70, %c0_71] : memref<16x1xf32, #tpu.memory_space<vmem>>, vector<16x1xf32>
    %133 = vector.broadcast %132 : vector<16x1xf32> to vector<16x64xf32>
    %134 = arith.addf %131, %133 : vector<16x64xf32>
    %cst_72 = arith.constant 0.000000e+00 : f32
    %135 = vector.broadcast %cst_72 : f32 to vector<16x64xf32>
    %136 = arith.subf %135, %134 : vector<16x64xf32>
    %137 = math.exp %136 : vector<16x64xf32>
    %cst_73 = arith.constant 1.000000e+00 : f32
    %138 = vector.broadcast %cst_73 : f32 to vector<16x64xf32>
    %139 = arith.addf %138, %137 : vector<16x64xf32>
    %140 = tpu.reciprocal %139 {approx = true} : vector<16x64xf32> -> vector<16x64xf32>
    %141 = arith.mulf %134, %140 : vector<16x64xf32>
    %cst_74 = arith.constant 0.000000e+00 : f32
    %142 = vector.broadcast %cst_74 : f32 to vector<16x9xf32>
    %c0_75 = arith.constant 0 : index
    %c0_76 = arith.constant 0 : index
    %143 = vector.load %arg25[%c0_75, %c0_76] : memref<16x290xf32, #tpu.memory_space<vmem>>, vector<16x9xf32>
    tpu.vector_store %arg25[%c0_75, %c0_76], %142 {strides = array<i32>} : memref<16x290xf32, #tpu.memory_space<vmem>>, vector<16x9xf32>,
    %c0_77 = arith.constant 0 : index
    %c9 = arith.constant 9 : index
    %144 = vector.load %arg25[%c0_77, %c9] : memref<16x290xf32, #tpu.memory_space<vmem>>, vector<16x64xf32>
    tpu.vector_store %arg25[%c0_77, %c9], %141 {strides = array<i32>} : memref<16x290xf32, #tpu.memory_space<vmem>>, vector<16x64xf32>,
    %cst_78 = arith.constant 0.000000e+00 : f32
    %145 = vector.broadcast %cst_78 : f32 to vector<16x9xf32>
    %c0_79 = arith.constant 0 : index
    %c73 = arith.constant 73 : index
    %146 = vector.load %arg25[%c0_79, %c73] : memref<16x290xf32, #tpu.memory_space<vmem>>, vector<16x9xf32>
    tpu.vector_store %arg25[%c0_79, %c73], %145 {strides = array<i32>} : memref<16x290xf32, #tpu.memory_space<vmem>>, vector<16x9xf32>,
    %147 = tpu.iota {dimensions = array<i32: 1>} : vector<1x64xi32>
    %c7_i32 = arith.constant 7 : i32
    %148 = vector.broadcast %c7_i32 : i32 to vector<1x64xi32>
    %149 = arith.andi %147, %148 : vector<1x64xi32>
    %c3_i32 = arith.constant 3 : i32
    %150 = vector.broadcast %c3_i32 : i32 to vector<1x64xi32>
    %151 = arith.shrsi %147, %150 : vector<1x64xi32>
    %cst_80 = arith.constant 0.000000e+00 : f32
    %152 = vector.broadcast %cst_80 : f32 to vector<32x64xf32>
    %c0_81 = arith.constant 0 : index
    %c0_82 = arith.constant 0 : index
    %153 = vector.load %arg25[%c0_81, %c0_82] : memref<16x290xf32, #tpu.memory_space<vmem>>, vector<16x64xf32>
    %c1_i32_83 = arith.constant 1 : i32
    %154 = vector.broadcast %c1_i32_83 : i32 to vector<1x64xi32>
    %155 = arith.cmpi sge, %151, %154 : vector<1x64xi32>
    %c1_i32_84 = arith.constant 1 : i32
    %156 = vector.broadcast %c1_i32_84 : i32 to vector<1x64xi32>
    %157 = arith.cmpi sge, %149, %156 : vector<1x64xi32>
    %158 = arith.andi %155, %157 : vector<1x64xi1>
    %159 = arith.extui %158 : vector<1x64xi1> to vector<1x64xi32>
    %160 = arith.sitofp %159 : vector<1x64xi32> to vector<1x64xf32>
    %161 = vector.broadcast %160 : vector<1x64xf32> to vector<16x64xf32>
    %162 = arith.mulf %153, %161 : vector<16x64xf32>
    %c0_85 = arith.constant 0 : index
    %c0_86 = arith.constant 0 : index
    %c0_87 = arith.constant 0 : index
    %163 = vector.load %arg6[%c0_85, %c0_86, %c0_87] : memref<9x32x16xf32, #tpu.memory_space<vmem>>, vector<1x32x16xf32>
    %164 = vector.shape_cast %163 : vector<1x32x16xf32> to vector<32x16xf32>
    %cst_88 = arith.constant dense<0.000000e+00> : vector<32x64xf32>
    %165 = tpu.matmul %164, %162, %cst_88 {dimension_numbers = #tpu.dot_dimension_numbers<[1], [0], [0], [1], [0, 0, 1, 1], [], []>} : vector<32x16xf32>, vector<16x64xf32>, vector<32x64xf32> -> vector<32x64xf32>
    %166 = arith.addf %152, %165 : vector<32x64xf32>
    %c0_89 = arith.constant 0 : index
    %c1_90 = arith.constant 1 : index
    %167 = vector.load %arg25[%c0_89, %c1_90] : memref<16x290xf32, #tpu.memory_space<vmem>>, vector<16x64xf32>
    %c1_i32_91 = arith.constant 1 : i32
    %168 = vector.broadcast %c1_i32_91 : i32 to vector<1x64xi32>
    %169 = arith.cmpi sge, %151, %168 : vector<1x64xi32>
    %170 = arith.extui %169 : vector<1x64xi1> to vector<1x64xi32>
    %171 = arith.sitofp %170 : vector<1x64xi32> to vector<1x64xf32>
    %172 = vector.broadcast %171 : vector<1x64xf32> to vector<16x64xf32>
    %173 = arith.mulf %167, %172 : vector<16x64xf32>
    %c1_92 = arith.constant 1 : index
    %c0_93 = arith.constant 0 : index
    %c0_94 = arith.constant 0 : index
    %174 = vector.load %arg6[%c1_92, %c0_93, %c0_94] : memref<9x32x16xf32, #tpu.memory_space<vmem>>, vector<1x32x16xf32>
    %175 = vector.shape_cast %174 : vector<1x32x16xf32> to vector<32x16xf32>
    %cst_95 = arith.constant dense<0.000000e+00> : vector<32x64xf32>
    %176 = tpu.matmul %175, %173, %cst_95 {dimension_numbers = #tpu.dot_dimension_numbers<[1], [0], [0], [1], [0, 0, 1, 1], [], []>} : vector<32x16xf32>, vector<16x64xf32>, vector<32x64xf32> -> vector<32x64xf32>
    %177 = arith.addf %166, %176 : vector<32x64xf32>
    %c0_96 = arith.constant 0 : index
    %c2_97 = arith.constant 2 : index
    %178 = vector.load %arg25[%c0_96, %c2_97] : memref<16x290xf32, #tpu.memory_space<vmem>>, vector<16x64xf32>
    %c1_i32_98 = arith.constant 1 : i32
    %179 = vector.broadcast %c1_i32_98 : i32 to vector<1x64xi32>
    %180 = arith.cmpi sge, %151, %179 : vector<1x64xi32>
    %c7_i32_99 = arith.constant 7 : i32
    %181 = vector.broadcast %c7_i32_99 : i32 to vector<1x64xi32>
    %182 = arith.cmpi slt, %149, %181 : vector<1x64xi32>
    %183 = arith.andi %180, %182 : vector<1x64xi1>
    %184 = arith.extui %183 : vector<1x64xi1> to vector<1x64xi32>
    %185 = arith.sitofp %184 : vector<1x64xi32> to vector<1x64xf32>
    %186 = vector.broadcast %185 : vector<1x64xf32> to vector<16x64xf32>
    %187 = arith.mulf %178, %186 : vector<16x64xf32>
    %c2_100 = arith.constant 2 : index
    %c0_101 = arith.constant 0 : index
    %c0_102 = arith.constant 0 : index
    %188 = vector.load %arg6[%c2_100, %c0_101, %c0_102] : memref<9x32x16xf32, #tpu.memory_space<vmem>>, vector<1x32x16xf32>
    %189 = vector.shape_cast %188 : vector<1x32x16xf32> to vector<32x16xf32>
    %cst_103 = arith.constant dense<0.000000e+00> : vector<32x64xf32>
    %190 = tpu.matmul %189, %187, %cst_103 {dimension_numbers = #tpu.dot_dimension_numbers<[1], [0], [0], [1], [0, 0, 1, 1], [], []>} : vector<32x16xf32>, vector<16x64xf32>, vector<32x64xf32> -> vector<32x64xf32>
    %191 = arith.addf %177, %190 : vector<32x64xf32>
    %c0_104 = arith.constant 0 : index
    %c8_105 = arith.constant 8 : index
    %192 = vector.load %arg25[%c0_104, %c8_105] : memref<16x290xf32, #tpu.memory_space<vmem>>, vector<16x64xf32>
    %c1_i32_106 = arith.constant 1 : i32
    %193 = vector.broadcast %c1_i32_106 : i32 to vector<1x64xi32>
    %194 = arith.cmpi sge, %149, %193 : vector<1x64xi32>
    %195 = arith.extui %194 : vector<1x64xi1> to vector<1x64xi32>
    %196 = arith.sitofp %195 : vector<1x64xi32> to vector<1x64xf32>
    %197 = vector.broadcast %196 : vector<1x64xf32> to vector<16x64xf32>
    %198 = arith.mulf %192, %197 : vector<16x64xf32>
    %c3_107 = arith.constant 3 : index
    %c0_108 = arith.constant 0 : index
    %c0_109 = arith.constant 0 : index
    %199 = vector.load %arg6[%c3_107, %c0_108, %c0_109] : memref<9x32x16xf32, #tpu.memory_space<vmem>>, vector<1x32x16xf32>
    %200 = vector.shape_cast %199 : vector<1x32x16xf32> to vector<32x16xf32>
    %cst_110 = arith.constant dense<0.000000e+00> : vector<32x64xf32>
    %201 = tpu.matmul %200, %198, %cst_110 {dimension_numbers = #tpu.dot_dimension_numbers<[1], [0], [0], [1], [0, 0, 1, 1], [], []>} : vector<32x16xf32>, vector<16x64xf32>, vector<32x64xf32> -> vector<32x64xf32>
    %202 = arith.addf %191, %201 : vector<32x64xf32>
    %c0_111 = arith.constant 0 : index
    %c9_112 = arith.constant 9 : index
    %203 = vector.load %arg25[%c0_111, %c9_112] : memref<16x290xf32, #tpu.memory_space<vmem>>, vector<16x64xf32>
    %c4_113 = arith.constant 4 : index
    %c0_114 = arith.constant 0 : index
    %c0_115 = arith.constant 0 : index
    %204 = vector.load %arg6[%c4_113, %c0_114, %c0_115] : memref<9x32x16xf32, #tpu.memory_space<vmem>>, vector<1x32x16xf32>
    %205 = vector.shape_cast %204 : vector<1x32x16xf32> to vector<32x16xf32>
    %cst_116 = arith.constant dense<0.000000e+00> : vector<32x64xf32>
    %206 = tpu.matmul %205, %203, %cst_116 {dimension_numbers = #tpu.dot_dimension_numbers<[1], [0], [0], [1], [0, 0, 1, 1], [], []>} : vector<32x16xf32>, vector<16x64xf32>, vector<32x64xf32> -> vector<32x64xf32>
    %207 = arith.addf %202, %206 : vector<32x64xf32>
    %c0_117 = arith.constant 0 : index
    %c10 = arith.constant 10 : index
    %208 = vector.load %arg25[%c0_117, %c10] : memref<16x290xf32, #tpu.memory_space<vmem>>, vector<16x64xf32>
    %c7_i32_118 = arith.constant 7 : i32
    %209 = vector.broadcast %c7_i32_118 : i32 to vector<1x64xi32>
    %210 = arith.cmpi slt, %149, %209 : vector<1x64xi32>
    %211 = arith.extui %210 : vector<1x64xi1> to vector<1x64xi32>
    %212 = arith.sitofp %211 : vector<1x64xi32> to vector<1x64xf32>
    %213 = vector.broadcast %212 : vector<1x64xf32> to vector<16x64xf32>
    %214 = arith.mulf %208, %213 : vector<16x64xf32>
    %c5_119 = arith.constant 5 : index
    %c0_120 = arith.constant 0 : index
    %c0_121 = arith.constant 0 : index
    %215 = vector.load %arg6[%c5_119, %c0_120, %c0_121] : memref<9x32x16xf32, #tpu.memory_space<vmem>>, vector<1x32x16xf32>
    %216 = vector.shape_cast %215 : vector<1x32x16xf32> to vector<32x16xf32>
    %cst_122 = arith.constant dense<0.000000e+00> : vector<32x64xf32>
    %217 = tpu.matmul %216, %214, %cst_122 {dimension_numbers = #tpu.dot_dimension_numbers<[1], [0], [0], [1], [0, 0, 1, 1], [], []>} : vector<32x16xf32>, vector<16x64xf32>, vector<32x64xf32> -> vector<32x64xf32>
    %218 = arith.addf %207, %217 : vector<32x64xf32>
    %c0_123 = arith.constant 0 : index
    %c16_124 = arith.constant 16 : index
    %219 = vector.load %arg25[%c0_123, %c16_124] : memref<16x290xf32, #tpu.memory_space<vmem>>, vector<16x64xf32>
    %c7_i32_125 = arith.constant 7 : i32
    %220 = vector.broadcast %c7_i32_125 : i32 to vector<1x64xi32>
    %221 = arith.cmpi slt, %151, %220 : vector<1x64xi32>
    %c1_i32_126 = arith.constant 1 : i32
    %222 = vector.broadcast %c1_i32_126 : i32 to vector<1x64xi32>
    %223 = arith.cmpi sge, %149, %222 : vector<1x64xi32>
    %224 = arith.andi %221, %223 : vector<1x64xi1>
    %225 = arith.extui %224 : vector<1x64xi1> to vector<1x64xi32>
    %226 = arith.sitofp %225 : vector<1x64xi32> to vector<1x64xf32>
    %227 = vector.broadcast %226 : vector<1x64xf32> to vector<16x64xf32>
    %228 = arith.mulf %219, %227 : vector<16x64xf32>
    %c6_127 = arith.constant 6 : index
    %c0_128 = arith.constant 0 : index
    %c0_129 = arith.constant 0 : index
    %229 = vector.load %arg6[%c6_127, %c0_128, %c0_129] : memref<9x32x16xf32, #tpu.memory_space<vmem>>, vector<1x32x16xf32>
    %230 = vector.shape_cast %229 : vector<1x32x16xf32> to vector<32x16xf32>
    %cst_130 = arith.constant dense<0.000000e+00> : vector<32x64xf32>
    %231 = tpu.matmul %230, %228, %cst_130 {dimension_numbers = #tpu.dot_dimension_numbers<[1], [0], [0], [1], [0, 0, 1, 1], [], []>} : vector<32x16xf32>, vector<16x64xf32>, vector<32x64xf32> -> vector<32x64xf32>
    %232 = arith.addf %218, %231 : vector<32x64xf32>
    %c0_131 = arith.constant 0 : index
    %c17_132 = arith.constant 17 : index
    %233 = vector.load %arg25[%c0_131, %c17_132] : memref<16x290xf32, #tpu.memory_space<vmem>>, vector<16x64xf32>
    %c7_i32_133 = arith.constant 7 : i32
    %234 = vector.broadcast %c7_i32_133 : i32 to vector<1x64xi32>
    %235 = arith.cmpi slt, %151, %234 : vector<1x64xi32>
    %236 = arith.extui %235 : vector<1x64xi1> to vector<1x64xi32>
    %237 = arith.sitofp %236 : vector<1x64xi32> to vector<1x64xf32>
    %238 = vector.broadcast %237 : vector<1x64xf32> to vector<16x64xf32>
    %239 = arith.mulf %233, %238 : vector<16x64xf32>
    %c7_134 = arith.constant 7 : index
    %c0_135 = arith.constant 0 : index
    %c0_136 = arith.constant 0 : index
    %240 = vector.load %arg6[%c7_134, %c0_135, %c0_136] : memref<9x32x16xf32, #tpu.memory_space<vmem>>, vector<1x32x16xf32>
    %241 = vector.shape_cast %240 : vector<1x32x16xf32> to vector<32x16xf32>
    %cst_137 = arith.constant dense<0.000000e+00> : vector<32x64xf32>
    %242 = tpu.matmul %241, %239, %cst_137 {dimension_numbers = #tpu.dot_dimension_numbers<[1], [0], [0], [1], [0, 0, 1, 1], [], []>} : vector<32x16xf32>, vector<16x64xf32>, vector<32x64xf32> -> vector<32x64xf32>
    %243 = arith.addf %232, %242 : vector<32x64xf32>
    %c0_138 = arith.constant 0 : index
    %c18_139 = arith.constant 18 : index
    %244 = vector.load %arg25[%c0_138, %c18_139] : memref<16x290xf32, #tpu.memory_space<vmem>>, vector<16x64xf32>
    %c7_i32_140 = arith.constant 7 : i32
    %245 = vector.broadcast %c7_i32_140 : i32 to vector<1x64xi32>
    %246 = arith.cmpi slt, %151, %245 : vector<1x64xi32>
    %c7_i32_141 = arith.constant 7 : i32
    %247 = vector.broadcast %c7_i32_141 : i32 to vector<1x64xi32>
    %248 = arith.cmpi slt, %149, %247 : vector<1x64xi32>
    %249 = arith.andi %246, %248 : vector<1x64xi1>
    %250 = arith.extui %249 : vector<1x64xi1> to vector<1x64xi32>
    %251 = arith.sitofp %250 : vector<1x64xi32> to vector<1x64xf32>
    %252 = vector.broadcast %251 : vector<1x64xf32> to vector<16x64xf32>
    %253 = arith.mulf %244, %252 : vector<16x64xf32>
    %c8_142 = arith.constant 8 : index
    %c0_143 = arith.constant 0 : index
    %c0_144 = arith.constant 0 : index
    %254 = vector.load %arg6[%c8_142, %c0_143, %c0_144] : memref<9x32x16xf32, #tpu.memory_space<vmem>>, vector<1x32x16xf32>
    %255 = vector.shape_cast %254 : vector<1x32x16xf32> to vector<32x16xf32>
    %cst_145 = arith.constant dense<0.000000e+00> : vector<32x64xf32>
    %256 = tpu.matmul %255, %253, %cst_145 {dimension_numbers = #tpu.dot_dimension_numbers<[1], [0], [0], [1], [0, 0, 1, 1], [], []>} : vector<32x16xf32>, vector<16x64xf32>, vector<32x64xf32> -> vector<32x64xf32>
    %257 = arith.addf %243, %256 : vector<32x64xf32>
    %c0_146 = arith.constant 0 : index
    %c0_147 = arith.constant 0 : index
    %258 = vector.load %arg19[%c0_146, %c0_147] : memref<64x16xf32, #tpu.memory_space<vmem>>, vector<64x16xf32>
    %cst_148 = arith.constant dense<0.000000e+00> : vector<32x16xf32>
    %259 = tpu.matmul %257, %258, %cst_148 {dimension_numbers = #tpu.dot_dimension_numbers<[1], [0], [0], [1], [0, 0, 1, 1], [], []>} : vector<32x64xf32>, vector<64x16xf32>, vector<32x16xf32> -> vector<32x16xf32>
    %c0_149 = arith.constant 0 : index
    %c0_150 = arith.constant 0 : index
    %260 = vector.load %arg7[%c0_149, %c0_150] : memref<32x1xf32, #tpu.memory_space<vmem>>, vector<32x1xf32>
    %261 = vector.broadcast %260 : vector<32x1xf32> to vector<32x16xf32>
    %262 = arith.addf %259, %261 : vector<32x16xf32>
    %cst_151 = arith.constant 0.000000e+00 : f32
    %263 = vector.broadcast %cst_151 : f32 to vector<32x16xf32>
    %264 = arith.subf %263, %262 : vector<32x16xf32>
    %265 = math.exp %264 : vector<32x16xf32>
    %cst_152 = arith.constant 1.000000e+00 : f32
    %266 = vector.broadcast %cst_152 : f32 to vector<32x16xf32>
    %267 = arith.addf %266, %265 : vector<32x16xf32>
    %268 = tpu.reciprocal %267 {approx = true} : vector<32x16xf32> -> vector<32x16xf32>
    %269 = arith.mulf %262, %268 : vector<32x16xf32>
    %c0_153 = arith.constant 0 : index
    %c0_154 = arith.constant 0 : index
    %270 = vector.load %arg20[%c0_153, %c0_154] : memref<16x64xf32, #tpu.memory_space<vmem>>, vector<16x64xf32>
    %cst_155 = arith.constant dense<0.000000e+00> : vector<32x64xf32>
    %271 = tpu.matmul %269, %270, %cst_155 {dimension_numbers = #tpu.dot_dimension_numbers<[1], [0], [0], [1], [0, 0, 1, 1], [], []>} : vector<32x16xf32>, vector<16x64xf32>, vector<32x64xf32> -> vector<32x64xf32>
    %272 = tpu.concatenate %271, %141 in 0 : vector<32x64xf32>, vector<16x64xf32> -> vector<48x64xf32>
    %c0_156 = arith.constant 0 : index
    %c0_157 = arith.constant 0 : index
    %273 = vector.load %arg8[%c0_156, %c0_157] : memref<16x48xf32, #tpu.memory_space<vmem>>, vector<16x48xf32>
    %cst_158 = arith.constant dense<0.000000e+00> : vector<16x64xf32>
    %274 = tpu.matmul %273, %272, %cst_158 {dimension_numbers = #tpu.dot_dimension_numbers<[1], [0], [0], [1], [0, 0, 1, 1], [], []>} : vector<16x48xf32>, vector<48x64xf32>, vector<16x64xf32> -> vector<16x64xf32>
    %c0_159 = arith.constant 0 : index
    %c0_160 = arith.constant 0 : index
    %275 = vector.load %arg9[%c0_159, %c0_160] : memref<16x1xf32, #tpu.memory_space<vmem>>, vector<16x1xf32>
    %276 = vector.broadcast %275 : vector<16x1xf32> to vector<16x64xf32>
    %277 = arith.addf %274, %276 : vector<16x64xf32>
    %cst_161 = arith.constant 0.000000e+00 : f32
    %278 = vector.broadcast %cst_161 : f32 to vector<16x64xf32>
    %279 = arith.subf %278, %277 : vector<16x64xf32>
    %280 = math.exp %279 : vector<16x64xf32>
    %cst_162 = arith.constant 1.000000e+00 : f32
    %281 = vector.broadcast %cst_162 : f32 to vector<16x64xf32>
    %282 = arith.addf %281, %280 : vector<16x64xf32>
    %283 = tpu.reciprocal %282 {approx = true} : vector<16x64xf32> -> vector<16x64xf32>
    %284 = arith.mulf %277, %283 : vector<16x64xf32>
    %c0_163 = arith.constant 0 : index
    %c0_164 = arith.constant 0 : index
    %285 = vector.load %arg10[%c0_163, %c0_164] : memref<45x16xf32, #tpu.memory_space<vmem>>, vector<45x16xf32>
    %cst_165 = arith.constant dense<0.000000e+00> : vector<45x64xf32>
    %286 = tpu.matmul %285, %284, %cst_165 {dimension_numbers = #tpu.dot_dimension_numbers<[1], [0], [0], [1], [0, 0, 1, 1], [], []>} : vector<45x16xf32>, vector<16x64xf32>, vector<45x64xf32> -> vector<45x64xf32>
    %c0_166 = arith.constant 0 : index
    %c0_167 = arith.constant 0 : index
    %287 = vector.load %arg11[%c0_166, %c0_167] : memref<45x1xf32, #tpu.memory_space<vmem>>, vector<45x1xf32>
    %288 = vector.broadcast %287 : vector<45x1xf32> to vector<45x64xf32>
    %289 = arith.addf %286, %288 : vector<45x64xf32>
    %c0_168 = arith.constant 0 : index
    %c0_169 = arith.constant 0 : index
    %c0_170 = arith.constant 0 : index
    %290 = vector.load %arg22[%c0_168, %c0_169, %c0_170] : memref<1x45x64xf32, #tpu.memory_space<vmem>>, vector<1x45x64xf32>
    %291 = vector.shape_cast %290 : vector<1x45x64xf32> to vector<45x64xf32>
    %292 = vector.shape_cast %289 : vector<45x64xf32> to vector<1x45x64xf32>
    tpu.vector_store %arg22[%c0_168, %c0_169, %c0_170], %292 {strides = array<i32>} : memref<1x45x64xf32, #tpu.memory_space<vmem>>, vector<1x45x64xf32>,
    %c0_171 = arith.constant 0 : index
    %c0_172 = arith.constant 0 : index
    %293 = vector.load %arg12[%c0_171, %c0_172] : memref<45x32xf32, #tpu.memory_space<vmem>>, vector<45x32xf32>
    %cst_173 = arith.constant dense<0.000000e+00> : vector<45x16xf32>
    %294 = tpu.matmul %293, %269, %cst_173 {dimension_numbers = #tpu.dot_dimension_numbers<[1], [0], [0], [1], [0, 0, 1, 1], [], []>} : vector<45x32xf32>, vector<32x16xf32>, vector<45x16xf32> -> vector<45x16xf32>
    %c0_174 = arith.constant 0 : index
    %c0_175 = arith.constant 0 : index
    %295 = vector.load %arg13[%c0_174, %c0_175] : memref<45x1xf32, #tpu.memory_space<vmem>>, vector<45x1xf32>
    %296 = vector.broadcast %295 : vector<45x1xf32> to vector<45x16xf32>
    %297 = arith.addf %294, %296 : vector<45x16xf32>
    %c0_176 = arith.constant 0 : index
    %c0_177 = arith.constant 0 : index
    %c0_178 = arith.constant 0 : index
    %298 = vector.load %arg23[%c0_176, %c0_177, %c0_178] : memref<1x45x16xf32, #tpu.memory_space<vmem>>, vector<1x45x16xf32>
    %299 = vector.shape_cast %298 : vector<1x45x16xf32> to vector<45x16xf32>
    %300 = vector.shape_cast %297 : vector<45x16xf32> to vector<1x45x16xf32>
    tpu.vector_store %arg23[%c0_176, %c0_177, %c0_178], %300 {strides = array<i32>} : memref<1x45x16xf32, #tpu.memory_space<vmem>>, vector<1x45x16xf32>,
    %cst_179 = arith.constant 0.000000e+00 : f32
    %301 = vector.broadcast %cst_179 : f32 to vector<16x9xf32>
    %c0_180 = arith.constant 0 : index
    %c0_181 = arith.constant 0 : index
    %302 = vector.load %arg25[%c0_180, %c0_181] : memref<16x290xf32, #tpu.memory_space<vmem>>, vector<16x9xf32>
    tpu.vector_store %arg25[%c0_180, %c0_181], %301 {strides = array<i32>} : memref<16x290xf32, #tpu.memory_space<vmem>>, vector<16x9xf32>,
    %c0_182 = arith.constant 0 : index
    %c9_183 = arith.constant 9 : index
    %303 = vector.load %arg25[%c0_182, %c9_183] : memref<16x290xf32, #tpu.memory_space<vmem>>, vector<16x64xf32>
    tpu.vector_store %arg25[%c0_182, %c9_183], %284 {strides = array<i32>} : memref<16x290xf32, #tpu.memory_space<vmem>>, vector<16x64xf32>,
    %cst_184 = arith.constant 0.000000e+00 : f32
    %304 = vector.broadcast %cst_184 : f32 to vector<16x9xf32>
    %c0_185 = arith.constant 0 : index
    %c73_186 = arith.constant 73 : index
    %305 = vector.load %arg25[%c0_185, %c73_186] : memref<16x290xf32, #tpu.memory_space<vmem>>, vector<16x9xf32>
    tpu.vector_store %arg25[%c0_185, %c73_186], %304 {strides = array<i32>} : memref<16x290xf32, #tpu.memory_space<vmem>>, vector<16x9xf32>,
    %306 = tpu.iota {dimensions = array<i32: 1>} : vector<1x64xi32>
    %c7_i32_187 = arith.constant 7 : i32
    %307 = vector.broadcast %c7_i32_187 : i32 to vector<1x64xi32>
    %308 = arith.andi %306, %307 : vector<1x64xi32>
    %c3_i32_188 = arith.constant 3 : i32
    %309 = vector.broadcast %c3_i32_188 : i32 to vector<1x64xi32>
    %310 = arith.shrsi %306, %309 : vector<1x64xi32>
    %cst_189 = arith.constant 0.000000e+00 : f32
    %311 = vector.broadcast %cst_189 : f32 to vector<16x64xf32>
    %c0_190 = arith.constant 0 : index
    %c0_191 = arith.constant 0 : index
    %312 = vector.load %arg25[%c0_190, %c0_191] : memref<16x290xf32, #tpu.memory_space<vmem>>, vector<16x64xf32>
    %c1_i32_192 = arith.constant 1 : i32
    %313 = vector.broadcast %c1_i32_192 : i32 to vector<1x64xi32>
    %314 = arith.cmpi sge, %310, %313 : vector<1x64xi32>
    %c1_i32_193 = arith.constant 1 : i32
    %315 = vector.broadcast %c1_i32_193 : i32 to vector<1x64xi32>
    %316 = arith.cmpi sge, %308, %315 : vector<1x64xi32>
    %317 = arith.andi %314, %316 : vector<1x64xi1>
    %318 = arith.extui %317 : vector<1x64xi1> to vector<1x64xi32>
    %319 = arith.sitofp %318 : vector<1x64xi32> to vector<1x64xf32>
    %320 = vector.broadcast %319 : vector<1x64xf32> to vector<16x64xf32>
    %321 = arith.mulf %312, %320 : vector<16x64xf32>
    %c0_194 = arith.constant 0 : index
    %c0_195 = arith.constant 0 : index
    %c0_196 = arith.constant 0 : index
    %322 = vector.load %arg14[%c0_194, %c0_195, %c0_196] : memref<9x16x16xf32, #tpu.memory_space<vmem>>, vector<1x16x16xf32>
    %323 = vector.shape_cast %322 : vector<1x16x16xf32> to vector<16x16xf32>
    %cst_197 = arith.constant dense<0.000000e+00> : vector<16x64xf32>
    %324 = tpu.matmul %323, %321, %cst_197 {dimension_numbers = #tpu.dot_dimension_numbers<[1], [0], [0], [1], [0, 0, 1, 1], [], []>} : vector<16x16xf32>, vector<16x64xf32>, vector<16x64xf32> -> vector<16x64xf32>
    %325 = arith.addf %311, %324 : vector<16x64xf32>
    %c0_198 = arith.constant 0 : index
    %c1_199 = arith.constant 1 : index
    %326 = vector.load %arg25[%c0_198, %c1_199] : memref<16x290xf32, #tpu.memory_space<vmem>>, vector<16x64xf32>
    %c1_i32_200 = arith.constant 1 : i32
    %327 = vector.broadcast %c1_i32_200 : i32 to vector<1x64xi32>
    %328 = arith.cmpi sge, %310, %327 : vector<1x64xi32>
    %329 = arith.extui %328 : vector<1x64xi1> to vector<1x64xi32>
    %330 = arith.sitofp %329 : vector<1x64xi32> to vector<1x64xf32>
    %331 = vector.broadcast %330 : vector<1x64xf32> to vector<16x64xf32>
    %332 = arith.mulf %326, %331 : vector<16x64xf32>
    %c1_201 = arith.constant 1 : index
    %c0_202 = arith.constant 0 : index
    %c0_203 = arith.constant 0 : index
    %333 = vector.load %arg14[%c1_201, %c0_202, %c0_203] : memref<9x16x16xf32, #tpu.memory_space<vmem>>, vector<1x16x16xf32>
    %334 = vector.shape_cast %333 : vector<1x16x16xf32> to vector<16x16xf32>
    %cst_204 = arith.constant dense<0.000000e+00> : vector<16x64xf32>
    %335 = tpu.matmul %334, %332, %cst_204 {dimension_numbers = #tpu.dot_dimension_numbers<[1], [0], [0], [1], [0, 0, 1, 1], [], []>} : vector<16x16xf32>, vector<16x64xf32>, vector<16x64xf32> -> vector<16x64xf32>
    %336 = arith.addf %325, %335 : vector<16x64xf32>
    %c0_205 = arith.constant 0 : index
    %c2_206 = arith.constant 2 : index
    %337 = vector.load %arg25[%c0_205, %c2_206] : memref<16x290xf32, #tpu.memory_space<vmem>>, vector<16x64xf32>
    %c1_i32_207 = arith.constant 1 : i32
    %338 = vector.broadcast %c1_i32_207 : i32 to vector<1x64xi32>
    %339 = arith.cmpi sge, %310, %338 : vector<1x64xi32>
    %c7_i32_208 = arith.constant 7 : i32
    %340 = vector.broadcast %c7_i32_208 : i32 to vector<1x64xi32>
    %341 = arith.cmpi slt, %308, %340 : vector<1x64xi32>
    %342 = arith.andi %339, %341 : vector<1x64xi1>
    %343 = arith.extui %342 : vector<1x64xi1> to vector<1x64xi32>
    %344 = arith.sitofp %343 : vector<1x64xi32> to vector<1x64xf32>
    %345 = vector.broadcast %344 : vector<1x64xf32> to vector<16x64xf32>
    %346 = arith.mulf %337, %345 : vector<16x64xf32>
    %c2_209 = arith.constant 2 : index
    %c0_210 = arith.constant 0 : index
    %c0_211 = arith.constant 0 : index
    %347 = vector.load %arg14[%c2_209, %c0_210, %c0_211] : memref<9x16x16xf32, #tpu.memory_space<vmem>>, vector<1x16x16xf32>
    %348 = vector.shape_cast %347 : vector<1x16x16xf32> to vector<16x16xf32>
    %cst_212 = arith.constant dense<0.000000e+00> : vector<16x64xf32>
    %349 = tpu.matmul %348, %346, %cst_212 {dimension_numbers = #tpu.dot_dimension_numbers<[1], [0], [0], [1], [0, 0, 1, 1], [], []>} : vector<16x16xf32>, vector<16x64xf32>, vector<16x64xf32> -> vector<16x64xf32>
    %350 = arith.addf %336, %349 : vector<16x64xf32>
    %c0_213 = arith.constant 0 : index
    %c8_214 = arith.constant 8 : index
    %351 = vector.load %arg25[%c0_213, %c8_214] : memref<16x290xf32, #tpu.memory_space<vmem>>, vector<16x64xf32>
    %c1_i32_215 = arith.constant 1 : i32
    %352 = vector.broadcast %c1_i32_215 : i32 to vector<1x64xi32>
    %353 = arith.cmpi sge, %308, %352 : vector<1x64xi32>
    %354 = arith.extui %353 : vector<1x64xi1> to vector<1x64xi32>
    %355 = arith.sitofp %354 : vector<1x64xi32> to vector<1x64xf32>
    %356 = vector.broadcast %355 : vector<1x64xf32> to vector<16x64xf32>
    %357 = arith.mulf %351, %356 : vector<16x64xf32>
    %c3_216 = arith.constant 3 : index
    %c0_217 = arith.constant 0 : index
    %c0_218 = arith.constant 0 : index
    %358 = vector.load %arg14[%c3_216, %c0_217, %c0_218] : memref<9x16x16xf32, #tpu.memory_space<vmem>>, vector<1x16x16xf32>
    %359 = vector.shape_cast %358 : vector<1x16x16xf32> to vector<16x16xf32>
    %cst_219 = arith.constant dense<0.000000e+00> : vector<16x64xf32>
    %360 = tpu.matmul %359, %357, %cst_219 {dimension_numbers = #tpu.dot_dimension_numbers<[1], [0], [0], [1], [0, 0, 1, 1], [], []>} : vector<16x16xf32>, vector<16x64xf32>, vector<16x64xf32> -> vector<16x64xf32>
    %361 = arith.addf %350, %360 : vector<16x64xf32>
    %c0_220 = arith.constant 0 : index
    %c9_221 = arith.constant 9 : index
    %362 = vector.load %arg25[%c0_220, %c9_221] : memref<16x290xf32, #tpu.memory_space<vmem>>, vector<16x64xf32>
    %c4_222 = arith.constant 4 : index
    %c0_223 = arith.constant 0 : index
    %c0_224 = arith.constant 0 : index
    %363 = vector.load %arg14[%c4_222, %c0_223, %c0_224] : memref<9x16x16xf32, #tpu.memory_space<vmem>>, vector<1x16x16xf32>
    %364 = vector.shape_cast %363 : vector<1x16x16xf32> to vector<16x16xf32>
    %cst_225 = arith.constant dense<0.000000e+00> : vector<16x64xf32>
    %365 = tpu.matmul %364, %362, %cst_225 {dimension_numbers = #tpu.dot_dimension_numbers<[1], [0], [0], [1], [0, 0, 1, 1], [], []>} : vector<16x16xf32>, vector<16x64xf32>, vector<16x64xf32> -> vector<16x64xf32>
    %366 = arith.addf %361, %365 : vector<16x64xf32>
    %c0_226 = arith.constant 0 : index
    %c10_227 = arith.constant 10 : index
    %367 = vector.load %arg25[%c0_226, %c10_227] : memref<16x290xf32, #tpu.memory_space<vmem>>, vector<16x64xf32>
    %c7_i32_228 = arith.constant 7 : i32
    %368 = vector.broadcast %c7_i32_228 : i32 to vector<1x64xi32>
    %369 = arith.cmpi slt, %308, %368 : vector<1x64xi32>
    %370 = arith.extui %369 : vector<1x64xi1> to vector<1x64xi32>
    %371 = arith.sitofp %370 : vector<1x64xi32> to vector<1x64xf32>
    %372 = vector.broadcast %371 : vector<1x64xf32> to vector<16x64xf32>
    %373 = arith.mulf %367, %372 : vector<16x64xf32>
    %c5_229 = arith.constant 5 : index
    %c0_230 = arith.constant 0 : index
    %c0_231 = arith.constant 0 : index
    %374 = vector.load %arg14[%c5_229, %c0_230, %c0_231] : memref<9x16x16xf32, #tpu.memory_space<vmem>>, vector<1x16x16xf32>
    %375 = vector.shape_cast %374 : vector<1x16x16xf32> to vector<16x16xf32>
    %cst_232 = arith.constant dense<0.000000e+00> : vector<16x64xf32>
    %376 = tpu.matmul %375, %373, %cst_232 {dimension_numbers = #tpu.dot_dimension_numbers<[1], [0], [0], [1], [0, 0, 1, 1], [], []>} : vector<16x16xf32>, vector<16x64xf32>, vector<16x64xf32> -> vector<16x64xf32>
    %377 = arith.addf %366, %376 : vector<16x64xf32>
    %c0_233 = arith.constant 0 : index
    %c16_234 = arith.constant 16 : index
    %378 = vector.load %arg25[%c0_233, %c16_234] : memref<16x290xf32, #tpu.memory_space<vmem>>, vector<16x64xf32>
    %c7_i32_235 = arith.constant 7 : i32
    %379 = vector.broadcast %c7_i32_235 : i32 to vector<1x64xi32>
    %380 = arith.cmpi slt, %310, %379 : vector<1x64xi32>
    %c1_i32_236 = arith.constant 1 : i32
    %381 = vector.broadcast %c1_i32_236 : i32 to vector<1x64xi32>
    %382 = arith.cmpi sge, %308, %381 : vector<1x64xi32>
    %383 = arith.andi %380, %382 : vector<1x64xi1>
    %384 = arith.extui %383 : vector<1x64xi1> to vector<1x64xi32>
    %385 = arith.sitofp %384 : vector<1x64xi32> to vector<1x64xf32>
    %386 = vector.broadcast %385 : vector<1x64xf32> to vector<16x64xf32>
    %387 = arith.mulf %378, %386 : vector<16x64xf32>
    %c6_237 = arith.constant 6 : index
    %c0_238 = arith.constant 0 : index
    %c0_239 = arith.constant 0 : index
    %388 = vector.load %arg14[%c6_237, %c0_238, %c0_239] : memref<9x16x16xf32, #tpu.memory_space<vmem>>, vector<1x16x16xf32>
    %389 = vector.shape_cast %388 : vector<1x16x16xf32> to vector<16x16xf32>
    %cst_240 = arith.constant dense<0.000000e+00> : vector<16x64xf32>
    %390 = tpu.matmul %389, %387, %cst_240 {dimension_numbers = #tpu.dot_dimension_numbers<[1], [0], [0], [1], [0, 0, 1, 1], [], []>} : vector<16x16xf32>, vector<16x64xf32>, vector<16x64xf32> -> vector<16x64xf32>
    %391 = arith.addf %377, %390 : vector<16x64xf32>
    %c0_241 = arith.constant 0 : index
    %c17_242 = arith.constant 17 : index
    %392 = vector.load %arg25[%c0_241, %c17_242] : memref<16x290xf32, #tpu.memory_space<vmem>>, vector<16x64xf32>
    %c7_i32_243 = arith.constant 7 : i32
    %393 = vector.broadcast %c7_i32_243 : i32 to vector<1x64xi32>
    %394 = arith.cmpi slt, %310, %393 : vector<1x64xi32>
    %395 = arith.extui %394 : vector<1x64xi1> to vector<1x64xi32>
    %396 = arith.sitofp %395 : vector<1x64xi32> to vector<1x64xf32>
    %397 = vector.broadcast %396 : vector<1x64xf32> to vector<16x64xf32>
    %398 = arith.mulf %392, %397 : vector<16x64xf32>
    %c7_244 = arith.constant 7 : index
    %c0_245 = arith.constant 0 : index
    %c0_246 = arith.constant 0 : index
    %399 = vector.load %arg14[%c7_244, %c0_245, %c0_246] : memref<9x16x16xf32, #tpu.memory_space<vmem>>, vector<1x16x16xf32>
    %400 = vector.shape_cast %399 : vector<1x16x16xf32> to vector<16x16xf32>
    %cst_247 = arith.constant dense<0.000000e+00> : vector<16x64xf32>
    %401 = tpu.matmul %400, %398, %cst_247 {dimension_numbers = #tpu.dot_dimension_numbers<[1], [0], [0], [1], [0, 0, 1, 1], [], []>} : vector<16x16xf32>, vector<16x64xf32>, vector<16x64xf32> -> vector<16x64xf32>
    %402 = arith.addf %391, %401 : vector<16x64xf32>
    %c0_248 = arith.constant 0 : index
    %c18_249 = arith.constant 18 : index
    %403 = vector.load %arg25[%c0_248, %c18_249] : memref<16x290xf32, #tpu.memory_space<vmem>>, vector<16x64xf32>
    %c7_i32_250 = arith.constant 7 : i32
    %404 = vector.broadcast %c7_i32_250 : i32 to vector<1x64xi32>
    %405 = arith.cmpi slt, %310, %404 : vector<1x64xi32>
    %c7_i32_251 = arith.constant 7 : i32
    %406 = vector.broadcast %c7_i32_251 : i32 to vector<1x64xi32>
    %407 = arith.cmpi slt, %308, %406 : vector<1x64xi32>
    %408 = arith.andi %405, %407 : vector<1x64xi1>
    %409 = arith.extui %408 : vector<1x64xi1> to vector<1x64xi32>
    %410 = arith.sitofp %409 : vector<1x64xi32> to vector<1x64xf32>
    %411 = vector.broadcast %410 : vector<1x64xf32> to vector<16x64xf32>
    %412 = arith.mulf %403, %411 : vector<16x64xf32>
    %c8_252 = arith.constant 8 : index
    %c0_253 = arith.constant 0 : index
    %c0_254 = arith.constant 0 : index
    %413 = vector.load %arg14[%c8_252, %c0_253, %c0_254] : memref<9x16x16xf32, #tpu.memory_space<vmem>>, vector<1x16x16xf32>
    %414 = vector.shape_cast %413 : vector<1x16x16xf32> to vector<16x16xf32>
    %cst_255 = arith.constant dense<0.000000e+00> : vector<16x64xf32>
    %415 = tpu.matmul %414, %412, %cst_255 {dimension_numbers = #tpu.dot_dimension_numbers<[1], [0], [0], [1], [0, 0, 1, 1], [], []>} : vector<16x16xf32>, vector<16x64xf32>, vector<16x64xf32> -> vector<16x64xf32>
    %416 = arith.addf %402, %415 : vector<16x64xf32>
    %c0_256 = arith.constant 0 : index
    %c0_257 = arith.constant 0 : index
    %417 = vector.load %arg15[%c0_256, %c0_257] : memref<16x1xf32, #tpu.memory_space<vmem>>, vector<16x1xf32>
    %418 = vector.broadcast %417 : vector<16x1xf32> to vector<16x64xf32>
    %419 = arith.addf %416, %418 : vector<16x64xf32>
    %cst_258 = arith.constant 0.000000e+00 : f32
    %420 = vector.broadcast %cst_258 : f32 to vector<16x64xf32>
    %421 = arith.subf %420, %419 : vector<16x64xf32>
    %422 = math.exp %421 : vector<16x64xf32>
    %cst_259 = arith.constant 1.000000e+00 : f32
    %423 = vector.broadcast %cst_259 : f32 to vector<16x64xf32>
    %424 = arith.addf %423, %422 : vector<16x64xf32>
    %425 = tpu.reciprocal %424 {approx = true} : vector<16x64xf32> -> vector<16x64xf32>
    %426 = arith.mulf %419, %425 : vector<16x64xf32>
    %c0_260 = arith.constant 0 : index
    %c0_261 = arith.constant 0 : index
    %427 = vector.load %arg21[%c0_260, %c0_261] : memref<64x256xf32, #tpu.memory_space<vmem>>, vector<64x256xf32>
    %cst_262 = arith.constant dense<0.000000e+00> : vector<16x256xf32>
    %428 = tpu.matmul %426, %427, %cst_262 {dimension_numbers = #tpu.dot_dimension_numbers<[1], [0], [0], [1], [0, 0, 1, 1], [], []>} : vector<16x64xf32>, vector<64x256xf32>, vector<16x256xf32> -> vector<16x256xf32>
    %cst_263 = arith.constant 0.000000e+00 : f32
    %429 = vector.broadcast %cst_263 : f32 to vector<16x17xf32>
    %c0_264 = arith.constant 0 : index
    %c0_265 = arith.constant 0 : index
    %430 = vector.load %arg25[%c0_264, %c0_265] : memref<16x290xf32, #tpu.memory_space<vmem>>, vector<16x17xf32>
    tpu.vector_store %arg25[%c0_264, %c0_265], %429 {strides = array<i32>} : memref<16x290xf32, #tpu.memory_space<vmem>>, vector<16x17xf32>,
    %c0_266 = arith.constant 0 : index
    %c17_267 = arith.constant 17 : index
    %431 = vector.load %arg25[%c0_266, %c17_267] : memref<16x290xf32, #tpu.memory_space<vmem>>, vector<16x256xf32>
    tpu.vector_store %arg25[%c0_266, %c17_267], %428 {strides = array<i32>} : memref<16x290xf32, #tpu.memory_space<vmem>>, vector<16x256xf32>,
    %cst_268 = arith.constant 0.000000e+00 : f32
    %432 = vector.broadcast %cst_268 : f32 to vector<16x17xf32>
    %c0_269 = arith.constant 0 : index
    %c273_270 = arith.constant 273 : index
    %433 = vector.load %arg25[%c0_269, %c273_270] : memref<16x290xf32, #tpu.memory_space<vmem>>, vector<16x17xf32>
    tpu.vector_store %arg25[%c0_269, %c273_270], %432 {strides = array<i32>} : memref<16x290xf32, #tpu.memory_space<vmem>>, vector<16x17xf32>,
    %434 = tpu.iota {dimensions = array<i32: 1>} : vector<1x256xi32>
    %c15_i32_271 = arith.constant 15 : i32
    %435 = vector.broadcast %c15_i32_271 : i32 to vector<1x256xi32>
    %436 = arith.andi %434, %435 : vector<1x256xi32>
    %c4_i32_272 = arith.constant 4 : i32
    %437 = vector.broadcast %c4_i32_272 : i32 to vector<1x256xi32>
    %438 = arith.shrsi %434, %437 : vector<1x256xi32>
    %cst_273 = arith.constant 0.000000e+00 : f32
    %439 = vector.broadcast %cst_273 : f32 to vector<4x256xf32>
    %c0_274 = arith.constant 0 : index
    %c0_275 = arith.constant 0 : index
    %440 = vector.load %arg25[%c0_274, %c0_275] : memref<16x290xf32, #tpu.memory_space<vmem>>, vector<16x256xf32>
    %c1_i32_276 = arith.constant 1 : i32
    %441 = vector.broadcast %c1_i32_276 : i32 to vector<1x256xi32>
    %442 = arith.cmpi sge, %438, %441 : vector<1x256xi32>
    %c1_i32_277 = arith.constant 1 : i32
    %443 = vector.broadcast %c1_i32_277 : i32 to vector<1x256xi32>
    %444 = arith.cmpi sge, %436, %443 : vector<1x256xi32>
    %445 = arith.andi %442, %444 : vector<1x256xi1>
    %446 = arith.extui %445 : vector<1x256xi1> to vector<1x256xi32>
    %447 = arith.sitofp %446 : vector<1x256xi32> to vector<1x256xf32>
    %448 = vector.broadcast %447 : vector<1x256xf32> to vector<16x256xf32>
    %449 = arith.mulf %440, %448 : vector<16x256xf32>
    %c0_278 = arith.constant 0 : index
    %c0_279 = arith.constant 0 : index
    %c0_280 = arith.constant 0 : index
    %450 = vector.load %arg16[%c0_278, %c0_279, %c0_280] : memref<9x4x16xf32, #tpu.memory_space<vmem>>, vector<1x4x16xf32>
    %451 = vector.shape_cast %450 : vector<1x4x16xf32> to vector<4x16xf32>
    %cst_281 = arith.constant dense<0.000000e+00> : vector<4x256xf32>
    %452 = tpu.matmul %451, %449, %cst_281 {dimension_numbers = #tpu.dot_dimension_numbers<[1], [0], [0], [1], [0, 0, 1, 1], [], []>} : vector<4x16xf32>, vector<16x256xf32>, vector<4x256xf32> -> vector<4x256xf32>
    %453 = arith.addf %439, %452 : vector<4x256xf32>
    %c0_282 = arith.constant 0 : index
    %c1_283 = arith.constant 1 : index
    %454 = vector.load %arg25[%c0_282, %c1_283] : memref<16x290xf32, #tpu.memory_space<vmem>>, vector<16x256xf32>
    %c1_i32_284 = arith.constant 1 : i32
    %455 = vector.broadcast %c1_i32_284 : i32 to vector<1x256xi32>
    %456 = arith.cmpi sge, %438, %455 : vector<1x256xi32>
    %457 = arith.extui %456 : vector<1x256xi1> to vector<1x256xi32>
    %458 = arith.sitofp %457 : vector<1x256xi32> to vector<1x256xf32>
    %459 = vector.broadcast %458 : vector<1x256xf32> to vector<16x256xf32>
    %460 = arith.mulf %454, %459 : vector<16x256xf32>
    %c1_285 = arith.constant 1 : index
    %c0_286 = arith.constant 0 : index
    %c0_287 = arith.constant 0 : index
    %461 = vector.load %arg16[%c1_285, %c0_286, %c0_287] : memref<9x4x16xf32, #tpu.memory_space<vmem>>, vector<1x4x16xf32>
    %462 = vector.shape_cast %461 : vector<1x4x16xf32> to vector<4x16xf32>
    %cst_288 = arith.constant dense<0.000000e+00> : vector<4x256xf32>
    %463 = tpu.matmul %462, %460, %cst_288 {dimension_numbers = #tpu.dot_dimension_numbers<[1], [0], [0], [1], [0, 0, 1, 1], [], []>} : vector<4x16xf32>, vector<16x256xf32>, vector<4x256xf32> -> vector<4x256xf32>
    %464 = arith.addf %453, %463 : vector<4x256xf32>
    %c0_289 = arith.constant 0 : index
    %c2_290 = arith.constant 2 : index
    %465 = vector.load %arg25[%c0_289, %c2_290] : memref<16x290xf32, #tpu.memory_space<vmem>>, vector<16x256xf32>
    %c1_i32_291 = arith.constant 1 : i32
    %466 = vector.broadcast %c1_i32_291 : i32 to vector<1x256xi32>
    %467 = arith.cmpi sge, %438, %466 : vector<1x256xi32>
    %c15_i32_292 = arith.constant 15 : i32
    %468 = vector.broadcast %c15_i32_292 : i32 to vector<1x256xi32>
    %469 = arith.cmpi slt, %436, %468 : vector<1x256xi32>
    %470 = arith.andi %467, %469 : vector<1x256xi1>
    %471 = arith.extui %470 : vector<1x256xi1> to vector<1x256xi32>
    %472 = arith.sitofp %471 : vector<1x256xi32> to vector<1x256xf32>
    %473 = vector.broadcast %472 : vector<1x256xf32> to vector<16x256xf32>
    %474 = arith.mulf %465, %473 : vector<16x256xf32>
    %c2_293 = arith.constant 2 : index
    %c0_294 = arith.constant 0 : index
    %c0_295 = arith.constant 0 : index
    %475 = vector.load %arg16[%c2_293, %c0_294, %c0_295] : memref<9x4x16xf32, #tpu.memory_space<vmem>>, vector<1x4x16xf32>
    %476 = vector.shape_cast %475 : vector<1x4x16xf32> to vector<4x16xf32>
    %cst_296 = arith.constant dense<0.000000e+00> : vector<4x256xf32>
    %477 = tpu.matmul %476, %474, %cst_296 {dimension_numbers = #tpu.dot_dimension_numbers<[1], [0], [0], [1], [0, 0, 1, 1], [], []>} : vector<4x16xf32>, vector<16x256xf32>, vector<4x256xf32> -> vector<4x256xf32>
    %478 = arith.addf %464, %477 : vector<4x256xf32>
    %c0_297 = arith.constant 0 : index
    %c16_298 = arith.constant 16 : index
    %479 = vector.load %arg25[%c0_297, %c16_298] : memref<16x290xf32, #tpu.memory_space<vmem>>, vector<16x256xf32>
    %c1_i32_299 = arith.constant 1 : i32
    %480 = vector.broadcast %c1_i32_299 : i32 to vector<1x256xi32>
    %481 = arith.cmpi sge, %436, %480 : vector<1x256xi32>
    %482 = arith.extui %481 : vector<1x256xi1> to vector<1x256xi32>
    %483 = arith.sitofp %482 : vector<1x256xi32> to vector<1x256xf32>
    %484 = vector.broadcast %483 : vector<1x256xf32> to vector<16x256xf32>
    %485 = arith.mulf %479, %484 : vector<16x256xf32>
    %c3_300 = arith.constant 3 : index
    %c0_301 = arith.constant 0 : index
    %c0_302 = arith.constant 0 : index
    %486 = vector.load %arg16[%c3_300, %c0_301, %c0_302] : memref<9x4x16xf32, #tpu.memory_space<vmem>>, vector<1x4x16xf32>
    %487 = vector.shape_cast %486 : vector<1x4x16xf32> to vector<4x16xf32>
    %cst_303 = arith.constant dense<0.000000e+00> : vector<4x256xf32>
    %488 = tpu.matmul %487, %485, %cst_303 {dimension_numbers = #tpu.dot_dimension_numbers<[1], [0], [0], [1], [0, 0, 1, 1], [], []>} : vector<4x16xf32>, vector<16x256xf32>, vector<4x256xf32> -> vector<4x256xf32>
    %489 = arith.addf %478, %488 : vector<4x256xf32>
    %c0_304 = arith.constant 0 : index
    %c17_305 = arith.constant 17 : index
    %490 = vector.load %arg25[%c0_304, %c17_305] : memref<16x290xf32, #tpu.memory_space<vmem>>, vector<16x256xf32>
    %c4_306 = arith.constant 4 : index
    %c0_307 = arith.constant 0 : index
    %c0_308 = arith.constant 0 : index
    %491 = vector.load %arg16[%c4_306, %c0_307, %c0_308] : memref<9x4x16xf32, #tpu.memory_space<vmem>>, vector<1x4x16xf32>
    %492 = vector.shape_cast %491 : vector<1x4x16xf32> to vector<4x16xf32>
    %cst_309 = arith.constant dense<0.000000e+00> : vector<4x256xf32>
    %493 = tpu.matmul %492, %490, %cst_309 {dimension_numbers = #tpu.dot_dimension_numbers<[1], [0], [0], [1], [0, 0, 1, 1], [], []>} : vector<4x16xf32>, vector<16x256xf32>, vector<4x256xf32> -> vector<4x256xf32>
    %494 = arith.addf %489, %493 : vector<4x256xf32>
    %c0_310 = arith.constant 0 : index
    %c18_311 = arith.constant 18 : index
    %495 = vector.load %arg25[%c0_310, %c18_311] : memref<16x290xf32, #tpu.memory_space<vmem>>, vector<16x256xf32>
    %c15_i32_312 = arith.constant 15 : i32
    %496 = vector.broadcast %c15_i32_312 : i32 to vector<1x256xi32>
    %497 = arith.cmpi slt, %436, %496 : vector<1x256xi32>
    %498 = arith.extui %497 : vector<1x256xi1> to vector<1x256xi32>
    %499 = arith.sitofp %498 : vector<1x256xi32> to vector<1x256xf32>
    %500 = vector.broadcast %499 : vector<1x256xf32> to vector<16x256xf32>
    %501 = arith.mulf %495, %500 : vector<16x256xf32>
    %c5_313 = arith.constant 5 : index
    %c0_314 = arith.constant 0 : index
    %c0_315 = arith.constant 0 : index
    %502 = vector.load %arg16[%c5_313, %c0_314, %c0_315] : memref<9x4x16xf32, #tpu.memory_space<vmem>>, vector<1x4x16xf32>
    %503 = vector.shape_cast %502 : vector<1x4x16xf32> to vector<4x16xf32>
    %cst_316 = arith.constant dense<0.000000e+00> : vector<4x256xf32>
    %504 = tpu.matmul %503, %501, %cst_316 {dimension_numbers = #tpu.dot_dimension_numbers<[1], [0], [0], [1], [0, 0, 1, 1], [], []>} : vector<4x16xf32>, vector<16x256xf32>, vector<4x256xf32> -> vector<4x256xf32>
    %505 = arith.addf %494, %504 : vector<4x256xf32>
    %c0_317 = arith.constant 0 : index
    %c32_318 = arith.constant 32 : index
    %506 = vector.load %arg25[%c0_317, %c32_318] : memref<16x290xf32, #tpu.memory_space<vmem>>, vector<16x256xf32>
    %c15_i32_319 = arith.constant 15 : i32
    %507 = vector.broadcast %c15_i32_319 : i32 to vector<1x256xi32>
    %508 = arith.cmpi slt, %438, %507 : vector<1x256xi32>
    %c1_i32_320 = arith.constant 1 : i32
    %509 = vector.broadcast %c1_i32_320 : i32 to vector<1x256xi32>
    %510 = arith.cmpi sge, %436, %509 : vector<1x256xi32>
    %511 = arith.andi %508, %510 : vector<1x256xi1>
    %512 = arith.extui %511 : vector<1x256xi1> to vector<1x256xi32>
    %513 = arith.sitofp %512 : vector<1x256xi32> to vector<1x256xf32>
    %514 = vector.broadcast %513 : vector<1x256xf32> to vector<16x256xf32>
    %515 = arith.mulf %506, %514 : vector<16x256xf32>
    %c6_321 = arith.constant 6 : index
    %c0_322 = arith.constant 0 : index
    %c0_323 = arith.constant 0 : index
    %516 = vector.load %arg16[%c6_321, %c0_322, %c0_323] : memref<9x4x16xf32, #tpu.memory_space<vmem>>, vector<1x4x16xf32>
    %517 = vector.shape_cast %516 : vector<1x4x16xf32> to vector<4x16xf32>
    %cst_324 = arith.constant dense<0.000000e+00> : vector<4x256xf32>
    %518 = tpu.matmul %517, %515, %cst_324 {dimension_numbers = #tpu.dot_dimension_numbers<[1], [0], [0], [1], [0, 0, 1, 1], [], []>} : vector<4x16xf32>, vector<16x256xf32>, vector<4x256xf32> -> vector<4x256xf32>
    %519 = arith.addf %505, %518 : vector<4x256xf32>
    %c0_325 = arith.constant 0 : index
    %c33_326 = arith.constant 33 : index
    %520 = vector.load %arg25[%c0_325, %c33_326] : memref<16x290xf32, #tpu.memory_space<vmem>>, vector<16x256xf32>
    %c15_i32_327 = arith.constant 15 : i32
    %521 = vector.broadcast %c15_i32_327 : i32 to vector<1x256xi32>
    %522 = arith.cmpi slt, %438, %521 : vector<1x256xi32>
    %523 = arith.extui %522 : vector<1x256xi1> to vector<1x256xi32>
    %524 = arith.sitofp %523 : vector<1x256xi32> to vector<1x256xf32>
    %525 = vector.broadcast %524 : vector<1x256xf32> to vector<16x256xf32>
    %526 = arith.mulf %520, %525 : vector<16x256xf32>
    %c7_328 = arith.constant 7 : index
    %c0_329 = arith.constant 0 : index
    %c0_330 = arith.constant 0 : index
    %527 = vector.load %arg16[%c7_328, %c0_329, %c0_330] : memref<9x4x16xf32, #tpu.memory_space<vmem>>, vector<1x4x16xf32>
    %528 = vector.shape_cast %527 : vector<1x4x16xf32> to vector<4x16xf32>
    %cst_331 = arith.constant dense<0.000000e+00> : vector<4x256xf32>
    %529 = tpu.matmul %528, %526, %cst_331 {dimension_numbers = #tpu.dot_dimension_numbers<[1], [0], [0], [1], [0, 0, 1, 1], [], []>} : vector<4x16xf32>, vector<16x256xf32>, vector<4x256xf32> -> vector<4x256xf32>
    %530 = arith.addf %519, %529 : vector<4x256xf32>
    %c0_332 = arith.constant 0 : index
    %c34_333 = arith.constant 34 : index
    %531 = vector.load %arg25[%c0_332, %c34_333] : memref<16x290xf32, #tpu.memory_space<vmem>>, vector<16x256xf32>
    %c15_i32_334 = arith.constant 15 : i32
    %532 = vector.broadcast %c15_i32_334 : i32 to vector<1x256xi32>
    %533 = arith.cmpi slt, %438, %532 : vector<1x256xi32>
    %c15_i32_335 = arith.constant 15 : i32
    %534 = vector.broadcast %c15_i32_335 : i32 to vector<1x256xi32>
    %535 = arith.cmpi slt, %436, %534 : vector<1x256xi32>
    %536 = arith.andi %533, %535 : vector<1x256xi1>
    %537 = arith.extui %536 : vector<1x256xi1> to vector<1x256xi32>
    %538 = arith.sitofp %537 : vector<1x256xi32> to vector<1x256xf32>
    %539 = vector.broadcast %538 : vector<1x256xf32> to vector<16x256xf32>
    %540 = arith.mulf %531, %539 : vector<16x256xf32>
    %c8_336 = arith.constant 8 : index
    %c0_337 = arith.constant 0 : index
    %c0_338 = arith.constant 0 : index
    %541 = vector.load %arg16[%c8_336, %c0_337, %c0_338] : memref<9x4x16xf32, #tpu.memory_space<vmem>>, vector<1x4x16xf32>
    %542 = vector.shape_cast %541 : vector<1x4x16xf32> to vector<4x16xf32>
    %cst_339 = arith.constant dense<0.000000e+00> : vector<4x256xf32>
    %543 = tpu.matmul %542, %540, %cst_339 {dimension_numbers = #tpu.dot_dimension_numbers<[1], [0], [0], [1], [0, 0, 1, 1], [], []>} : vector<4x16xf32>, vector<16x256xf32>, vector<4x256xf32> -> vector<4x256xf32>
    %544 = arith.addf %530, %543 : vector<4x256xf32>
    %c0_340 = arith.constant 0 : index
    %c0_341 = arith.constant 0 : index
    %545 = vector.load %arg17[%c0_340, %c0_341] : memref<4x1xf32, #tpu.memory_space<vmem>>, vector<4x1xf32>
    %546 = vector.broadcast %545 : vector<4x1xf32> to vector<4x256xf32>
    %547 = arith.addf %544, %546 : vector<4x256xf32>
    %cst_342 = arith.constant 0.000000e+00 : f32
    %548 = vector.broadcast %cst_342 : f32 to vector<4x256xf32>
    %549 = arith.subf %548, %547 : vector<4x256xf32>
    %550 = math.exp %549 : vector<4x256xf32>
    %cst_343 = arith.constant 1.000000e+00 : f32
    %551 = vector.broadcast %cst_343 : f32 to vector<4x256xf32>
    %552 = arith.addf %551, %550 : vector<4x256xf32>
    %cst_344 = arith.constant 1.000000e+00 : f32
    %553 = vector.broadcast %cst_344 : f32 to vector<4x256xf32>
    %554 = arith.divf %553, %552 : vector<4x256xf32>
    %c0_345 = arith.constant 0 : index
    %c0_346 = arith.constant 0 : index
    %c0_347 = arith.constant 0 : index
    %555 = vector.load %arg24[%c0_345, %c0_346, %c0_347] : memref<1x4x256xf32, #tpu.memory_space<vmem>>, vector<1x4x256xf32>
    %556 = vector.shape_cast %555 : vector<1x4x256xf32> to vector<4x256xf32>
    %557 = vector.shape_cast %554 : vector<4x256xf32> to vector<1x4x256xf32>
    tpu.vector_store %arg24[%c0_345, %c0_346, %c0_347], %557 {strides = array<i32>} : memref<1x4x256xf32, #tpu.memory_space<vmem>>, vector<1x4x256xf32>,
    return
  }
  func.func @transform_0(%arg0: i32) -> (i32, i32, i32) {
    %c0_i32 = arith.constant 0 : i32
    %c0_i32_0 = arith.constant 0 : i32
    %c0_i32_1 = arith.constant 0 : i32
    return %arg0, %c0_i32, %c0_i32_0 : i32, i32, i32
  }
  func.func @transform_1(%arg0: i32) -> (i32, i32) {
    %c0_i32 = arith.constant 0 : i32
    %c0_i32_0 = arith.constant 0 : i32
    %c0_i32_1 = arith.constant 0 : i32
    return %c0_i32, %c0_i32_0 : i32, i32
  }
  func.func @transform_2(%arg0: i32) -> (i32, i32) {
    %c0_i32 = arith.constant 0 : i32
    %c0_i32_0 = arith.constant 0 : i32
    %c0_i32_1 = arith.constant 0 : i32
    return %c0_i32, %c0_i32_0 : i32, i32
  }
  func.func @transform_3(%arg0: i32) -> (i32, i32, i32) {
    %c0_i32 = arith.constant 0 : i32
    %c0_i32_0 = arith.constant 0 : i32
    %c0_i32_1 = arith.constant 0 : i32
    %c0_i32_2 = arith.constant 0 : i32
    return %c0_i32, %c0_i32_0, %c0_i32_1 : i32, i32, i32
  }
  func.func @transform_4(%arg0: i32) -> (i32, i32) {
    %c0_i32 = arith.constant 0 : i32
    %c0_i32_0 = arith.constant 0 : i32
    %c0_i32_1 = arith.constant 0 : i32
    return %c0_i32, %c0_i32_0 : i32, i32
  }
  func.func @transform_5(%arg0: i32) -> (i32, i32, i32) {
    %c0_i32 = arith.constant 0 : i32
    %c0_i32_0 = arith.constant 0 : i32
    %c0_i32_1 = arith.constant 0 : i32
    %c0_i32_2 = arith.constant 0 : i32
    return %c0_i32, %c0_i32_0, %c0_i32_1 : i32, i32, i32
  }
  func.func @transform_6(%arg0: i32) -> (i32, i32) {
    %c0_i32 = arith.constant 0 : i32
    %c0_i32_0 = arith.constant 0 : i32
    %c0_i32_1 = arith.constant 0 : i32
    return %c0_i32, %c0_i32_0 : i32, i32
  }
  func.func @transform_7(%arg0: i32) -> (i32, i32) {
    %c0_i32 = arith.constant 0 : i32
    %c0_i32_0 = arith.constant 0 : i32
    %c0_i32_1 = arith.constant 0 : i32
    return %c0_i32, %c0_i32_0 : i32, i32
  }
  func.func @transform_8(%arg0: i32) -> (i32, i32) {
    %c0_i32 = arith.constant 0 : i32
    %c0_i32_0 = arith.constant 0 : i32
    %c0_i32_1 = arith.constant 0 : i32
    return %c0_i32, %c0_i32_0 : i32, i32
  }
  func.func @transform_9(%arg0: i32) -> (i32, i32) {
    %c0_i32 = arith.constant 0 : i32
    %c0_i32_0 = arith.constant 0 : i32
    %c0_i32_1 = arith.constant 0 : i32
    return %c0_i32, %c0_i32_0 : i32, i32
  }
  func.func @transform_10(%arg0: i32) -> (i32, i32) {
    %c0_i32 = arith.constant 0 : i32
    %c0_i32_0 = arith.constant 0 : i32
    %c0_i32_1 = arith.constant 0 : i32
    return %c0_i32, %c0_i32_0 : i32, i32
  }
  func.func @transform_11(%arg0: i32) -> (i32, i32) {
    %c0_i32 = arith.constant 0 : i32
    %c0_i32_0 = arith.constant 0 : i32
    %c0_i32_1 = arith.constant 0 : i32
    return %c0_i32, %c0_i32_0 : i32, i32
  }
  func.func @transform_12(%arg0: i32) -> (i32, i32) {
    %c0_i32 = arith.constant 0 : i32
    %c0_i32_0 = arith.constant 0 : i32
    %c0_i32_1 = arith.constant 0 : i32
    return %c0_i32, %c0_i32_0 : i32, i32
  }
  func.func @transform_13(%arg0: i32) -> (i32, i32, i32) {
    %c0_i32 = arith.constant 0 : i32
    %c0_i32_0 = arith.constant 0 : i32
    %c0_i32_1 = arith.constant 0 : i32
    %c0_i32_2 = arith.constant 0 : i32
    return %c0_i32, %c0_i32_0, %c0_i32_1 : i32, i32, i32
  }
  func.func @transform_14(%arg0: i32) -> (i32, i32) {
    %c0_i32 = arith.constant 0 : i32
    %c0_i32_0 = arith.constant 0 : i32
    %c0_i32_1 = arith.constant 0 : i32
    return %c0_i32, %c0_i32_0 : i32, i32
  }
  func.func @transform_15(%arg0: i32) -> (i32, i32, i32) {
    %c0_i32 = arith.constant 0 : i32
    %c0_i32_0 = arith.constant 0 : i32
    %c0_i32_1 = arith.constant 0 : i32
    %c0_i32_2 = arith.constant 0 : i32
    return %c0_i32, %c0_i32_0, %c0_i32_1 : i32, i32, i32
  }
  func.func @transform_16(%arg0: i32) -> (i32, i32) {
    %c0_i32 = arith.constant 0 : i32
    %c0_i32_0 = arith.constant 0 : i32
    %c0_i32_1 = arith.constant 0 : i32
    return %c0_i32, %c0_i32_0 : i32, i32
  }
  func.func @transform_17(%arg0: i32) -> (i32, i32) {
    %c0_i32 = arith.constant 0 : i32
    %c0_i32_0 = arith.constant 0 : i32
    %c0_i32_1 = arith.constant 0 : i32
    return %c0_i32, %c0_i32_0 : i32, i32
  }
  func.func @transform_18(%arg0: i32) -> (i32, i32) {
    %c0_i32 = arith.constant 0 : i32
    %c0_i32_0 = arith.constant 0 : i32
    %c0_i32_1 = arith.constant 0 : i32
    return %c0_i32, %c0_i32_0 : i32, i32
  }
  func.func @transform_19(%arg0: i32) -> (i32, i32) {
    %c0_i32 = arith.constant 0 : i32
    %c0_i32_0 = arith.constant 0 : i32
    %c0_i32_1 = arith.constant 0 : i32
    return %c0_i32, %c0_i32_0 : i32, i32
  }
  func.func @transform_20(%arg0: i32) -> (i32, i32) {
    %c0_i32 = arith.constant 0 : i32
    %c0_i32_0 = arith.constant 0 : i32
    %c0_i32_1 = arith.constant 0 : i32
    return %c0_i32, %c0_i32_0 : i32, i32
  }
  func.func @transform_21(%arg0: i32) -> (i32, i32, i32) {
    %c0_i32 = arith.constant 0 : i32
    %c0_i32_0 = arith.constant 0 : i32
    %c0_i32_1 = arith.constant 0 : i32
    return %arg0, %c0_i32, %c0_i32_0 : i32, i32, i32
  }
  func.func @transform_22(%arg0: i32) -> (i32, i32, i32) {
    %c0_i32 = arith.constant 0 : i32
    %c0_i32_0 = arith.constant 0 : i32
    %c0_i32_1 = arith.constant 0 : i32
    return %arg0, %c0_i32, %c0_i32_0 : i32, i32, i32
  }
  func.func @transform_23(%arg0: i32) -> (i32, i32, i32) {
    %c0_i32 = arith.constant 0 : i32
    %c0_i32_0 = arith.constant 0 : i32
    %c0_i32_1 = arith.constant 0 : i32
    return %arg0, %c0_i32, %c0_i32_0 : i32, i32, i32
  }
}

</mosaic_0001>

<bundles_post_ra>
// kernel: mcnet_forward.1
= control target key start
LH: loop header
LB: loop body
LE: loop exit
PB: predicated region body
PF: predicated region fallthrough
CT: control target
= control target key end

     0   :  { %s8341_s0 = inlined_call_operand.vmem [shape: f32[2,27,256], index: 0, kind: input, shape index: {}]   ;;  %s8342_s1 = inlined_call_operand.vmem [shape: f32[8,27], index: 1, kind: input, shape index: {}]   ;;  %s8343_s2 = inlined_call_operand.vmem [shape: f32[8,1], index: 2, kind: input, shape index: {}]   ;;  %s8344_s3 = inlined_call_operand.vmem [shape: f32[9,16,8], index: 3, kind: input, shape index: {}]   ;;  %s8345_s4 = inlined_call_operand.vmem [shape: f32[16,1], index: 4, kind: input, shape index: {}]   ;;  %s8346_s5 = inlined_call_operand.vmem [shape: f32[9,32,16], index: 5, kind: input, shape index: {}]   ;;  %s8347_s6 = inlined_call_operand.vmem [shape: f32[32,1], index: 6, kind: input, shape index: {}]   ;;  %s8348_s7 = inlined_call_operand.vmem [shape: f32[16,48], index: 7, kind: input, shape index: {}]   ;;  %s8349_s8 = inlined_call_operand.vmem [shape: f32[16,1], index: 8, kind: input, shape index: {}]   ;;  %s8350_s9 = inlined_call_operand.vmem [shape: f32[45,16], index: 9, kind: input, shape index: {}]   ;;  %s8351_s10 = inlined_call_operand.vmem [shape: f32[45,1], index: 10, kind: input, shape index: {}]   ;;  %s8352_s11 = inlined_call_operand.vmem [shape: f32[45,32], index: 11, kind: input, shape index: {}]   ;;  %s8353_s12 = inlined_call_operand.vmem [shape: f32[45,1], index: 12, kind: input, shape index: {}]   ;;  %s8354_s13 = inlined_call_operand.vmem [shape: f32[9,16,16], index: 13, kind: input, shape index: {}]   ;;  %s8355_s14 = inlined_call_operand.vmem [shape: f32[16,1], index: 14, kind: input, shape index: {}]   ;;  %s8356_s15 = inlined_call_operand.vmem [shape: f32[9,4,16], index: 15, kind: input, shape index: {}]   ;;  %s8357_s16 = inlined_call_operand.vmem [shape: f32[4,1], index: 16, kind: input, shape index: {}]   ;;  %s8358_s17 = inlined_call_operand.vmem [shape: f32[256,64], index: 17, kind: input, shape index: {}]   ;;  %s8359_s18 = inlined_call_operand.vmem [shape: f32[64,16], index: 18, kind: input, shape index: {}]   ;;  %s8360_s19 = inlined_call_operand.vmem [shape: f32[16,64], index: 19, kind: input, shape index: {}]   ;;  %s8361_s20 = inlined_call_operand.vmem [shape: f32[64,256], index: 20, kind: input, shape index: {}]   ;;  %s8362_s21 = inlined_call_operand.vmem [shape: f32[2,45,64], index: 21, kind: output, shape index: {0}]   ;;  %s8363_s22 = inlined_call_operand.vmem [shape: f32[2,45,16], index: 22, kind: output, shape index: {1}]   ;;  %s8364_s23 = inlined_call_operand.vmem [shape: f32[2,4,256], index: 23, kind: output, shape index: {2}]  }
   0x1   :  { %8430 = sst [smem:[#allocation13_spill]] %s8341_s0 }
   0x2   :  { %8431 = sst [smem:[#allocation14_spill]] %s8342_s1 }
   0x3   :  { %8432 = sst [smem:[#allocation15_spill]] %s8343_s2 }
   0x4   :  { %8433 = sst [smem:[#allocation16_spill]] %s8344_s3 }
   0x5   :  { %8434 = sst [smem:[#allocation17_spill]] %s8345_s4  ;;  %s6871_s4 = smov 0  }
   0x6   :  { %8435 = sst [smem:[#allocation18_spill]] %s8346_s5 }
   0x7   :  { %8436 = sst [smem:[#allocation19_spill]] %s8347_s6 }
   0x8   :  { %8437 = sst [smem:[#allocation20_spill]] %s8348_s7 }
   0x9   :  { %8438 = sst [smem:[#allocation21_spill]] %s8358_s17 }
   0xa   :  { %8439 = sst [smem:[#allocation22_spill]] %s8362_s21 }
   0xb   :  { %8440 = sst [smem:[#allocation23_spill]] %s8363_s22 }
   0xc   :  { %8441 = sst [smem:[#allocation24_spill]] %s8364_s23 }
   0xd LB: > { %8442 = sst [smem:[#allocation3_spill]] %s6725_s4  ;;  %s5972_s30 = sadd.s32 4294967295, %s6725_s4   ;;  %s6725_s4 = sphi %s6871_s4, %s34_s4  }
   0xe   : > { %p5976_p0 = scmp.ge.s32.totalorder %s6725_s4, 1  ;;  %p642_p1 = scmp.lt.s32.totalorder %s6725_s4, 3 }
  0x10   : > { %p643_p2 = pnand %p5976_p0, %p642_p1 }
  0x12   : > { %646 = sbr.rel (%p643_p2) target bundleno = 3422 (0xd5e), region = 104 }
  0x17   : > { %p716_p3 = scmp.lt.s32.totalorder %s5972_s30, 1  ;;  %v8391_v0 = vmov 0.0   ;;  %v6728_v1 = vmov 0   ;;  %s8443_s5 = sld [smem:[#allocation15_spill]]  ;;  %vm755_vm0 = vcmask 1042432   ;;  %vm751_vm1 = vcmask 220160  }
  0x18   : > { %826 = vmatprep.mubr.f32.mxu0 %v8391_v0  ;;  %6626 = vset.pattern.permute.xlu0 %v6728_v1  ;;  %s8444_s6 = sld [smem:[#allocation13_spill]]  ;;  %v863_v12 = vlaneseq  ;;  %vm845_vm5 = vcmask 138240   ;;  %s8388_s3 = smov 17  }
  0x19   : > { %s8542_s30 = smov (!%p716_p3, %s5972_s30), 1  ;;  %993 = vmatprep.mubr.f32.mxu1 %v8391_v0  ;;  %6662 = vset.pattern.permute.xlu1 %v6728_v1  ;;  %s8445_s29 = sld [smem:[#allocation14_spill]]  ;;  %846 = vst.msk [vmem:[#allocation2] sm:$0xff] %vm845_vm5, %v8391_v0 }
  0x1a   : > { %s6189_s1 = sshll.u32 %s8542_s30, 6  ;;  %v6894_v13 = vand.u32 127, %v863_v12  ;;  %s6730_s0 = smov 2  }
  0x1b   : > { %s8390_s24 = smov 1   ;;  %s8386_s25 = smov 18  }
  0x1c   : > { %v868_v14 = vshra.s32 %v6894_v13, 4  ;;  %v866_v15 = vand.u32 15, %v6894_v13  ;;  %v865_v30 = vadd.s32 128, %v6894_v13  ;;  %s6735_s26 = smov 32   ;;  %s6736_s2 = smov 34  }
  0x1d   : > { %v745_v2 = vld [vmem:[%s8443_s5] sm:$0xff]  ;;  %s8387_s5 = smov 16   ;;  %s8380_s7 = smov 112  }
  0x1e   : > { %748 = vperm.xlu0 %6626, %v745_v2   ;;  %s720_s27 = scalar_lea.vmem %s8444_s6, %s6189_s1  ;;  %vm6898_vm2 = vcmp.ge.s32.totalorder %v868_v14, 1  ;;  %vm6902_vm3 = vcmp.ge.s32.totalorder %v866_v15, 1  ;;  %v867_v32 = vand.u32 15, %v865_v30  ;;  %v869_v33 = vshra.s32 %v865_v30, 4  ;;  %s6734_s1 = smov 33  }
  0x1f   : > { %v744_v3 = vld [vmem:[%s720_s27 + $0x38] sm:$0x7]  ;;  %v743_v4 = vld [vmem:[%s720_s27 + $0x30] sm:$0x7]  ;;  %v742_v5 = vld [vmem:[%s720_s27 + $0x28] sm:$0xff]  ;;  %vm6913_vm6 = vcmp.lt.s32.totalorder %v866_v15, 15 }
  0x20   : > { %5983 = vmatprep.subr.msk.mxu0 %vm755_vm0, %v744_v3  ;;  %v741_v6 = vld [vmem:[%s720_s27 + $0x20] sm:$0xff]  ;;  %v740_v7 = vld [vmem:[%s720_s27 + $0x18] sm:$0xff]  ;;  %v739_v8 = vld [vmem:[%s720_s27 + $0x10] sm:$0xff]  ;;  %vm6917_vm7 = vcmp.ge.s32.totalorder %v869_v33, 1  ;;  %vm6921_vm8 = vcmp.lt.s32.totalorder %v867_v32, 15  ;;  %v5988_v42 = vsel %vm6898_vm2, 1.0, %v8391_v0 }
  0x21   : > { %5984 = vmatpush1.msk.msra.mxu0 %vm755_vm0, %v743_v4  ;;  %v738_v9 = vld [vmem:[%s720_s27 + $0x8] sm:$0xff]  ;;  %v737_v10 = vld [vmem:[%s720_s27] sm:$0xff]  ;;  %vm876_vm4 = vmand %vm6898_vm2, %vm6902_vm3  ;;  %v5989_v43 = vsel %vm6917_vm7, 1.0, %v8391_v0  ;;  %vm6942_vm11 = vcmp.ge.s32.totalorder %v867_v32, 1  ;;  %vm6946_vm12 = vcmp.lt.s32.totalorder %v868_v14, 15  ;;  %v6012_v48 = vsel %vm6913_vm6, 1.0, %v8391_v0 }
  0x22   : > { %788 = vmatprep.subr.mxu0 %v742_v5  ;;  %v736_v11 = vld [vmem:[%s8445_s29] sm:$0xff]  ;;  %vm1091_vm9 = vmand %vm6898_vm2, %vm6913_vm6  ;;  %v6013_v49 = vsel %vm6921_vm8, 1.0, %v8391_v0  ;;  %vm6956_vm13 = vcmp.lt.s32.totalorder %v869_v33, 15  ;;  %v6627_v51 = vpack.i.bf16 %v5989_v43, %v5988_v42  ;;  %v6002_v52 = vsel %vm6902_vm3, 1.0, %v8391_v0  ;;  %s8384_s6 = smov 127   ;;  %s8382_s27 = smov 126  }
  0x23   : > { %789 = vmatpush1.msra.mxu0 %v741_v6  ;;  %vm1092_vm10 = vmand %vm6917_vm7, %vm6921_vm8  ;;  %v5996_v38 = vsel %vm1091_vm9, 1.0, %v8391_v0  ;;  %v6003_v53 = vsel %vm6942_vm11, 1.0, %v8391_v0  ;;  %v6642_v54 = vpack.i.bf16 %v6013_v49, %v6012_v48  ;;  %v6024_v55 = vsel %vm6946_vm12, 1.0, %v8391_v0  ;;  %s8374_s28 = smov 111   ;;  %s8372_s29 = smov 110  }
  0x24   : > { %790 = vmatprep.subr.mxu0 %v740_v7  ;;  %v5997_v39 = vsel %vm1092_vm10, 1.0, %v8391_v0  ;;  %vm1565_vm14 = vmand %vm6946_vm12, %vm6902_vm3  ;;  %v6025_v56 = vsel %vm6956_vm13, 1.0, %v8391_v0  ;;  %v6637_v57 = vpack.i.bf16 %v6003_v53, %v6002_v52  ;;  %vm897_vm9 = vcmask 7168   ;;  %s8473_s17 = sld [smem:[#allocation21_spill]]  ;;  %s8493_s23 = smov 9  }
  0x25   : > { %791 = vmatpush1.msra.mxu0 %v739_v8  ;;  %v6632_v45 = vpack.i.bf16 %v5997_v39, %v5996_v38  ;;  %vm1566_vm15 = vmand %vm6956_vm13, %vm6942_vm11  ;;  %v6018_v58 = vsel %vm1565_vm14, 1.0, %v8391_v0  ;;  %v6652_v60 = vpack.i.bf16 %v6025_v56, %v6024_v55  ;;  %vm1103_vm10 = vcmask 15360   ;;  %s8498_s22 = smov 95   ;;  %s8504_s21 = smov 94  }
  0x26   : > { %792 = vmatprep.subr.mxu0 %v738_v9  ;;  %v6019_v59 = vsel %vm1566_vm15, 1.0, %v8391_v0  ;;  %vm1811_vm0 = vmand %vm6946_vm12, %vm6913_vm6  ;;  %vm857_vm6 = vcmask 1047688   ;;  %vm1225_vm12 = vcmask 130048   ;;  %vm1577_vm14 = vcmask 261120  }
  0x27   : > { %793 = vmatpush1.msra.mxu0 %v737_v10  ;;  %v6647_v61 = vpack.i.bf16 %v6019_v59, %v6018_v58  ;;  %v6030_v62 = vsel %vm1811_vm0, 1.0, %v8391_v0  ;;  %vm1699_vm15 = vcmask 269312   ;;  %vm1823_vm0 = vcmask 277504  }
  0x28   : > { %5985 = vmatmul.mubr.msk.f32.vlgmr.msra.gmra.mxu0 %vm751_vm1, %v736_v11  ;;  %vm1812_vm1 = vmand %vm6956_vm13, %vm6921_vm8  ;;  %vm861_vm8 = vcmask 277640   ;;  %vm1451_vm13 = vcmask 146432   ;;  %vm8399_vm2 = vcmask 1031168   ;;  %vm8396_vm3 = vcmask 908288  }
  0x29   : > { %1198 = vmatprep.mubr.f32.mxu0 %v8391_v0  ;;  %v6031_v63 = vsel %vm1812_vm1, 1.0, %v8391_v0  ;;  %vm877_vm1 = vmand %vm6917_vm7, %vm6942_vm11  ;;  %vm922_vm7 = vcmask 64512   ;;  %vm8397_vm11 = vcmask 900096  }
  0x2a   : > { %v6657_v1 = vpack.i.bf16 %v6031_v63, %v6030_v62 }
  0x99   : > { %v749_v18 = vpop.permute.xlu0 %748 }
  0xe8   : > { %v828_v19 = vpop.f32.mrf.mxu0 }
  0xe9   : > { %v829_v20 = vadd.f32 %v828_v19, %v749_v18 }
  0xea   : > { %v830_v21 = vpop.f32.mrf.mxu0 }
  0xeb   : > { %v833_v22 = vsub.f32 0.0, %v829_v20  ;;  %v831_v23 = vadd.f32 %v830_v21, %v749_v18 }
  0xed   : > { %v835_v24 = vmul.f32 1.442695, %v833_v22  ;;  %v834_v25 = vsub.f32 0.0, %v831_v23 }
  0xef   : > { %6663 = vpow2.f32 %v835_v24  ;;  %v837_v26 = vmul.f32 1.442695, %v834_v25 }
  0xf1   : > { %6665 = vpow2.f32 %v837_v26 }
  0xfc   : > { %v6664_v27 = vpop.eup %6663 }
  0xfd   : > { %v839_v28 = vadd.f32 1.0, %v6664_v27 }
  0xfe   : > { %v6666_v29 = vpop.eup %6665 }
  0xff   : > { %6667 = vrcp.f32 %v839_v28  ;;  %v840_v31 = vadd.f32 1.0, %v6666_v29 }
 0x101   : > { %6669 = vrcp.f32 %v840_v31 }
 0x10c   : > { %v6668_v37 = vpop.eup %6667 }
 0x10d   : > { %v843_v40 = vmul.f32 %v6668_v37, %v829_v20 }
 0x10e   : > { %v6670_v41 = vpop.eup %6669 }
 0x10f   : > { %849 = vrot.lane.b32.xlu0 %v843_v40, %s8388_s3  ;;  %v844_v44 = vmul.f32 %v6670_v41, %v831_v23 }
 0x111   : > { %851 = vrot.lane.b32.xlu1 %v844_v44, %s8388_s3  ;;  %s8406_s3 = smov 9  }
 0x113   : > { %6633 = vrot.lane.b32.xlu0 %v6632_v45, %s6730_s0 }
 0x115   : > { %6628 = vrot.lane.b32.xlu1 %v6627_v51, %s8390_s24  ;;  %s8481_s24 = smov 1  }
 0x117   : > { %6643 = vrot.lane.b32.xlu0 %v6642_v54, %s8386_s25  ;;  %s8485_s25 = sld [smem:[#allocation18_spill]] }
 0x119   : > { %6638 = vrot.lane.b32.xlu1 %v6637_v57, %s8387_s5  ;;  %s8486_s5 = smov 127  }
 0x11b   : > { %6653 = vrot.lane.b32.xlu0 %v6652_v60, %s6734_s1  ;;  %s8370_s1 = smov 96  }
 0x11d   : > { %6648 = vrot.lane.b32.xlu1 %v6647_v61, %s6735_s26  ;;  %s8378_s26 = smov 95  }
 0x121   : > { %6658 = vrot.lane.b32.xlu1 %v6657_v1, %s6736_s2  ;;  %s8376_s2 = smov 94  }
 0x181   : > { %v850_v2 = vpop.permute.xlu0 %849 }
 0x182   : > { %858 = vst.msk [vmem:[#allocation2] sm:$0xff] %vm857_vm6, %v850_v2 }
 0x183   : > { %v852_v3 = vpop.permute.xlu1 %851 }
 0x184   : > { %860 = vst.msk [vmem:[#allocation2 + $0x10] sm:$0xff] %vm845_vm5, %v852_v3  ;;  %v7020_v18 = vsel %vm845_vm5, %v850_v2, %v852_v3  ;;  %v7143_v3 = vsel %vm877_vm1, 1.0, %v8391_v0 }
 0x185   : > { %862 = vst.msk [vmem:[#allocation2 + $0x10] sm:$0xff] %vm861_vm8, %v8391_v0  ;;  %v6634_v4 = vpop.permute.xlu0 %6633  ;;  %8470 = vst [vmem:[#allocation11_spill] sm:$0xff] %v7143_v3 }
 0x186   : > { %v7001_v6 = vunpack.i.l.bf16 %v6634_v4  ;;  %v7035_v23 = vunpack.i.h.bf16 %v6634_v4 }
 0x187   : > { %v6629_v5 = vpop.permute.xlu1 %6628 }
 0x188   : > { %v7003_v7 = vunpack.i.l.bf16 %v6629_v5  ;;  %v7011_v11 = vunpack.i.h.bf16 %v6629_v5  ;;  %v7043_v27 = vsel %vm1103_vm10, %v7001_v6, %v7035_v23  ;;  %vm8394_vm10 = vcmask 785408  }
 0x189   : > { %v7005_v8 = vld [vmem:[#allocation2] sm:$0xff]  ;;  %v6644_v24 = vpop.permute.xlu0 %6643  ;;  %v1109_v30 = vmul.f32 %v7043_v27, %v7020_v18 }
 0x18a   : > { %v902_v9 = vmul.f32 %v7003_v7, %v7005_v8  ;;  %v1108_v10 = vmul.f32 %v7001_v6, %v7005_v8  ;;  %v7024_v19 = vsel %vm897_vm9, %v7003_v7, %v7011_v11  ;;  %v7039_v25 = vunpack.i.l.bf16 %v6644_v24 }
 0x18b   : > { %v6639_v12 = vpop.permute.xlu1 %6638  ;;  %v903_v21 = vmul.f32 %v7024_v19, %v7020_v18  ;;  %v7076_v40 = vunpack.i.h.bf16 %v6644_v24  ;;  %vm917_vm9 = vcmask 1039360  }
 0x18c   : > { %v7013_v14 = vunpack.i.l.bf16 %v6639_v12  ;;  %911 = vrot.lane.b32.xlu0 %v902_v9, %s8384_s6  ;;  %1117 = vrot.lane.b32.xlu1 %v1108_v10, %s8382_s27  ;;  %v7026_v20 = vld [vmem:[#allocation2 + $0x10] sm:$0xff]  ;;  %v1456_v29 = vmul.f32 %v7039_v25, %v7005_v8  ;;  %v7055_v31 = vunpack.i.h.bf16 %v6639_v12  ;;  %v7151_v9 = vsel %vm876_vm4, 1.0, %v8391_v0 }
 0x18d   : > { %v904_v22 = vmul.f32 %v7011_v11, %v7026_v20  ;;  %v1110_v32 = vmul.f32 %v7035_v23, %v7026_v20  ;;  %v6654_v34 = vpop.permute.xlu0 %6653  ;;  %v1458_v43 = vmul.f32 %v7076_v40, %v7026_v20  ;;  %v7088_v44 = vsel %vm1451_vm13, %v7039_v25, %v7076_v40  ;;  %8471 = vst [vmem:[#allocation12_spill] sm:$0xff] %v7151_v9 }
 0x18e   : > { %v1230_v15 = vmul.f32 %v7013_v14, %v7005_v8  ;;  %v7066_v36 = vsel %vm1225_vm12, %v7013_v14, %v7055_v31  ;;  %v7070_v37 = vunpack.i.l.bf16 %v6654_v34  ;;  %v1232_v39 = vmul.f32 %v7055_v31, %v7026_v20  ;;  %8463 = vst [vmem:[#allocation5_spill] sm:$0xff] %v7088_v44 }
 0x18f   : > { %v6649_v26 = vpop.permute.xlu1 %6648  ;;  %8462 = vst [vmem:[#allocation4_spill] sm:$0xff] %v7066_v36  ;;  %v1231_v38 = vmul.f32 %v7066_v36, %v7020_v18  ;;  %v1457_v48 = vmul.f32 %v7088_v44, %v7020_v18  ;;  %v7101_v50 = vunpack.i.h.bf16 %v6654_v34  ;;  %v883_v12 = vmul.f32 %v7143_v3, %v7020_v18 }
 0x190   : > { %1239 = vrot.lane.b32.xlu0 %v1230_v15, %s8380_s7  ;;  %1345 = vrot.lane.b32.xlu1 %v7020_v18, %s8374_s28  ;;  %v7049_v28 = vunpack.i.l.bf16 %v6649_v26  ;;  %v7078_v41 = vunpack.i.h.bf16 %v6649_v26  ;;  %v1704_v42 = vmul.f32 %v7070_v37, %v7005_v8  ;;  %v882_v16 = vmul.f32 %v7151_v9, %v7005_v8 }
 0x191   : > { %v1706_v54 = vmul.f32 %v7101_v50, %v7026_v20  ;;  %v7115_v55 = vsel %vm1699_vm15, %v7070_v37, %v7101_v50  ;;  %vm8398_vm4 = vcmask 916480   ;;  %vm8395_vm13 = vcmask 777216  }
 0x192   : > { %v1582_v33 = vmul.f32 %v7049_v28, %v7005_v8  ;;  %v7093_v45 = vsel %vm1577_vm14, %v7049_v28, %v7078_v41  ;;  %v1584_v53 = vmul.f32 %v7078_v41, %v7026_v20  ;;  %8467 = vst [vmem:[#allocation9_spill] sm:$0xff] %v7115_v55  ;;  %v1705_v57 = vmul.f32 %v7115_v55, %v7020_v18 }
 0x193   : > { %8464 = vst [vmem:[#allocation6_spill] sm:$0xff] %v7093_v45  ;;  %v6659_v47 = vpop.permute.xlu1 %6658  ;;  %v1583_v49 = vmul.f32 %v7093_v45, %v7020_v18  ;;  %vm8393_vm15 = vcmask 769024  }
 0x194   : > { %913 = vrot.lane.b32.xlu0 %v903_v21, %s8384_s6  ;;  %915 = vrot.lane.b32.xlu1 %v904_v22, %s8384_s6  ;;  %v7103_v51 = vunpack.i.h.bf16 %v6659_v47  ;;  %v7105_v52 = vunpack.i.l.bf16 %v6659_v47  ;;  %s6746_s6 = smov 10  }
 0x196   : > { %8465 = vst [vmem:[#allocation7_spill] sm:$0xff] %v7103_v51  ;;  %8466 = vst [vmem:[#allocation8_spill] sm:$0xff] %v7105_v52  ;;  %v7119_v56 = vsel %vm1823_vm0, %v7105_v52, %v7103_v51  ;;  %v1830_v59 = vmul.f32 %v7103_v51, %v7026_v20  ;;  %v1828_v60 = vmul.f32 %v7105_v52, %v7005_v8 }
 0x197   : > { %8468 = vst [vmem:[#allocation10_spill] sm:$0xff] %v7119_v56  ;;  %v1829_v58 = vmul.f32 %v7119_v56, %v7020_v18 }
 0x198   : > { %1347 = vrot.lane.b32.xlu0 %v7026_v20, %s8374_s28  ;;  %1343 = vrot.lane.b32.xlu1 %v7005_v8, %s8374_s28  ;;  %s8469_s28 = sld [smem:[#allocation17_spill]] }
 0x19c   : > { %1465 = vrot.lane.b32.xlu0 %v1456_v29, %s8372_s29  ;;  %1119 = vrot.lane.b32.xlu1 %v1109_v30, %s8382_s27 }
 0x19e   : > { %v1968_v61 = vld [vmem:[%s8469_s28 + $0x8] sm:$0xff] }
 0x1a0   : > { %1121 = vrot.lane.b32.xlu0 %v1110_v32, %s8382_s27  ;;  %1591 = vrot.lane.b32.xlu1 %v1582_v33, %s8370_s1  ;;  %s8482_s27 = smov 17  }
 0x1a4   : > { %1241 = vrot.lane.b32.xlu0 %v1231_v38, %s8380_s7  ;;  %1243 = vrot.lane.b32.xlu1 %v1232_v39, %s8380_s7  ;;  %s8483_s7 = smov 16  }
 0x1a8   : > { %1713 = vrot.lane.b32.xlu0 %v1704_v42, %s8378_s26  ;;  %1469 = vrot.lane.b32.xlu1 %v1458_v43, %s8372_s29 }
 0x1ac   : > { %1467 = vrot.lane.b32.xlu0 %v1457_v48, %s8372_s29  ;;  %1593 = vrot.lane.b32.xlu1 %v1583_v49, %s8370_s1  ;;  %s8488_s29 = smov 112  }
 0x1b0   : > { %1595 = vrot.lane.b32.xlu0 %v1584_v53, %s8370_s1  ;;  %1717 = vrot.lane.b32.xlu1 %v1706_v54, %s8378_s26  ;;  %s8484_s1 = smov 18  }
 0x1b4   : > { %1715 = vrot.lane.b32.xlu0 %v1705_v57, %s8378_s26  ;;  %1839 = vrot.lane.b32.xlu1 %v1829_v58, %s8376_s2  ;;  %s8400_s26 = smov 118  }
 0x1b8   : > { %1841 = vrot.lane.b32.xlu0 %v1830_v59, %s8376_s2  ;;  %1837 = vrot.lane.b32.xlu1 %v1828_v60, %s8376_s2  ;;  %s8472_s2 = sld [smem:[#allocation16_spill]] }
 0x1bc   : > { %1976 = vperm.xlu0 %6626, %v1968_v61  }
 0x1be   : > { %v5990_v35 = vld [vmem:[%s8472_s2 + $0x10] sm:$0xff]  ;;  %v5991_v20 = vld [vmem:[%s8472_s2 + $0x18] sm:$0xff]  ;;  %v884_v8 = vld [vmem:[%s8472_s2] sm:$0xff] }
 0x1bf   : > { %v885_v29 = vld [vmem:[%s8472_s2 + $0x8] sm:$0xff]  ;;  %v5998_v30 = vld [vmem:[%s8472_s2 + $0x20] sm:$0xff]  ;;  %v6004_v48 = vld [vmem:[%s8472_s2 + $0x30] sm:$0xff] }
 0x1c0   : > { %v5999_v47 = vld [vmem:[%s8472_s2 + $0x28] sm:$0xff]  ;;  %v6005_v54 = vld [vmem:[%s8472_s2 + $0x38] sm:$0xff]  ;;  %v6008_v57 = vld [vmem:[%s8472_s2 + $0x40] sm:$0xff] }
 0x1fe   : > { %v912_v62 = vpop.permute.xlu0 %911  ;;  %v1118_v63 = vpop.permute.xlu1 %1117 }
 0x202   : > { %v1240_v1 = vpop.permute.xlu0 %1239  ;;  %v1346_v2 = vpop.permute.xlu1 %1345 }
 0x206   : > { %v914_v4 = vpop.permute.xlu0 %913  ;;  %v916_v5 = vpop.permute.xlu1 %915 }
 0x207   : > { %v919_v10 = vsel %vm917_vm9, %v914_v4, %v916_v5  ;;  %v918_v46 = vsel %vm917_vm9, %v912_v62, %v914_v4  ;;  %v6009_v62 = vld [vmem:[%s8472_s2 + $0x48] sm:$0xff]  ;;  %v6015_v5 = vld [vmem:[%s8472_s2 + $0x58] sm:$0xff] }
 0x208   : > { %959 = vmatprep.subr.mxu1 %v919_v10  ;;  %v6020_v10 = vld [vmem:[%s8472_s2 + $0x60] sm:$0xff] }
 0x209   : > { %960 = vmatpush1.msra.mxu1 %v918_v46 }
 0x20a   : > { %v1348_v17 = vpop.permute.xlu0 %1347  ;;  %5992 = vmatmul.mubr.msk.f32.vlgmr.msra.gmra.mxu1 %vm922_vm7, %v5990_v35  ;;  %1042 = vmatprep.subr.mxu1 %v883_v12  ;;  %v1344_v15 = vpop.permute.xlu1 %1343 }
 0x20b   : > { %1043 = vmatpush1.msra.mxu1 %v882_v16  ;;  %999 = vmatprep.mubr.f32.mxu1 %v8391_v0  ;;  %v1351_v34 = vsel %vm8396_vm3, %v1346_v2, %v1348_v17  ;;  %v1350_v39 = vsel %vm8396_vm3, %v1344_v15, %v1346_v2  ;;  %v6021_v15 = vld [vmem:[%s8472_s2 + $0x68] sm:$0xff] }
 0x20e   : > { %v1466_v21 = vpop.permute.xlu0 %1465  ;;  %5993 = vmatmul.mubr.msk.f32.gmra.mxu1 %vm922_vm7, %v5991_v20  ;;  %v1120_v18 = vpop.permute.xlu1 %1119  ;;  %v6026_v20 = vld [vmem:[%s8472_s2 + $0x70] sm:$0xff] }
 0x20f   : > { %1076 = vmatprep.mubr.f32.mxu1 %v8391_v0  ;;  %v1124_v32 = vsel %vm8399_vm2, %v1118_v63, %v1120_v18  ;;  %v6014_v63 = vld [vmem:[%s8472_s2 + $0x50] sm:$0xff] }
 0x212   : > { %v1122_v22 = vpop.permute.xlu0 %1121  ;;  %5994 = vmatmul.mubr.msk.f32.vlgmr.msra.gmra.mxu1 %vm922_vm7, %v884_v8  ;;  %v1592_v24 = vpop.permute.xlu1 %1591 }
 0x213   : > { %v1125_v26 = vsel %vm8399_vm2, %v1120_v18, %v1122_v22  ;;  %1082 = vmatprep.mubr.f32.mxu1 %v8391_v0  ;;  %vm2080_vm2 = vcmask 671304  }
 0x214   : > { %1164 = vmatprep.subr.mxu0 %v1125_v26  ;;  %v6032_v26 = vld [vmem:[%s8472_s2 + $0x80] sm:$0xff] }
 0x215   : > { %1165 = vmatpush1.msra.mxu0 %v1124_v32  ;;  %v1950_v32 = vld [vmem:[%s8473_s17 + $0x78] sm:$0xff] }
 0x216   : > { %v1242_v33 = vpop.permute.xlu0 %1241  ;;  %5995 = vmatmul.mubr.msk.f32.gmra.mxu1 %vm922_vm7, %v885_v29  ;;  %6000 = vmatmul.mubr.msk.f32.vlgmr.msra.gmra.mxu0 %vm922_vm7, %v5998_v30  ;;  %v1244_v38 = vpop.permute.xlu1 %1243  ;;  %v6033_v29 = vld [vmem:[%s8472_s2 + $0x88] sm:$0xff]  ;;  %v1966_v30 = vld [vmem:[%s8473_s17 + $0xf8] sm:$0xff] }
 0x217   : > { %1390 = vmatprep.subr.mxu0 %v1351_v34  ;;  %v1247_v42 = vsel %vm8398_vm4, %v1242_v33, %v1244_v38  ;;  %1204 = vmatprep.mubr.f32.mxu0 %v8391_v0  ;;  %v1246_v43 = vsel %vm8398_vm4, %v1240_v1, %v1242_v33  ;;  %v1965_v33 = vld [vmem:[%s8473_s17 + $0xf0] sm:$0xff]  ;;  %v1964_v38 = vld [vmem:[%s8473_s17 + $0xe8] sm:$0xff]  ;;  %vm2077_vm4 = vcmask 597064  }
 0x218   : > { %1391 = vmatpush1.msra.mxu0 %v1350_v39  ;;  %1286 = vmatprep.subr.mxu1 %v1247_v42  ;;  %v1949_v34 = vld [vmem:[%s8473_s17 + $0x70] sm:$0xff]  ;;  %v1948_v39 = vld [vmem:[%s8473_s17 + $0x68] sm:$0xff]  ;;  %v1963_v42 = vld [vmem:[%s8473_s17 + $0xe0] sm:$0xff] }
 0x219   : > { %1287 = vmatpush1.msra.mxu1 %v1246_v43  ;;  %1320 = vmatprep.mubr.f32.mxu1 %v8391_v0  ;;  %v1947_v43 = vld [vmem:[%s8473_s17 + $0x60] sm:$0xff] }
 0x21a   : > { %v1714_v49 = vpop.permute.xlu0 %1713  ;;  %6001 = vmatmul.mubr.msk.f32.gmra.mxu0 %vm922_vm7, %v5999_v47  ;;  %6006 = vmatmul.mubr.msk.f32.vlgmr.msra.gmra.mxu1 %vm922_vm7, %v6004_v48  ;;  %v1470_v53 = vpop.permute.xlu1 %1469  ;;  %v1962_v47 = vld [vmem:[%s8473_s17 + $0xd8] sm:$0xff] }
 0x21b   : > { %1326 = vmatprep.mubr.f32.mxu1 %v8391_v0  ;;  %1424 = vmatprep.mubr.f32.mxu0 %v8391_v0  ;;  %v1946_v48 = vld [vmem:[%s8473_s17 + $0x58] sm:$0xff] }
 0x21e   : > { %v1468_v58 = vpop.permute.xlu0 %1467  ;;  %6007 = vmatmul.mubr.msk.f32.gmra.mxu1 %vm922_vm7, %v6005_v54  ;;  %6010 = vmatmul.mubr.msk.f32.vlgmr.msra.gmra.mxu0 %vm922_vm7, %v6008_v57  ;;  %v1594_v59 = vpop.permute.xlu1 %1593  ;;  %v1960_v54 = vld [vmem:[%s8473_s17 + $0xc8] sm:$0xff] }
 0x21f   : > { %v1473_v60 = vsel %vm8397_vm11, %v1468_v58, %v1470_v53  ;;  %1430 = vmatprep.mubr.f32.mxu0 %v8391_v0  ;;  %v1472_v61 = vsel %vm8397_vm11, %v1466_v21, %v1468_v58  ;;  %1546 = vmatprep.mubr.f32.mxu1 %v8391_v0  ;;  %v1598_v46 = vsel %vm8394_vm10, %v1592_v24, %v1594_v59  ;;  %v6027_v24 = vld [vmem:[%s8472_s2 + $0x78] sm:$0xff]  ;;  %v1945_v53 = vld [vmem:[%s8473_s17 + $0x50] sm:$0xff]  ;;  %v1944_v57 = vld [vmem:[%s8473_s17 + $0x48] sm:$0xff]  ;;  %s8495_s2 = smov 120  }
 0x220   : > { %1512 = vmatprep.subr.mxu1 %v1473_v60  ;;  %v1959_v58 = vld [vmem:[%s8473_s17 + $0xc0] sm:$0xff]  ;;  %v1958_v60 = vld [vmem:[%s8473_s17 + $0xb8] sm:$0xff] }
 0x221   : > { %1513 = vmatpush1.msra.mxu1 %v1472_v61  ;;  %v1942_v61 = vld [vmem:[%s8473_s17 + $0x38] sm:$0xff] }
 0x222   : > { %v1596_v1 = vpop.permute.xlu0 %1595  ;;  %6011 = vmatmul.mubr.msk.f32.gmra.mxu0 %vm922_vm7, %v6009_v62  ;;  %6016 = vmatmul.mubr.msk.f32.vlgmr.msra.gmra.mxu1 %vm922_vm7, %v6014_v63  ;;  %v1718_v2 = vpop.permute.xlu1 %1717  ;;  %v1957_v62 = vld [vmem:[%s8473_s17 + $0xb0] sm:$0xff] }
 0x223   : > { %v1599_v4 = vsel %vm8394_vm10, %v1594_v59, %v1596_v1  ;;  %1552 = vmatprep.mubr.f32.mxu1 %v8391_v0  ;;  %1672 = vmatprep.mubr.f32.mxu0 %v8391_v0  ;;  %v1943_v59 = vld [vmem:[%s8473_s17 + $0x40] sm:$0xff]  ;;  %v1941_v63 = vld [vmem:[%s8473_s17 + $0x30] sm:$0xff]  ;;  %v1956_v1 = vld [vmem:[%s8473_s17 + $0xa8] sm:$0xff] }
 0x224   : > { %1638 = vmatprep.subr.mxu0 %v1599_v4  ;;  %v1955_v4 = vld [vmem:[%s8473_s17 + $0xa0] sm:$0xff] }
 0x225   : > { %1639 = vmatpush1.msra.mxu0 %v1598_v46  ;;  %v1938_v46 = vld [vmem:[%s8473_s17 + $0x18] sm:$0xff] }
 0x226   : > { %v1716_v35 = vpop.permute.xlu0 %1715  ;;  %6017 = vmatmul.mubr.msk.f32.gmra.mxu1 %vm922_vm7, %v6015_v5  ;;  %6022 = vmatmul.mubr.msk.f32.vlgmr.msra.gmra.mxu0 %vm922_vm7, %v6020_v10  ;;  %v1840_v12 = vpop.permute.xlu1 %1839  ;;  %v1939_v5 = vld [vmem:[%s8473_s17 + $0x20] sm:$0xff]  ;;  %v1954_v10 = vld [vmem:[%s8473_s17 + $0x98] sm:$0xff] }
 0x227   : > { %v1721_v16 = vsel %vm8395_vm13, %v1716_v35, %v1718_v2  ;;  %1678 = vmatprep.mubr.f32.mxu0 %v8391_v0  ;;  %v1720_v17 = vsel %vm8395_vm13, %v1714_v49, %v1716_v35  ;;  %1794 = vmatprep.mubr.f32.mxu1 %v8391_v0  ;;  %v1961_v49 = vld [vmem:[%s8473_s17 + $0xd0] sm:$0xff]  ;;  %v1940_v2 = vld [vmem:[%s8473_s17 + $0x28] sm:$0xff] }
 0x228   : > { %1760 = vmatprep.subr.mxu1 %v1721_v16  ;;  %v1953_v35 = vld [vmem:[%s8473_s17 + $0x90] sm:$0xff]  ;;  %v1952_v16 = vld [vmem:[%s8473_s17 + $0x88] sm:$0xff] }
 0x229   : > { %1761 = vmatpush1.msra.mxu1 %v1720_v17  ;;  %v1936_v17 = vld [vmem:[%s8473_s17 + $0x8] sm:$0xff] }
 0x22a   : > { %v1842_v21 = vpop.permute.xlu0 %1841  ;;  %6023 = vmatmul.mubr.msk.f32.gmra.mxu0 %vm922_vm7, %v6021_v15  ;;  %6028 = vmatmul.mubr.msk.f32.vlgmr.msra.gmra.mxu1 %vm922_vm7, %v6026_v20  ;;  %v1838_v18 = vpop.permute.xlu1 %1837  ;;  %v1951_v15 = vld [vmem:[%s8473_s17 + $0x80] sm:$0xff] }
 0x22b   : > { %v1844_v8 = vsel %vm8393_vm15, %v1838_v18, %v1840_v12  ;;  %v1845_v22 = vsel %vm8393_vm15, %v1840_v12, %v1842_v21  ;;  %1800 = vmatprep.mubr.f32.mxu1 %v8391_v0  ;;  %1918 = vmatprep.mubr.f32.mxu0 %v8391_v0  ;;  %v1937_v12 = vld [vmem:[%s8473_s17 + $0x10] sm:$0xff]  ;;  %v1935_v20 = vld [vmem:[%s8473_s17] sm:$0xff]  ;;  %vm2066_vm15 = vcmask 72704   ;;  %s8492_s17 = sld [smem:[#allocation20_spill]] }
 0x22c   : > { %1884 = vmatprep.subr.mxu0 %v1845_v22  ;;  %6191 = vmatprep.subr.mxu1 %v1966_v30  ;;  %v1967_v21 = vld [vmem:[%s8469_s28] sm:$0xff] }
 0x22d   : > { %1885 = vmatpush1.msra.mxu0 %v1844_v8  ;;  %6192 = vmatpush3.msra.mxu1 %v1950_v32 }
 0x22e   : > { %6029 = vmatmul.mubr.msk.f32.gmra.mxu1 %vm922_vm7, %v6027_v24  ;;  %6034 = vmatmul.mubr.msk.f32.vlgmr.msra.gmra.mxu0 %vm922_vm7, %v6032_v26 }
 0x22f   : > { %1924 = vmatprep.mubr.f32.mxu0 %v8391_v0  ;;  %6193 = vmatprep.subr.mxu1 %v1965_v33 }
 0x230   : > { %6194 = vmatpush3.msra.mxu1 %v1949_v34  ;;  %1971 = vperm.xlu1 %6662, %v1967_v21  }
 0x231   : > { %6195 = vmatprep.subr.mxu1 %v1964_v38 }
 0x232   : > { %6035 = vmatmul.mubr.msk.f32.gmra.mxu0 %vm922_vm7, %v6033_v29  ;;  %6196 = vmatpush3.msra.mxu1 %v1948_v39 }
 0x233   : > { %6197 = vmatprep.subr.mxu1 %v1963_v42 }
 0x234   : > { %6198 = vmatpush3.msra.mxu1 %v1947_v43 }
 0x235   : > { %6199 = vmatprep.subr.mxu1 %v1962_v47 }
 0x236   : > { %6200 = vmatpush3.msra.mxu1 %v1946_v48 }
 0x237   : > { %6201 = vmatprep.subr.mxu1 %v1961_v49 }
 0x238   : > { %6202 = vmatpush3.msra.mxu1 %v1945_v53 }
 0x239   : > { %6203 = vmatprep.subr.mxu1 %v1960_v54 }
 0x23a   : > { %6204 = vmatpush3.msra.mxu1 %v1944_v57 }
 0x23b   : > { %6205 = vmatprep.subr.mxu1 %v1959_v58 }
 0x23c   : > { %6206 = vmatpush3.msra.mxu1 %v1943_v59 }
 0x23d   : > { %6207 = vmatprep.subr.mxu1 %v1958_v60 }
 0x23e   : > { %6208 = vmatpush3.msra.mxu1 %v1942_v61 }
 0x23f   : > { %6209 = vmatprep.subr.mxu1 %v1957_v62 }
 0x240   : > { %6210 = vmatpush3.msra.mxu1 %v1941_v63 }
 0x241   : > { %6211 = vmatprep.subr.mxu1 %v1956_v1 }
 0x242   : > { %6212 = vmatpush3.msra.mxu1 %v1940_v2 }
 0x243   : > { %6213 = vmatprep.subr.mxu1 %v1955_v4 }
 0x244   : > { %6214 = vmatpush3.msra.mxu1 %v1939_v5 }
 0x245   : > { %6215 = vmatprep.subr.mxu1 %v1954_v10 }
 0x246   : > { %6216 = vmatpush3.msra.mxu1 %v1938_v46 }
 0x247   : > { %6217 = vmatprep.subr.mxu1 %v1953_v35 }
 0x248   : > { %6218 = vmatpush3.msra.mxu1 %v1937_v12 }
 0x249   : > { %6219 = vmatprep.subr.mxu1 %v1952_v16 }
 0x24a   : > { %6220 = vmatpush3.msra.mxu1 %v1936_v17 }
 0x24b   : > { %6221 = vmatprep.subr.mxu1 %v1951_v15 }
 0x24c   : > { %6222 = vmatpush3.msra.mxu1 %v1935_v20 }
 0x2ca   : > { %v995_v18 = vpop.f32.mrf.mxu1 }
 0x2cc   : > { %v997_v8 = vpop.f32.mrf.mxu1 }
 0x2ce   : > { %v1001_v22 = vpop.f32.mrf.mxu1 }
 0x2d0   : > { %v1003_v24 = vpop.f32.mrf.mxu1 }
 0x2d2   : > { %v1078_v26 = vpop.f32.mrf.mxu1 }
 0x2d3   : > { %v1079_v59 = vadd.f32 %v1078_v26, %v995_v18 }
 0x2d4   : > { %v1080_v29 = vpop.f32.mrf.mxu1 }
 0x2d5   : > { %v1081_v58 = vadd.f32 %v1080_v29, %v997_v8 }
 0x2d6   : > { %v1084_v30 = vpop.f32.mrf.mxu1  ;;  %v1200_v32 = vpop.f32.mrf.mxu0 }
 0x2d7   : > { %v1211_v63 = vadd.f32 %v1200_v32, %v1079_v59  ;;  %v1085_v10 = vadd.f32 %v1084_v30, %v1001_v22 }
 0x2d8   : > { %v1086_v33 = vpop.f32.mrf.mxu1  ;;  %v1202_v34 = vpop.f32.mrf.mxu0 }
 0x2d9   : > { %v1212_v62 = vadd.f32 %v1202_v34, %v1081_v58  ;;  %v1087_v4 = vadd.f32 %v1086_v33, %v1003_v24 }
 0x2da   : > { %v1206_v38 = vpop.f32.mrf.mxu0  ;;  %v1322_v39 = vpop.f32.mrf.mxu1 }
 0x2db   : > { %v1333_v46 = vadd.f32 %v1322_v39, %v1211_v63  ;;  %v1213_v15 = vadd.f32 %v1206_v38, %v1085_v10 }
 0x2dc   : > { %v1208_v42 = vpop.f32.mrf.mxu0  ;;  %v1324_v43 = vpop.f32.mrf.mxu1 }
 0x2dd   : > { %v1334_v5 = vadd.f32 %v1324_v43, %v1212_v62  ;;  %v1214_v16 = vadd.f32 %v1208_v42, %v1087_v4 }
 0x2de   : > { %v1328_v47 = vpop.f32.mrf.mxu1  ;;  %v1426_v48 = vpop.f32.mrf.mxu0 }
 0x2df   : > { %v1437_v20 = vadd.f32 %v1426_v48, %v1333_v46  ;;  %v1335_v26 = vadd.f32 %v1328_v47, %v1213_v15  ;;  %v8478_v46 = vmov 0.0  }
 0x2e0   : > { %v1330_v49 = vpop.f32.mrf.mxu1  ;;  %v1428_v53 = vpop.f32.mrf.mxu0  ;;  %2067 = vst.msk [vmem:[#allocation2] sm:$0xff] %vm2066_vm15, %v8478_v46  ;;  %2068 = vst.msk [vmem:[#allocation2 + $0x18] sm:$0xff] %vm2066_vm15, %v8478_v46 }
 0x2e1   : > { %v1438_v17 = vadd.f32 %v1428_v53, %v1334_v5  ;;  %v1336_v8 = vadd.f32 %v1330_v49, %v1214_v16  ;;  %v2084_v5 = vshra.s32 %v6894_v13, 3 }
 0x2e2   : > { %v1432_v54 = vpop.f32.mrf.mxu0  ;;  %v1548_v57 = vpop.f32.mrf.mxu1 }
 0x2e3   : > { %v1559_v29 = vadd.f32 %v1548_v57, %v1437_v20  ;;  %v1439_v24 = vadd.f32 %v1432_v54, %v1335_v26  ;;  %vm7362_vm0 = vcmp.ge.s32.totalorder %v2084_v5, 1  ;;  %vm2795_vm3 = vcmp.lt.s32.totalorder %v2084_v5, 7 }
 0x2e4   : > { %v1434_v60 = vpop.f32.mrf.mxu0  ;;  %v1550_v61 = vpop.f32.mrf.mxu1 }
 0x2e5   : > { %v1560_v18 = vadd.f32 %v1550_v61, %v1438_v17  ;;  %v1440_v58 = vadd.f32 %v1434_v60, %v1336_v8 }
 0x2e6   : > { %v1554_v1 = vpop.f32.mrf.mxu1  ;;  %v1674_v2 = vpop.f32.mrf.mxu0 }
 0x2e7   : > { %v1685_v33 = vadd.f32 %v1674_v2, %v1559_v29  ;;  %v1561_v42 = vadd.f32 %v1554_v1, %v1439_v24  ;;  %v6040_v1 = vld [vmem:[%s8485_s25 + $0x30] sm:$0xff] }
 0x2e8   : > { %v1556_v35 = vpop.f32.mrf.mxu1  ;;  %v1676_v12 = vpop.f32.mrf.mxu0 }
 0x2e9   : > { %v1686_v59 = vadd.f32 %v1676_v12, %v1560_v18  ;;  %v1562_v39 = vadd.f32 %v1556_v35, %v1440_v58  ;;  %v1972_v12 = vpop.permute.xlu1 %1971  ;;  %v1977_v18 = vpop.permute.xlu0 %1976 }
 0x2ea   : > { %v1680_v21 = vpop.f32.mrf.mxu0  ;;  %v1796_v0 = vpop.f32.mrf.mxu1 }
 0x2eb   : > { %v1807_v53 = vadd.f32 %v1796_v0, %v1685_v33  ;;  %v1687_v49 = vadd.f32 %v1680_v21, %v1561_v42  ;;  %v2083_v0 = vand.u32 7, %v6894_v13 }
 0x2ec   : > { %v1682_v34 = vpop.f32.mrf.mxu0  ;;  %v1798_v32 = vpop.f32.mrf.mxu1 }
 0x2ed   : > { %v1808_v43 = vadd.f32 %v1798_v32, %v1686_v59  ;;  %v1688_v62 = vadd.f32 %v1682_v34, %v1562_v39  ;;  %vm7366_vm1 = vcmp.ge.s32.totalorder %v2083_v0, 1  ;;  %vm7378_vm10 = vcmp.lt.s32.totalorder %v2083_v0, 7 }
 0x2ee   : > { %v1802_v22 = vpop.f32.mrf.mxu1  ;;  %v1920_v30 = vpop.f32.mrf.mxu0  ;;  %vm2089_vm7 = vmand %vm7362_vm0, %vm7366_vm1 }
 0x2ef   : > { %v1931_v61 = vadd.f32 %v1920_v30, %v1807_v53  ;;  %v1809_v4 = vadd.f32 %v1802_v22, %v1687_v49  ;;  %vm2314_vm13 = vmand %vm7362_vm0, %vm7378_vm10 }
 0x2f0   : > { %v1804_v38 = vpop.f32.mrf.mxu1  ;;  %v1922_v48 = vpop.f32.mrf.mxu0  ;;  %v6050_v42 = vsel %vm2314_vm13, 1.0, %v8478_v46  ;;  %vm2796_vm13 = vmand %vm2795_vm3, %vm7366_vm1 }
 0x2f1   : > { %v1932_v63 = vadd.f32 %v1922_v48, %v1808_v43  ;;  %v1810_v57 = vadd.f32 %v1804_v38, %v1688_v62  ;;  %v6037_v38 = vsel %vm7362_vm0, 1.0, %v8478_v46  ;;  %v6076_v48 = vsel %vm7378_vm10, 1.0, %v8478_v46  ;;  %vm3041_vm11 = vmand %vm2795_vm3, %vm7378_vm10 }
 0x2f2   : > { %v1926_v47 = vpop.f32.mrf.mxu0  ;;  %v6059_v62 = vsel %vm7366_vm1, 1.0, %v8478_v46  ;;  %v6085_v49 = vsel %vm2796_vm13, 1.0, %v8478_v46  ;;  %vm8521_vm13 = vcmask 908288  }
 0x2f3   : > { %2043 = vmatprep.mubr.f32.mxu1 %v1932_v63  ;;  %v1933_v2 = vadd.f32 %v1926_v47, %v1809_v4  ;;  %v6094_v63 = vsel %vm2795_vm3, 1.0, %v8478_v46  ;;  %v6038_v4 = vld [vmem:[%s8485_s25 + $0x20] sm:$0xff]  ;;  %vm3196_vm3 = vcmask 523264  }
 0x2f4   : > { %v1928_v60 = vpop.f32.mrf.mxu0  ;;  %2044 = vmatmul.mubr.f32.vlgmr.msra.gmra.mxu1 %v1931_v61  ;;  %v6103_v61 = vsel %vm3041_vm11, 1.0, %v8478_v46  ;;  %6367 = vmatprep.mubr.msk.f32.mxu0 %vm1225_vm12, %v6038_v4  ;;  %v6039_v4 = vld [vmem:[%s8485_s25 + $0x28] sm:$0xff]  ;;  %vm3431_vm11 = vcmask 392192  }
 0x2f5   : > { %v1934_v54 = vadd.f32 %v1928_v60, %v1810_v57 }
 0x2f7   : > { %2048 = vmatprep.mubr.f32.mxu1 %v1934_v54 }
 0x2f8   : > { %2049 = vmatmul.mubr.f32.gmra.mxu1 %v1933_v2 }
 0x3b4   : > { %v6223_v13 = vpop.f32.mrf.mxu1 }
 0x3b6   : > { %v6224_v35 = vpop.f32.mrf.mxu1 }
 0x3b7   : > { %v6225_v16 = vadd.f32 %v6224_v35, %v6223_v13 }
 0x3b8   : > { %v6226_v17 = vpop.f32.mrf.mxu1 }
 0x3b9   : > { %v2046_v15 = vadd.f32 %v6225_v16, %v1972_v12 }
 0x3ba   : > { %v6227_v20 = vpop.f32.mrf.mxu1 }
 0x3bb   : > { %v2054_v21 = vsub.f32 0.0, %v2046_v15  ;;  %v6228_v8 = vadd.f32 %v6227_v20, %v6226_v17 }
 0x3bd   : > { %v2056_v26 = vmul.f32 1.442695, %v2054_v21  ;;  %v2051_v29 = vadd.f32 %v6228_v8, %v1977_v18 }
 0x3bf   : > { %6671 = vpow2.f32 %v2056_v26  ;;  %v2055_v34 = vsub.f32 0.0, %v2051_v29 }
 0x3c1   : > { %v2058_v32 = vmul.f32 1.442695, %v2055_v34 }
 0x3c3   : > { %6673 = vpow2.f32 %v2058_v32 }
 0x3cc   : > { %v6672_v58 = vpop.eup %6671 }
 0x3cd   : > { %v2060_v59 = vadd.f32 1.0, %v6672_v58 }
 0x3cf   : > { %6675 = vrcp.f32 %v2060_v59 }
 0x3d0   : > { %v6674_v24 = vpop.eup %6673 }
 0x3d1   : > { %v2061_v33 = vadd.f32 1.0, %v6674_v24 }
 0x3d3   : > { %6677 = vrcp.f32 %v2061_v33 }
 0x3dc   : > { %v6676_v30 = vpop.eup %6675 }
 0x3dd   : > { %v7382_v39 = vmul.f32 %v6676_v30, %v2046_v15  ;;  %v6068_v15 = vld [vmem:[%s8485_s25 + $0x80] sm:$0xff] }
 0x3de   : > { %6407 = vmatprep.mubr.msk.f32.mxu1 %vm1225_vm12, %v6068_v15  ;;  %v2096_v15 = vld [vmem:[%s8485_s25 + $0x10] sm:$0xff] }
 0x3df   : > { %2071 = vrot.lane.b32.xlu1 %v7382_v39, %s8406_s3 }
 0x3e0   : > { %v6678_v43 = vpop.eup %6677 }
 0x3e1   : > { %v7391_v53 = vmul.f32 %v6678_v43, %v2051_v29 }
 0x3e3   : > { %2073 = vrot.lane.b32.xlu0 %v7391_v53, %s8406_s3  ;;  %2318 = vrot.lane.b32.xlu1 %v6050_v42, %s6730_s0  ;;  %s6747_s0 = smov 8   ;;  %s8496_s3 = smov 118  }
 0x3e7   : > { %2101 = vrot.lane.b32.xlu0 %v6037_v38, %s8481_s24  ;;  %2676 = vrot.lane.b32.xlu1 %v6076_v48, %s6746_s6  ;;  %s8487_s24 = smov 126   ;;  %s8489_s6 = smov 111   ;;  %v3419_v48 = vld [vmem:[%s8349_s8] sm:$0xff] }
 0x3eb   : > { %2440 = vrot.lane.b32.xlu0 %v6059_v62, %s6747_s0  ;;  %2922 = vrot.lane.b32.xlu1 %v6094_v63, %s8482_s27  ;;  %s8490_s0 = smov 110   ;;  %v3420_v62 = vld [vmem:[%s8349_s8 + $0x8] sm:$0xff] }
 0x3ef   : > { %2800 = vrot.lane.b32.xlu0 %v6085_v49, %s8483_s7  ;;  %s8402_s7 = smov 120   ;;  %v7512_v49 = vsel %vm2089_vm7, 1.0, %v8478_v46 }
 0x3f3   : > { %3045 = vrot.lane.b32.xlu0 %v6103_v61, %s8484_s1  ;;  %s8404_s1 = smov 119  }
 0x451   : > { %v2072_v47 = vpop.permute.xlu1 %2071 }
 0x452   : > { %2078 = vst.msk [vmem:[#allocation2] sm:$0xff] %vm2077_vm4, %v2072_v47 }
 0x453   : > { %2081 = vst.msk [vmem:[#allocation2] sm:$0xff] %vm2080_vm2, %v8478_v46 }
 0x455   : > { %v2074_v57 = vpop.permute.xlu0 %2073  ;;  %v7430_v2 = vpop.permute.xlu1 %2318 }
 0x456   : > { %2079 = vst.msk [vmem:[#allocation2 + $0x18] sm:$0xff] %vm2077_vm4, %v2074_v57 }
 0x457   : > { %2082 = vst.msk [vmem:[#allocation2 + $0x18] sm:$0xff] %vm2080_vm2, %v8478_v46 }
 0x459   : > { %v7426_v60 = vpop.permute.xlu0 %2101  ;;  %v7455_v21 = vpop.permute.xlu1 %2676 }
 0x45a   : > { %v7428_v54 = vld [vmem:[#allocation2] sm:$0xff] }
 0x45b   : > { %v2104_v5 = vmul.f32 %v7426_v60, %v7428_v54  ;;  %3849 = vst.msk [vmem:[#allocation2] sm:$0xff] %vm2066_vm15, %v8478_v46  ;;  %v2321_v0 = vmul.f32 %v7430_v2, %v7428_v54  ;;  %v2679_v8 = vmul.f32 %v7455_v21, %v7428_v54  ;;  %v2092_v10 = vmul.f32 %v7512_v49, %v7428_v54 }
 0x45d   : > { %2113 = vrot.lane.b32.xlu0 %v2104_v5, %s8486_s5  ;;  %v7439_v35 = vpop.permute.xlu0 %2440  ;;  %v7470_v34 = vpop.permute.xlu1 %2922 }
 0x45e   : > { %v2086_v13 = vld [vmem:[#allocation2 + $0x18] sm:$0xff]  ;;  %v2443_v17 = vmul.f32 %v7439_v35, %v7428_v54  ;;  %v2925_v58 = vmul.f32 %v7470_v34, %v7428_v54 }
 0x45f   : > { %v2105_v12 = vmul.f32 %v7426_v60, %v2086_v13  ;;  %3850 = vst.msk [vmem:[#allocation2 + $0x18] sm:$0xff] %vm2066_vm15, %v8478_v46  ;;  %v2322_v16 = vmul.f32 %v7430_v2, %v2086_v13  ;;  %v2444_v20 = vmul.f32 %v7439_v35, %v2086_v13  ;;  %v2680_v26 = vmul.f32 %v7455_v21, %v2086_v13 }
 0x460   : > { %v2926_v24 = vmul.f32 %v7470_v34, %v2086_v13  ;;  %v2093_v57 = vmul.f32 %v7512_v49, %v2086_v13 }
 0x461   : > { %2115 = vrot.lane.b32.xlu1 %v2105_v12, %s8486_s5  ;;  %2330 = vrot.lane.b32.xlu0 %v2321_v0, %s8487_s24  ;;  %v7463_v18 = vpop.permute.xlu0 %2800  ;;  %v2094_v12 = vld [vmem:[%s8485_s25] sm:$0xff] }
 0x462   : > { %v2803_v29 = vmul.f32 %v7463_v18, %v7428_v54  ;;  %v2804_v32 = vmul.f32 %v7463_v18, %v2086_v13 }
 0x465   : > { %2332 = vrot.lane.b32.xlu1 %v2322_v16, %s8487_s24  ;;  %2452 = vrot.lane.b32.xlu0 %v2443_v17, %s8402_s7  ;;  %v7477_v59 = vpop.permute.xlu0 %3045  ;;  %v2095_v17 = vld [vmem:[%s8485_s25 + $0x8] sm:$0xff] }
 0x466   : > { %v3048_v33 = vmul.f32 %v7477_v59, %v7428_v54  ;;  %v3049_v22 = vmul.f32 %v7477_v59, %v2086_v13 }
 0x469   : > { %2454 = vrot.lane.b32.xlu1 %v2444_v20, %s8402_s7  ;;  %2566 = vrot.lane.b32.xlu0 %v7428_v54, %s8404_s1 }
 0x46d   : > { %2568 = vrot.lane.b32.xlu1 %v2086_v13, %s8404_s1  ;;  %2688 = vrot.lane.b32.xlu0 %v2679_v8, %s8400_s26  ;;  %s8491_s1 = sld [smem:[#allocation19_spill]]  ;;  %v6041_v13 = vld [vmem:[%s8485_s25 + $0x38] sm:$0xff] }
 0x471   : > { %2690 = vrot.lane.b32.xlu1 %v2680_v26, %s8400_s26  ;;  %2812 = vrot.lane.b32.xlu0 %v2803_v29, %s8488_s29  ;;  %v2097_v26 = vld [vmem:[%s8485_s25 + $0x18] sm:$0xff]  ;;  %v6069_v29 = vld [vmem:[%s8485_s25 + $0x88] sm:$0xff]  ;;  %s6593_s26 = smul.u32 48, %s8542_s30 }
 0x473   : > { %v3173_v30 = vld [vmem:[%s8491_s1 + $0x8] sm:$0xff]  ;;  %v3172_v43 = vld [vmem:[%s8491_s1] sm:$0xff]  ;;  %v3175_v42 = vld [vmem:[%s8491_s1 + $0x18] sm:$0xff] }
 0x474   : > { %v3174_v38 = vld [vmem:[%s8491_s1 + $0x10] sm:$0xff] }
 0x475   : > { %2814 = vrot.lane.b32.xlu1 %v2804_v32, %s8488_s29  ;;  %2934 = vrot.lane.b32.xlu0 %v2925_v58, %s8489_s6  ;;  %v6051_v32 = vld [vmem:[%s8485_s25 + $0x40] sm:$0xff] }
 0x479   : > { %2936 = vrot.lane.b32.xlu1 %v2926_v24, %s8489_s6  ;;  %3057 = vrot.lane.b32.xlu0 %v3048_v33, %s8490_s0  ;;  %v6070_v24 = vld [vmem:[%s8485_s25 + $0x90] sm:$0xff] }
 0x47d   : > { %3059 = vrot.lane.b32.xlu1 %v3049_v22, %s8490_s0  ;;  %3183 = vperm.xlu0 %6626, %v3173_v30   ;;  %v6052_v22 = vld [vmem:[%s8485_s25 + $0x48] sm:$0xff]  ;;  %v6071_v30 = vld [vmem:[%s8485_s25 + $0x98] sm:$0xff] }
 0x481   : > { %3178 = vperm.xlu1 %6662, %v3172_v43   ;;  %3193 = vperm.xlu0 %6626, %v3175_v42   ;;  %v6053_v42 = vld [vmem:[%s8485_s25 + $0x50] sm:$0xff] }
 0x485   : > { %3188 = vperm.xlu1 %6662, %v3174_v38   ;;  %3423 = vperm.xlu0 %6626, %v3419_v48   ;;  %v6054_v38 = vld [vmem:[%s8485_s25 + $0x58] sm:$0xff] }
 0x489   : > { %3428 = vperm.xlu1 %6662, %v3420_v62   ;;  %v6086_v62 = vld [vmem:[%s8485_s25 + $0xc0] sm:$0xff] }
 0x4cf   : > { %v2114_v63 = vpop.permute.xlu0 %2113 }
 0x4d3   : > { %v2116_v61 = vpop.permute.xlu1 %2115  ;;  %v2331_v47 = vpop.permute.xlu0 %2330 }
 0x4d4   : > { %6363 = vmatprep.subr.mxu0 %v2116_v61 }
 0x4d5   : > { %6364 = vmatpush3.msra.mxu0 %v2116_v61  ;;  %v6087_v61 = vld [vmem:[%s8485_s25 + $0xc8] sm:$0xff] }
 0x4d6   : > { %6365 = vmatprep.subr.mxu0 %v2114_v63 }
 0x4d7   : > { %6366 = vmatpush3.msra.mxu0 %v2114_v63  ;;  %v2333_v5 = vpop.permute.xlu1 %2332  ;;  %v2453_v0 = vpop.permute.xlu0 %2452 }
 0x4d8   : > { %6368 = vmatmul.mubr.msk.f32.vlgmr.msra.gmra.mxu0 %vm1225_vm12, %v6039_v4  ;;  %6373 = vmatprep.subr.mxu0 %v2093_v57  ;;  %v6061_v4 = vld [vmem:[%s8485_s25 + $0x68] sm:$0xff] }
 0x4d9   : > { %6370 = vmatprep.mubr.msk.f32.mxu0 %vm1225_vm12, %v6040_v1  ;;  %6374 = vmatpush3.msra.mxu0 %v2093_v57  ;;  %v6088_v57 = vld [vmem:[%s8485_s25 + $0xd0] sm:$0xff] }
 0x4da   : > { %6375 = vmatprep.subr.mxu0 %v2092_v10 }
 0x4db   : > { %v2455_v16 = vpop.permute.xlu1 %2454  ;;  %6376 = vmatpush3.msra.mxu0 %v2092_v10  ;;  %v2567_v54 = vpop.permute.xlu0 %2566 }
 0x4dc   : > { %6371 = vmatmul.mubr.msk.f32.gmra.mxu0 %vm1225_vm12, %v6041_v13  ;;  %6383 = vmatprep.subr.mxu0 %v2333_v5  ;;  %v6063_v13 = vld [vmem:[%s8485_s25 + $0x78] sm:$0xff] }
 0x4dd   : > { %6377 = vmatprep.mubr.msk.f32.mxu0 %vm1225_vm12, %v2094_v12  ;;  %v6104_v12 = vld [vmem:[%s8485_s25 + $0x100] sm:$0xff] }
 0x4df   : > { %v2569_v20 = vpop.permute.xlu1 %2568  ;;  %v7539_v8 = vpop.permute.xlu0 %2688 }
 0x4e0   : > { %6378 = vmatmul.mubr.msk.f32.vlgmr.msra.gmra.mxu0 %vm1225_vm12, %v2095_v17  ;;  %6403 = vmatprep.subr.mxu1 %v2569_v20  ;;  %v6077_v17 = vld [vmem:[%s8485_s25 + $0xa0] sm:$0xff] }
 0x4e1   : > { %6404 = vmatpush3.msra.mxu1 %v2569_v20  ;;  %6380 = vmatprep.mubr.msk.f32.mxu0 %vm1225_vm12, %v2096_v15  ;;  %v3318_v15 = vld [vmem:[%s8360_s19] sm:$0xff]  ;;  %v6078_v20 = vld [vmem:[%s8485_s25 + $0xa8] sm:$0xff] }
 0x4e2   : > { %6405 = vmatprep.subr.mxu1 %v2567_v54  ;;  %6384 = vmatpush3.msra.mxu0 %v2333_v5  ;;  %v6089_v5 = vld [vmem:[%s8485_s25 + $0xd8] sm:$0xff] }
 0x4e3   : > { %v2691_v58 = vpop.permute.xlu1 %2690  ;;  %6406 = vmatpush3.msra.mxu1 %v2567_v54  ;;  %6385 = vmatprep.subr.mxu0 %v2331_v47  ;;  %v2813_v33 = vpop.permute.xlu0 %2812  ;;  %v6105_v54 = vld [vmem:[%s8485_s25 + $0x108] sm:$0xff] }
 0x4e4   : > { %6381 = vmatmul.mubr.msk.f32.gmra.mxu0 %vm1225_vm12, %v2097_v26  ;;  %6408 = vmatmul.mubr.msk.f32.vlgmr.msra.gmra.mxu1 %vm1225_vm12, %v6069_v29  ;;  %v6080_v26 = vld [vmem:[%s8485_s25 + $0xb8] sm:$0xff]  ;;  %v6106_v29 = vld [vmem:[%s8485_s25 + $0x110] sm:$0xff] }
 0x4e5   : > { %6386 = vmatpush3.msra.mxu0 %v2331_v47  ;;  %6387 = vmatprep.mubr.msk.f32.mxu0 %vm1225_vm12, %v6051_v32  ;;  %v6060_v47 = vld [vmem:[%s8485_s25 + $0x60] sm:$0xff] }
 0x4e6   : > { %6410 = vmatprep.mubr.msk.f32.mxu1 %vm1225_vm12, %v6070_v24  ;;  %6393 = vmatprep.subr.mxu0 %v2455_v16  ;;  %v6095_v32 = vld [vmem:[%s8485_s25 + $0xe0] sm:$0xff]  ;;  %v6096_v24 = vld [vmem:[%s8485_s25 + $0xe8] sm:$0xff] }
 0x4e7   : > { %v2815_v43 = vpop.permute.xlu1 %2814  ;;  %v2935_v48 = vpop.permute.xlu0 %2934 }
 0x4e8   : > { %6388 = vmatmul.mubr.msk.f32.vlgmr.msra.gmra.mxu0 %vm1225_vm12, %v6052_v22  ;;  %6411 = vmatmul.mubr.msk.f32.gmra.mxu1 %vm1225_vm12, %v6071_v30  ;;  %v6098_v22 = vld [vmem:[%s8485_s25 + $0xf8] sm:$0xff] }
 0x4e9   : > { %6423 = vmatprep.subr.mxu1 %v2815_v43  ;;  %6394 = vmatpush3.msra.mxu0 %v2455_v16  ;;  %v3319_v16 = vld [vmem:[%s8360_s19 + $0x8] sm:$0xff]  ;;  %v3171_v30 = vld [vmem:[%s8359_s18 + $0x38] sm:$0xff] }
 0x4ea   : > { %6424 = vmatpush3.msra.mxu1 %v2815_v43  ;;  %6390 = vmatprep.mubr.msk.f32.mxu0 %vm1225_vm12, %v6053_v42  ;;  %v3170_v43 = vld [vmem:[%s8359_s18 + $0x30] sm:$0xff]  ;;  %v3169_v42 = vld [vmem:[%s8359_s18 + $0x28] sm:$0xff] }
 0x4eb   : > { %6395 = vmatprep.subr.mxu0 %v2453_v0  ;;  %6425 = vmatprep.subr.mxu1 %v2813_v33  ;;  %v2937_v63 = vpop.permute.xlu1 %2936  ;;  %v3058_v10 = vpop.permute.xlu0 %3057 }
 0x4ec   : > { %6391 = vmatmul.mubr.msk.f32.gmra.mxu0 %vm1225_vm12, %v6054_v38  ;;  %6426 = vmatpush3.msra.mxu1 %v2813_v33  ;;  %v6097_v33 = vld [vmem:[%s8485_s25 + $0xf0] sm:$0xff]  ;;  %v3168_v38 = vld [vmem:[%s8359_s18 + $0x20] sm:$0xff] }
 0x4ed   : > { %6396 = vmatpush3.msra.mxu0 %v2453_v0  ;;  %6427 = vmatprep.mubr.msk.f32.mxu1 %vm1225_vm12, %v6086_v62  ;;  %v6062_v0 = vld [vmem:[%s8485_s25 + $0x70] sm:$0xff] }
 0x4ee   : > { %6428 = vmatmul.mubr.msk.f32.vlgmr.msra.gmra.mxu1 %vm1225_vm12, %v6087_v61  ;;  %6397 = vmatprep.mubr.msk.f32.mxu0 %vm1225_vm12, %v6060_v47  ;;  %v3166_v62 = vld [vmem:[%s8359_s18 + $0x10] sm:$0xff]  ;;  %v3164_v61 = vld [vmem:[%s8359_s18] sm:$0xff] }
 0x4ef   : > { %v3060_v1 = vpop.permute.xlu1 %3059  ;;  %6430 = vmatprep.mubr.msk.f32.mxu1 %vm1225_vm12, %v6088_v57  ;;  %6413 = vmatprep.subr.mxu0 %v2691_v58 }
 0x4f0   : > { %6398 = vmatmul.mubr.msk.f32.vlgmr.msra.gmra.mxu0 %vm1225_vm12, %v6061_v4  ;;  %6443 = vmatprep.subr.mxu1 %v3060_v1 }
 0x4f1   : > { %6444 = vmatpush3.msra.mxu1 %v3060_v1  ;;  %6414 = vmatpush3.msra.mxu0 %v2691_v58  ;;  %v6107_v58 = vld [vmem:[%s8485_s25 + $0x118] sm:$0xff] }
 0x4f2   : > { %6431 = vmatmul.mubr.msk.f32.gmra.mxu1 %vm1225_vm12, %v6089_v5  ;;  %6445 = vmatprep.subr.mxu1 %v3058_v10 }
 0x4f3   : > { %6400 = vmatprep.mubr.msk.f32.mxu0 %vm1225_vm12, %v6062_v0  ;;  %6415 = vmatprep.subr.mxu0 %v7539_v8 }
 0x4f4   : > { %6446 = vmatpush3.msra.mxu1 %v3058_v10  ;;  %6401 = vmatmul.mubr.msk.f32.gmra.mxu0 %vm1225_vm12, %v6063_v13 }
 0x4f5   : > { %6416 = vmatpush3.msra.mxu0 %v7539_v8  ;;  %6447 = vmatprep.mubr.msk.f32.mxu1 %vm1225_vm12, %v6104_v12  ;;  %v6079_v8 = vld [vmem:[%s8485_s25 + $0xb0] sm:$0xff] }
 0x4f6   : > { %6475 = vmatprep.subr.mxu1 %v3319_v16  ;;  %6448 = vmatmul.mubr.msk.f32.vlgmr.msra.gmra.mxu1 %vm1225_vm12, %v6105_v54 }
 0x4f7   : > { %6476 = vmatpush3.msra.mxu1 %v3319_v16  ;;  %6417 = vmatprep.mubr.msk.f32.mxu0 %vm1225_vm12, %v6077_v17 }
 0x4f8   : > { %6477 = vmatprep.subr.mxu1 %v3318_v15  ;;  %6418 = vmatmul.mubr.msk.f32.vlgmr.msra.gmra.mxu0 %vm1225_vm12, %v6078_v20 }
 0x4f9   : > { %6478 = vmatpush3.msra.mxu1 %v3318_v15  ;;  %6433 = vmatprep.subr.mxu0 %v2937_v63 }
 0x4fa   : > { %6485 = vmatprep.subr.mxu1 %v7391_v53  ;;  %6434 = vmatpush3.msra.mxu0 %v2937_v63  ;;  %v3165_v63 = vld [vmem:[%s8359_s18 + $0x8] sm:$0xff] }
 0x4fb   : > { %6420 = vmatprep.mubr.msk.f32.mxu0 %vm1225_vm12, %v6079_v8  ;;  %6435 = vmatprep.subr.mxu0 %v2935_v48 }
 0x4fc   : > { %6421 = vmatmul.mubr.msk.f32.gmra.mxu0 %vm1225_vm12, %v6080_v26  ;;  %6450 = vmatprep.mubr.msk.f32.mxu1 %vm1225_vm12, %v6106_v29 }
 0x4fd   : > { %6436 = vmatpush3.msra.mxu0 %v2935_v48  ;;  %6437 = vmatprep.mubr.msk.f32.mxu0 %vm1225_vm12, %v6095_v32  ;;  %v3167_v48 = vld [vmem:[%s8359_s18 + $0x18] sm:$0xff] }
 0x4fe   : > { %6451 = vmatmul.mubr.msk.f32.gmra.mxu1 %vm1225_vm12, %v6107_v58  ;;  %6453 = vmatprep.subr.mxu0 %v3171_v30 }
 0x500   : > { %6438 = vmatmul.mubr.msk.f32.vlgmr.msra.gmra.mxu0 %vm1225_vm12, %v6096_v24 }
 0x501   : > { %6440 = vmatprep.mubr.msk.f32.mxu0 %vm1225_vm12, %v6097_v33  ;;  %6454 = vmatpush3.msra.mxu0 %v3171_v30 }
 0x502   : > { %6455 = vmatprep.subr.mxu0 %v3170_v43 }
 0x503   : > { %6456 = vmatpush3.msra.mxu0 %v3170_v43 }
 0x504   : > { %6441 = vmatmul.mubr.msk.f32.gmra.mxu0 %vm1225_vm12, %v6098_v22  ;;  %6457 = vmatprep.subr.mxu0 %v3169_v42 }
 0x505   : > { %6458 = vmatpush3.msra.mxu0 %v3169_v42 }
 0x506   : > { %6459 = vmatprep.subr.mxu0 %v3168_v38 }
 0x507   : > { %6460 = vmatpush3.msra.mxu0 %v3168_v38 }
 0x508   : > { %6461 = vmatprep.subr.mxu0 %v3167_v48 }
 0x509   : > { %6462 = vmatpush3.msra.mxu0 %v3167_v48 }
 0x50a   : > { %6463 = vmatprep.subr.mxu0 %v3166_v62 }
 0x50b   : > { %6464 = vmatpush3.msra.mxu0 %v3166_v62 }
 0x50c   : > { %6465 = vmatprep.subr.mxu0 %v3165_v63 }
 0x50d   : > { %6466 = vmatpush3.msra.mxu0 %v3165_v63 }
 0x50e   : > { %6467 = vmatprep.subr.mxu0 %v3164_v61 }
 0x50f   : > { %6468 = vmatpush3.msra.mxu0 %v3164_v61 }
 0x598   : > { %v6369_v47 = vpop.f32.mrf.mxu0 }
 0x59a   : > { %v2197_v57 = vpop.f32.mrf.mxu0 }
 0x59c   : > { %v6372_v4 = vpop.f32.mrf.mxu0 }
 0x59e   : > { %v2207_v1 = vpop.f32.mrf.mxu0 }
 0x5a0   : > { %v6379_v10 = vpop.f32.mrf.mxu0 }
 0x5a1   : > { %v2300_v24 = vadd.f32 %v6379_v10, %v6369_v47 }
 0x5a2   : > { %v2294_v5 = vpop.f32.mrf.mxu0 }
 0x5a3   : > { %v2295_v22 = vadd.f32 %v2294_v5, %v2197_v57 }
 0x5a4   : > { %v6382_v0 = vpop.f32.mrf.mxu0  ;;  %v6409_v13 = vpop.f32.mrf.mxu1 }
 0x5a5   : > { %v2310_v48 = vadd.f32 %v6382_v0, %v6372_v4 }
 0x5a6   : > { %v2304_v12 = vpop.f32.mrf.mxu0  ;;  %v2650_v16 = vpop.f32.mrf.mxu1 }
 0x5a7   : > { %v2305_v61 = vadd.f32 %v2304_v12, %v2207_v1 }
 0x5a8   : > { %v6389_v54 = vpop.f32.mrf.mxu0  ;;  %v6412_v17 = vpop.f32.mrf.mxu1 }
 0x5a9   : > { %v2434_v30 = vadd.f32 %v6389_v54, %v2300_v24 }
 0x5aa   : > { %v2414_v15 = vpop.f32.mrf.mxu0  ;;  %v2660_v20 = vpop.f32.mrf.mxu1 }
 0x5ab   : > { %v2433_v38 = vadd.f32 %v2414_v15, %v2295_v22 }
 0x5ac   : > { %v6392_v8 = vpop.f32.mrf.mxu0 }
 0x5ad   : > { %v2436_v3 = vadd.f32 %v6392_v8, %v2310_v48 }
 0x5ae   : > { %v2424_v26 = vpop.f32.mrf.mxu0  ;;  %v6429_v29 = vpop.f32.mrf.mxu1 }
 0x5af   : > { %v2435_v56 = vadd.f32 %v2424_v26, %v2305_v61 }
 0x5b0   : > { %v6399_v32 = vpop.f32.mrf.mxu0  ;;  %v2896_v58 = vpop.f32.mrf.mxu1 }
 0x5b1   : > { %v2556_v62 = vadd.f32 %v6399_v32, %v2434_v30 }
 0x5b2   : > { %v2536_v33 = vpop.f32.mrf.mxu0  ;;  %v6432_v42 = vpop.f32.mrf.mxu1 }
 0x5b3   : > { %v2555_v9 = vadd.f32 %v2536_v33, %v2433_v38  ;;  %v2670_v55 = vadd.f32 %v6409_v13, %v2556_v62 }
 0x5b4   : > { %v6402_v43 = vpop.f32.mrf.mxu0  ;;  %v2906_v52 = vpop.f32.mrf.mxu1 }
 0x5b5   : > { %v2558_v45 = vadd.f32 %v6402_v43, %v2436_v3  ;;  %v2669_v36 = vadd.f32 %v2650_v16, %v2555_v9 }
 0x5b6   : > { %v2546_v63 = vpop.f32.mrf.mxu0  ;;  %v6449_v5 = vpop.f32.mrf.mxu1 }
 0x5b7   : > { %v2557_v47 = vadd.f32 %v2546_v63, %v2435_v56  ;;  %v2672_v24 = vadd.f32 %v6412_v17, %v2558_v45 }
 0x5b8   : > { %v6419_v51 = vpop.f32.mrf.mxu0  ;;  %v3141_v12 = vpop.f32.mrf.mxu1 }
 0x5b9   : > { %v2792_v10 = vadd.f32 %v6419_v51, %v2670_v55  ;;  %v2671_v4 = vadd.f32 %v2660_v20, %v2557_v47 }
 0x5ba   : > { %v2772_v44 = vpop.f32.mrf.mxu0 }
 0x5bb   : > { %v2791_v54 = vadd.f32 %v2772_v44, %v2669_v36  ;;  %v2916_v0 = vadd.f32 %v6429_v29, %v2792_v10  ;;  %v3184_v29 = vpop.permute.xlu0 %3183 }
 0x5bc   : > { %v6422_v57 = vpop.f32.mrf.mxu0 }
 0x5bd   : > { %v2794_v32 = vadd.f32 %v6422_v57, %v2672_v24  ;;  %v2915_v8 = vadd.f32 %v2896_v58, %v2791_v54  ;;  %v3179_v58 = vpop.permute.xlu1 %3178 }
 0x5be   : > { %v2782_v15 = vpop.f32.mrf.mxu0  ;;  %v6452_v9 = vpop.f32.mrf.mxu1 }
 0x5bf   : > { %v2793_v33 = vadd.f32 %v2782_v15, %v2671_v4  ;;  %v2918_v3 = vadd.f32 %v6432_v42, %v2794_v32  ;;  %v3194_v62 = vpop.permute.xlu0 %3193 }
 0x5c0   : > { %v6439_v1 = vpop.f32.mrf.mxu0  ;;  %v3151_v16 = vpop.f32.mrf.mxu1 }
 0x5c1   : > { %v3038_v22 = vadd.f32 %v6439_v1, %v2916_v0  ;;  %v2917_v51 = vadd.f32 %v2906_v52, %v2793_v33  ;;  %v3189_v57 = vpop.permute.xlu1 %3188 }
 0x5c2   : > { %v3018_v26 = vpop.f32.mrf.mxu0 }
 0x5c3   : > { %v3037_v13 = vadd.f32 %v3018_v26, %v2915_v8  ;;  %v3161_v56 = vadd.f32 %v6449_v5, %v3038_v22 }
 0x5c4   : > { %v6442_v30 = vpop.f32.mrf.mxu0 }
 0x5c5   : > { %v3160_v55 = vadd.f32 %v3141_v12, %v3037_v13  ;;  %v3040_v36 = vadd.f32 %v6442_v30, %v2918_v3 }
 0x5c6   : > { %v3028_v44 = vpop.f32.mrf.mxu0 }
 0x5c7   : > { %v3039_v45 = vadd.f32 %v3028_v44, %v2917_v51  ;;  %6469 = vmatprep.mubr.msk.f32.mxu0 %vm3196_vm3, %v3160_v55  ;;  %v3163_v20 = vadd.f32 %v6452_v9, %v3040_v36 }
 0x5c8   : > { %6470 = vmatmul.mubr.msk.f32.vlgmr.msra.gmra.mxu0 %vm3196_vm3, %v3161_v56 }
 0x5c9   : > { %v3162_v17 = vadd.f32 %v3151_v16, %v3039_v45  ;;  %v3417_v16 = vld [vmem:[%s8492_s17] sm:$0xff] }
 0x5cb   : > { %6472 = vmatprep.mubr.msk.f32.mxu0 %vm3196_vm3, %v3162_v17 }
 0x5cc   : > { %6473 = vmatmul.mubr.msk.f32.gmra.mxu0 %vm3196_vm3, %v3163_v20 }
 0x688   : > { %v6471_v43 = vpop.f32.mrf.mxu0 }
 0x689   : > { %v3281_v52 = vadd.f32 %v6471_v43, %v3184_v29 }
 0x68a   : > { %v3275_v42 = vpop.f32.mrf.mxu0 }
 0x68b   : > { %v3295_v38 = vsub.f32 0.0, %v3281_v52  ;;  %v3276_v48 = vadd.f32 %v3275_v42, %v3179_v58  ;;  %v3429_v58 = vpop.permute.xlu1 %3428  ;;  %v3424_v42 = vpop.permute.xlu0 %3423 }
 0x68c   : > { %v6474_v63 = vpop.f32.mrf.mxu0 }
 0x68d   : > { %v3300_v61 = vmul.f32 1.442695, %v3295_v38  ;;  %v3294_v47 = vsub.f32 0.0, %v3276_v48  ;;  %v3291_v10 = vadd.f32 %v6474_v63, %v3194_v62 }
 0x68e   : > { %v3285_v5 = vpop.f32.mrf.mxu0 }
 0x68f   : > { %6679 = vpow2.f32 %v3300_v61  ;;  %v3298_v54 = vmul.f32 1.442695, %v3294_v47  ;;  %v3297_v24 = vsub.f32 0.0, %v3291_v10  ;;  %v3286_v15 = vadd.f32 %v3285_v5, %v3189_v57 }
 0x691   : > { %6681 = vpow2.f32 %v3298_v54  ;;  %v3304_v4 = vmul.f32 1.442695, %v3297_v24  ;;  %v3296_v0 = vsub.f32 0.0, %v3286_v15 }
 0x693   : > { %6683 = vpow2.f32 %v3304_v4  ;;  %v3302_v32 = vmul.f32 1.442695, %v3296_v0 }
 0x695   : > { %6685 = vpow2.f32 %v3302_v32  ;;  %v3525_v32 = vld [vmem:[%s8350_s9] sm:$0xff] }
 0x696   : > { %6504 = vmatprep.mubr.msk.f32.mxu0 %vm1225_vm12, %v3525_v32  ;;  %v6141_v32 = vld [vmem:[%s8354_s13 + $0x28] sm:$0xff] }
 0x69c   : > { %v6680_v1 = vpop.eup %6679 }
 0x69d   : > { %v3307_v12 = vadd.f32 1.0, %v6680_v1  ;;  %v3526_v1 = vld [vmem:[%s8350_s9 + $0x8] sm:$0xff] }
 0x69e   : > { %v6682_v8 = vpop.eup %6681 }
 0x69f   : > { %v3306_v33 = vadd.f32 1.0, %v6682_v8  ;;  %6687 = vrcp.f32 %v3307_v12  ;;  %v3527_v12 = vld [vmem:[%s8350_s9 + $0x10] sm:$0xff]  ;;  %v3528_v8 = vld [vmem:[%s8350_s9 + $0x18] sm:$0xff] }
 0x6a0   : > { %v6684_v22 = vpop.eup %6683 }
 0x6a1   : > { %6689 = vrcp.f32 %v3306_v33  ;;  %v3309_v26 = vadd.f32 1.0, %v6684_v22  ;;  %v3529_v22 = vld [vmem:[%s8350_s9 + $0x20] sm:$0xff] }
 0x6a2   : > { %v6686_v13 = vpop.eup %6685 }
 0x6a3   : > { %v3308_v3 = vadd.f32 1.0, %v6686_v13  ;;  %6691 = vrcp.f32 %v3309_v26  ;;  %v3687_v26 = vld [vmem:[%s8352_s11] sm:$0xff]  ;;  %v3688_v13 = vld [vmem:[%s8352_s11 + $0x8] sm:$0xff] }
 0x6a5   : > { %6693 = vrcp.f32 %v3308_v3 }
 0x6ac   : > { %v6688_v30 = vpop.eup %6687 }
 0x6ad   : > { %v3315_v55 = vmul.f32 %v6688_v30, %v3281_v52  ;;  %v3530_v30 = vld [vmem:[%s8350_s9 + $0x28] sm:$0x1f] }
 0x6ae   : > { %v6690_v9 = vpop.eup %6689 }
 0x6af   : > { %v3314_v51 = vmul.f32 %v6690_v9, %v3276_v48  ;;  %v3689_v9 = vld [vmem:[%s8352_s11 + $0x10] sm:$0xff] }
 0x6b0   : > { %v6692_v56 = vpop.eup %6691 }
 0x6b1   : > { %6479 = vmatprep.mubr.msk.f32.mxu1 %vm1225_vm12, %v3314_v51  ;;  %v3317_v45 = vmul.f32 %v6692_v56, %v3291_v10  ;;  %v3691_v56 = vld [vmem:[%s8352_s11 + $0x20] sm:$0xff] }
 0x6b2   : > { %v6694_v36 = vpop.eup %6693  ;;  %6480 = vmatmul.mubr.msk.f32.vlgmr.msra.gmra.mxu1 %vm1225_vm12, %v3315_v55 }
 0x6b3   : > { %v3316_v44 = vmul.f32 %v6694_v36, %v3286_v15  ;;  %6486 = vmatpush3.msra.mxu1 %v7391_v53 }
 0x6b4   : > { %6487 = vmatprep.subr.mxu1 %v7382_v39 }
 0x6b5   : > { %6488 = vmatpush3.msra.mxu1 %v7382_v39  ;;  %6482 = vmatprep.mubr.msk.f32.mxu1 %vm1225_vm12, %v3316_v44  ;;  %v3418_v39 = vld [vmem:[%s8492_s17 + $0x8] sm:$0xff] }
 0x6b6   : > { %6483 = vmatmul.mubr.msk.f32.gmra.mxu1 %vm1225_vm12, %v3317_v45 }
 0x6b7   : > { %6497 = vmatprep.mubr.msk.f32.mxu1 %vm3431_vm11, %v3417_v16 }
 0x772   : > { %v6481_v17 = vpop.f32.mrf.mxu1 }
 0x774   : > { %v3398_v20 = vpop.f32.mrf.mxu1 }
 0x776   : > { %v6484_v29 = vpop.f32.mrf.mxu1 }
 0x777   : > { %6489 = vmatprep.subr.mxu1 %v6484_v29 }
 0x778   : > { %v3408_v53 = vpop.f32.mrf.mxu1  ;;  %6490 = vmatpush3.msra.mxu1 %v6484_v29 }
 0x779   : > { %6491 = vmatprep.subr.mxu1 %v3408_v53 }
 0x77a   : > { %6492 = vmatpush3.msra.mxu1 %v3408_v53 }
 0x77b   : > { %6493 = vmatprep.subr.mxu1 %v6481_v17 }
 0x77c   : > { %6494 = vmatpush3.msra.mxu1 %v6481_v17  ;;  %v6144_v17 = vld [vmem:[%s8354_s13 + $0x30] sm:$0xff] }
 0x77d   : > { %6495 = vmatprep.subr.mxu1 %v3398_v20 }
 0x77e   : > { %6496 = vmatpush3.msra.mxu1 %v3398_v20 }
 0x77f   : > { %6498 = vmatmul.mubr.msk.f32.vlgmr.msra.gmra.mxu1 %vm3431_vm11, %v3418_v39  ;;  %6513 = vmatprep.subr.mxu1 %v3317_v45  ;;  %vm8522_vm11 = vmmov %vm8521_vm13 }
 0x780   : > { %6514 = vmatpush3.msra.mxu1 %v3317_v45  ;;  %6521 = vmatprep.mubr.msk.f32.mxu1 %vm1577_vm14, %v3687_v26  ;;  %v6152_v26 = vld [vmem:[%s8354_s13 + $0x50] sm:$0xff] }
 0x781   : > { %6515 = vmatprep.subr.mxu1 %v3316_v44 }
 0x782   : > { %6516 = vmatpush3.msra.mxu1 %v3316_v44  ;;  %v3692_v44 = vld [vmem:[%s8352_s11 + $0x28] sm:$0x1f] }
 0x783   : > { %6517 = vmatprep.subr.mxu1 %v3315_v55 }
 0x784   : > { %6518 = vmatpush3.msra.mxu1 %v3315_v55  ;;  %v3690_v55 = vld [vmem:[%s8352_s11 + $0x18] sm:$0xff] }
 0x785   : > { %6519 = vmatprep.subr.mxu1 %v3314_v51 }
 0x786   : > { %6520 = vmatpush3.msra.mxu1 %v3314_v51  ;;  %v6134_v51 = vld [vmem:[%s8354_s13 + $0x10] sm:$0xff] }
 0x787   : > { %6522 = vmatmul.mubr.msk.f32.vlgmr.msra.gmra.mxu1 %vm1577_vm14, %v3688_v13 }
 0x788   : > { %6524 = vmatprep.mubr.msk.f32.mxu1 %vm1577_vm14, %v3689_v9  ;;  %v6156_v9 = vld [vmem:[%s8354_s13 + $0x60] sm:$0xff] }
 0x78b   : > { %6525 = vmatmul.mubr.msk.f32.gmra.mxu1 %vm1577_vm14, %v3690_v55 }
 0x78c   : > { %6527 = vmatprep.mubr.msk.f32.mxu1 %vm1577_vm14, %v3691_v56  ;;  %v6160_v56 = vld [vmem:[%s8354_s13 + $0x70] sm:$0xff] }
 0x78f   : > { %6528 = vmatmul.mubr.msk.f32.gmra.mxu1 %vm1577_vm14, %v3692_v44  ;;  %v6161_v44 = vld [vmem:[%s8354_s13 + $0x78] sm:$0xff] }
 0x790   : > { %6555 = vmatprep.mubr.msk.f32.mxu1 %vm1225_vm12, %v6144_v17  ;;  %v6165_v17 = vld [vmem:[%s8354_s13 + $0x88] sm:$0xff] }
 0x83f   : > { %v6499_v43 = vpop.f32.mrf.mxu1 }
 0x840   : > { %v3510_v52 = vadd.f32 %v6499_v43, %v3429_v58 }
 0x841   : > { %v3504_v38 = vpop.f32.mrf.mxu1 }
 0x842   : > { %v3514_v48 = vsub.f32 0.0, %v3510_v52  ;;  %v3505_v62 = vadd.f32 %v3504_v38, %v3424_v42 }
 0x844   : > { %v3517_v63 = vmul.f32 1.442695, %v3514_v48  ;;  %v3513_v61 = vsub.f32 0.0, %v3505_v62  ;;  %v4715_v48 = vld [vmem:[%s8355_s14 + $0x8] sm:$0xff] }
 0x846   : > { %6695 = vpow2.f32 %v3517_v63  ;;  %v3515_v47 = vmul.f32 1.442695, %v3513_v61 }
 0x848   : > { %6697 = vpow2.f32 %v3515_v47 }
 0x853   : > { %v6696_v10 = vpop.eup %6695 }
 0x854   : > { %v3520_v57 = vadd.f32 1.0, %v6696_v10 }
 0x855   : > { %v6698_v5 = vpop.eup %6697 }
 0x856   : > { %6699 = vrcp.f32 %v3520_v57  ;;  %v3519_v54 = vadd.f32 1.0, %v6698_v5  ;;  %v3867_v57 = vld [vmem:[%s8354_s13] sm:$0xff] }
 0x858   : > { %6701 = vrcp.f32 %v3519_v54 }
 0x863   : > { %v6700_v24 = vpop.eup %6699 }
 0x864   : > { %v3524_v15 = vmul.f32 %v6700_v24, %v3510_v52  ;;  %v3868_v24 = vld [vmem:[%s8354_s13 + $0x8] sm:$0xff] }
 0x865   : > { %v6702_v4 = vpop.eup %6701 }
 0x866   : > { %v3523_v0 = vmul.f32 %v6702_v4, %v3505_v62  ;;  %3855 = vrot.lane.b32.xlu1 %v3524_v15, %s8493_s23  ;;  %6500 = vmatprep.subr.mxu0 %v3524_v15  ;;  %v6140_v4 = vld [vmem:[%s8354_s13 + $0x20] sm:$0xff] }
 0x867   : > { %6501 = vmatpush3.msra.mxu0 %v3524_v15 }
 0x868   : > { %3853 = vrot.lane.b32.xlu0 %v3523_v0, %s8493_s23  ;;  %6502 = vmatprep.subr.mxu0 %v3523_v0  ;;  %s8494_s23 = smov 119  }
 0x869   : > { %6503 = vmatpush3.msra.mxu0 %v3523_v0 }
 0x86a   : > { %6505 = vmatmul.mubr.msk.f32.vlgmr.msra.gmra.mxu0 %vm1225_vm12, %v3526_v1  ;;  %v6145_v1 = vld [vmem:[%s8354_s13 + $0x38] sm:$0xff] }
 0x86b   : > { %6507 = vmatprep.mubr.msk.f32.mxu0 %vm1225_vm12, %v3527_v12 }
 0x86e   : > { %6508 = vmatmul.mubr.msk.f32.gmra.mxu0 %vm1225_vm12, %v3528_v8 }
 0x86f   : > { %6510 = vmatprep.mubr.msk.f32.mxu0 %vm1225_vm12, %v3529_v22  ;;  %v6149_v22 = vld [vmem:[%s8354_s13 + $0x48] sm:$0xff] }
 0x872   : > { %6511 = vmatmul.mubr.msk.f32.gmra.mxu0 %vm1225_vm12, %v3530_v30 }
 0x873   : > { %6534 = vmatprep.mubr.msk.f32.mxu0 %vm1225_vm12, %v6134_v51  ;;  %v6157_v51 = vld [vmem:[%s8354_s13 + $0x68] sm:$0xff] }
 0x8d8   : > { %v3856_v33 = vpop.permute.xlu1 %3855 }
 0x8d9   : > { %3860 = vst.msk [vmem:[#allocation2 + $0x18] sm:$0xff] %vm2077_vm4, %v3856_v33  ;;  %v6148_v33 = vld [vmem:[%s8354_s13 + $0x40] sm:$0xff] }
 0x8da   : > { %3862 = vst.msk [vmem:[#allocation2 + $0x18] sm:$0xff] %vm2080_vm2, %v8478_v46  ;;  %v3854_v3 = vpop.permute.xlu0 %3853 }
 0x8db   : > { %3859 = vst.msk [vmem:[#allocation2] sm:$0xff] %vm2077_vm4, %v3854_v3  ;;  %v6153_v3 = vld [vmem:[%s8354_s13 + $0x58] sm:$0xff] }
 0x8dc   : > { %3861 = vst.msk [vmem:[#allocation2] sm:$0xff] %vm2080_vm2, %v8478_v46  ;;  %vm8514_vm2 = vcmask 900096  }
 0x8dd   : > { %vm8516_vm10 = vmmov %vm8514_vm2 }
 0x8de   : > { %vm8519_vm1 = vmmov %vm8514_vm2 }
 0x8df   : > { %vm8520_vm7 = vmmov %vm8519_vm1 }
 0x8e1   : > { %v3864_v36 = vld [vmem:[#allocation2 + $0x18] sm:$0xff] }
 0x8e2   : > { %4243 = vrot.lane.b32.xlu1 %v3864_v36, %s8494_s23  ;;  %4840 = vst.msk [vmem:[#allocation2 + $0x18] sm:$0xff] %vm845_vm5, %v8478_v46  ;;  %v3870_v16 = vmul.f32 %v3864_v36, %v7426_v60  ;;  %v4045_v29 = vmul.f32 %v3864_v36, %v7430_v2  ;;  %v4141_v39 = vmul.f32 %v3864_v36, %v7439_v35 }
 0x8e3   : > { %v3863_v45 = vld [vmem:[#allocation2] sm:$0xff]  ;;  %v3866_v61 = vmul.f32 %v7512_v49, %v3864_v36 }
 0x8e4   : > { %4241 = vrot.lane.b32.xlu0 %v3863_v45, %s8494_s23  ;;  %4839 = vst.msk [vmem:[#allocation2] sm:$0xff] %vm845_vm5, %v8478_v46  ;;  %v3869_v20 = vmul.f32 %v3863_v45, %v7426_v60  ;;  %v4044_v53 = vmul.f32 %v3863_v45, %v7430_v2  ;;  %v4140_v58 = vmul.f32 %v3863_v45, %v7439_v35  ;;  %s6190_s23 = sshll.u32 %s8542_s30, 3 }
 0x8e5   : > { %v4331_v60 = vmul.f32 %v3864_v36, %v7455_v21  ;;  %v4330_v43 = vmul.f32 %v3863_v45, %v7455_v21  ;;  %v4427_v2 = vmul.f32 %v3864_v36, %v7463_v18  ;;  %v4426_v52 = vmul.f32 %v3863_v45, %v7463_v18  ;;  %v4714_v18 = vld [vmem:[%s8355_s14] sm:$0xff] }
 0x8e6   : > { %3878 = vrot.lane.b32.xlu1 %v3870_v16, %s8486_s5  ;;  %v4523_v35 = vmul.f32 %v3864_v36, %v7470_v34  ;;  %v4522_v42 = vmul.f32 %v3863_v45, %v7470_v34  ;;  %v4619_v21 = vmul.f32 %v3864_v36, %v7477_v59  ;;  %v4618_v38 = vmul.f32 %v3863_v45, %v7477_v59  ;;  %v6135_v59 = vld [vmem:[%s8354_s13 + $0x18] sm:$0xff] }
 0x8e7   : > { %v3865_v10 = vmul.f32 %v7512_v49, %v3863_v45  ;;  %v6164_v45 = vld [vmem:[%s8354_s13 + $0x80] sm:$0xff] }
 0x8e8   : > { %3876 = vrot.lane.b32.xlu0 %v3869_v20, %s8486_s5  ;;  %v4755_v20 = vld [vmem:[%s8361_s20 + $0x78] sm:$0xff] }
 0x8ea   : > { %4053 = vrot.lane.b32.xlu1 %v4045_v29, %s8487_s24  ;;  %v4754_v29 = vld [vmem:[%s8361_s20 + $0x70] sm:$0xff] }
 0x8ec   : > { %4051 = vrot.lane.b32.xlu0 %v4044_v53, %s8487_s24  ;;  %v4753_v53 = vld [vmem:[%s8361_s20 + $0x68] sm:$0xff] }
 0x8ee   : > { %4149 = vrot.lane.b32.xlu1 %v4141_v39, %s8495_s2  ;;  %v4752_v39 = vld [vmem:[%s8361_s20 + $0x60] sm:$0xff] }
 0x8f0   : > { %4147 = vrot.lane.b32.xlu0 %v4140_v58, %s8495_s2  ;;  %v4751_v58 = vld [vmem:[%s8361_s20 + $0x58] sm:$0xff]  ;;  %s8539_s2 = sld [smem:[#allocation24_spill]] }
 0x8f2   : > { %4339 = vrot.lane.b32.xlu1 %v4331_v60, %s8496_s3  ;;  %v4750_v60 = vld [vmem:[%s8361_s20 + $0x50] sm:$0xff] }
 0x8f4   : > { %4337 = vrot.lane.b32.xlu0 %v4330_v43, %s8496_s3  ;;  %v4749_v43 = vld [vmem:[%s8361_s20 + $0x48] sm:$0xff] }
 0x8f6   : > { %4435 = vrot.lane.b32.xlu1 %v4427_v2, %s8488_s29  ;;  %v4748_v2 = vld [vmem:[%s8361_s20 + $0x40] sm:$0xff]  ;;  %s735_s1 = scalar_lea.vmem %s8539_s2, %s6190_s23 }
 0x8f8   : > { %4433 = vrot.lane.b32.xlu0 %v4426_v52, %s8488_s29  ;;  %v4747_v52 = vld [vmem:[%s8361_s20 + $0x38] sm:$0xff] }
 0x8fa   : > { %4531 = vrot.lane.b32.xlu1 %v4523_v35, %s8489_s6  ;;  %v4746_v35 = vld [vmem:[%s8361_s20 + $0x30] sm:$0xff] }
 0x8fc   : > { %4529 = vrot.lane.b32.xlu0 %v4522_v42, %s8489_s6  ;;  %v4745_v42 = vld [vmem:[%s8361_s20 + $0x28] sm:$0xff] }
 0x8fe   : > { %4627 = vrot.lane.b32.xlu1 %v4619_v21, %s8490_s0  ;;  %v4744_v21 = vld [vmem:[%s8361_s20 + $0x20] sm:$0xff] }
 0x900   : > { %4625 = vrot.lane.b32.xlu0 %v4618_v38, %s8490_s0  ;;  %v4743_v38 = vld [vmem:[%s8361_s20 + $0x18] sm:$0xff] }
 0x902   : > { %4718 = vperm.xlu1 %6662, %v4714_v18   ;;  %v4742_v18 = vld [vmem:[%s8361_s20 + $0x10] sm:$0xff] }
 0x904   : > { %4723 = vperm.xlu0 %6626, %v4715_v48   ;;  %v4741_v48 = vld [vmem:[%s8361_s20 + $0x8] sm:$0xff] }
 0x954   : > { %v4244_v34 = vpop.permute.xlu1 %4243 }
 0x956   : > { %v4242_v62 = vpop.permute.xlu0 %4241 }
 0x958   : > { %v3879_v63 = vpop.permute.xlu1 %3878 }
 0x959   : > { %6530 = vmatprep.subr.mxu0 %v3879_v63 }
 0x95a   : > { %v3877_v47 = vpop.permute.xlu0 %3876  ;;  %6531 = vmatpush3.msra.mxu0 %v3879_v63 }
 0x95b   : > { %6532 = vmatprep.subr.mxu0 %v3877_v47 }
 0x95c   : > { %v4054_v5 = vpop.permute.xlu1 %4053  ;;  %6533 = vmatpush3.msra.mxu0 %v3877_v47  ;;  %v7931_v47 = vpop.f32.mrf.mxu1 }
 0x95d   : > { %6537 = vmatprep.subr.mxu0 %v3866_v61  ;;  %6535 = vmatmul.mubr.msk.f32.vlgmr.msra.gmra.mxu0 %vm1225_vm12, %v6135_v59 }
 0x95e   : > { %v4052_v54 = vpop.permute.xlu0 %4051  ;;  %6538 = vmatpush3.msra.mxu0 %v3866_v61  ;;  %6541 = vmatprep.mubr.msk.f32.mxu0 %vm1225_vm12, %v3867_v57 }
 0x95f   : > { %6539 = vmatprep.subr.mxu0 %v3865_v10 }
 0x960   : > { %v4150_v15 = vpop.permute.xlu1 %4149  ;;  %6540 = vmatpush3.msra.mxu0 %v3865_v10  ;;  %v7935_v10 = vpop.f32.mrf.mxu1 }
 0x961   : > { %6544 = vmatprep.subr.mxu0 %v4054_v5  ;;  %6551 = vmatprep.subr.mxu1 %v4150_v15 }
 0x962   : > { %v4148_v49 = vpop.permute.xlu0 %4147  ;;  %6542 = vmatmul.mubr.msk.f32.vlgmr.msra.gmra.mxu0 %vm1225_vm12, %v3868_v24  ;;  %6552 = vmatpush3.msra.mxu1 %v4150_v15 }
 0x963   : > { %6545 = vmatpush3.msra.mxu0 %v4054_v5  ;;  %6553 = vmatprep.subr.mxu1 %v4148_v49  ;;  %v7939_v5 = vpop.f32.mrf.mxu1 }
 0x964   : > { %6546 = vmatprep.subr.mxu0 %v4052_v54  ;;  %6554 = vmatpush3.msra.mxu1 %v4148_v49  ;;  %v4340_v0 = vpop.permute.xlu1 %4339 }
 0x965   : > { %6547 = vmatpush3.msra.mxu0 %v4052_v54  ;;  %6548 = vmatprep.mubr.msk.f32.mxu0 %vm1225_vm12, %v6140_v4  ;;  %v7943_v24 = vpop.f32.mrf.mxu1 }
 0x966   : > { %6558 = vmatprep.subr.mxu0 %v4244_v34  ;;  %6565 = vmatprep.subr.mxu1 %v4340_v0  ;;  %v4338_v12 = vpop.permute.xlu0 %4337 }
 0x967   : > { %6549 = vmatmul.mubr.msk.f32.vlgmr.msra.gmra.mxu0 %vm1225_vm12, %v6141_v32  ;;  %6556 = vmatmul.mubr.msk.f32.vlgmr.msra.gmra.mxu1 %vm1225_vm12, %v6145_v1  ;;  %v7945_v4 = vpop.f32.mrf.mxu1 }
 0x968   : > { %6559 = vmatpush3.msra.mxu0 %v4244_v34  ;;  %6566 = vmatpush3.msra.mxu1 %v4340_v0  ;;  %v4436_v8 = vpop.permute.xlu1 %4435  ;;  %v4740_v34 = vld [vmem:[%s8361_s20] sm:$0xff] }
 0x969   : > { %6560 = vmatprep.subr.mxu0 %v4242_v62  ;;  %6567 = vmatprep.subr.mxu1 %v4338_v12  ;;  %v7947_v32 = vpop.f32.mrf.mxu1 }
 0x96a   : > { %6568 = vmatpush3.msra.mxu1 %v4338_v12  ;;  %6561 = vmatpush3.msra.mxu0 %v4242_v62  ;;  %v4434_v13 = vpop.permute.xlu0 %4433  ;;  %v7925_v62 = vpop.f32.mrf.mxu0 }
 0x96b   : > { %6562 = vmatprep.mubr.msk.f32.mxu0 %vm1225_vm12, %v6148_v33  ;;  %6572 = vmatprep.subr.mxu0 %v4436_v8 }
 0x96c   : > { %6563 = vmatmul.mubr.msk.f32.vlgmr.msra.gmra.mxu0 %vm1225_vm12, %v6149_v22  ;;  %6569 = vmatprep.mubr.msk.f32.mxu1 %vm1225_vm12, %v6152_v26  ;;  %v4532_v30 = vpop.permute.xlu1 %4531  ;;  %v7927_v63 = vpop.f32.mrf.mxu0 }
 0x96d   : > { %6573 = vmatpush3.msra.mxu0 %v4436_v8  ;;  %6570 = vmatmul.mubr.msk.f32.vlgmr.msra.gmra.mxu1 %vm1225_vm12, %v6153_v3 }
 0x96e   : > { %6574 = vmatprep.subr.mxu0 %v4434_v13  ;;  %6579 = vmatprep.subr.mxu1 %v4532_v30  ;;  %v4530_v55 = vpop.permute.xlu0 %4529  ;;  %v7929_v61 = vpop.f32.mrf.mxu0 }
 0x96f   : > { %6575 = vmatpush3.msra.mxu0 %v4434_v13  ;;  %6576 = vmatprep.mubr.msk.f32.mxu0 %vm1225_vm12, %v6156_v9 }
 0x970   : > { %6580 = vmatpush3.msra.mxu1 %v4532_v30  ;;  %6577 = vmatmul.mubr.msk.f32.vlgmr.msra.gmra.mxu0 %vm1225_vm12, %v6157_v51  ;;  %v4628_v36 = vpop.permute.xlu1 %4627  ;;  %v7933_v59 = vpop.f32.mrf.mxu0 }
 0x971   : > { %6581 = vmatprep.subr.mxu1 %v4530_v55  ;;  %6583 = vmatprep.mubr.msk.f32.mxu1 %vm1225_vm12, %v6160_v56 }
 0x972   : > { %6582 = vmatpush3.msra.mxu1 %v4530_v55  ;;  %6586 = vmatprep.subr.mxu0 %v4628_v36  ;;  %v4626_v16 = vpop.permute.xlu0 %4625  ;;  %v7937_v57 = vpop.f32.mrf.mxu0 }
 0x973   : > { %6584 = vmatmul.mubr.msk.f32.vlgmr.msra.gmra.mxu1 %vm1225_vm12, %v6161_v44  ;;  %6587 = vmatpush3.msra.mxu0 %v4628_v36 }
 0x974   : > { %6588 = vmatprep.subr.mxu0 %v4626_v16  ;;  %6590 = vmatprep.mubr.msk.f32.mxu0 %vm1225_vm12, %v6164_v45  ;;  %v7941_v54 = vpop.f32.mrf.mxu0 }
 0x975   : > { %6589 = vmatpush3.msra.mxu0 %v4626_v16  ;;  %4826 = vmatprep.mubr.f32.mxu1 %v8478_v46 }
 0x976   : > { %6591 = vmatmul.mubr.msk.f32.vlgmr.msra.gmra.mxu0 %vm1225_vm12, %v6165_v17  ;;  %4778 = vmatprep.subr.mxu1 %v4755_v20 }
 0x977   : > { %4981 = vmatprep.mubr.f32.mxu0 %v8478_v46  ;;  %4779 = vmatpush1.msra.mxu1 %v4754_v29 }
 0x978   : > { %4780 = vmatprep.subr.mxu1 %v4753_v53 }
 0x979   : > { %4781 = vmatpush1.msra.mxu1 %v4752_v39 }
 0x97a   : > { %4782 = vmatprep.subr.mxu1 %v4751_v58 }
 0x97b   : > { %4783 = vmatpush1.msra.mxu1 %v4750_v60 }
 0x97c   : > { %4784 = vmatprep.subr.mxu1 %v4749_v43 }
 0x97d   : > { %4785 = vmatpush1.msra.mxu1 %v4748_v2 }
 0x97e   : > { %4786 = vmatprep.subr.mxu1 %v4747_v52 }
 0x97f   : > { %4787 = vmatpush1.msra.mxu1 %v4746_v35 }
 0x980   : > { %4788 = vmatprep.subr.mxu1 %v4745_v42 }
 0x981   : > { %4789 = vmatpush1.msra.mxu1 %v4744_v21  ;;  %v4724_v21 = vpop.permute.xlu0 %4723 }
 0x982   : > { %4790 = vmatprep.subr.mxu1 %v4743_v38 }
 0x983   : > { %4791 = vmatpush1.msra.mxu1 %v4742_v18 }
 0x984   : > { %4792 = vmatprep.subr.mxu1 %v4741_v48 }
 0x985   : > { %4793 = vmatpush1.msra.mxu1 %v4740_v34  ;;  %v4719_v34 = vpop.permute.xlu1 %4718 }
 0xa1d   : > { %v6536_v15 = vpop.f32.mrf.mxu0 }
 0xa1f   : > { %v3954_v49 = vpop.f32.mrf.mxu0 }
 0xa22   : > { %v6543_v0 = vpop.f32.mrf.mxu0 }
 0xa23   : > { %v4041_v12 = vadd.f32 %v6543_v0, %v6536_v15 }
 0xa24   : > { %v4035_v1 = vpop.f32.mrf.mxu0 }
 0xa25   : > { %v4036_v22 = vadd.f32 %v4035_v1, %v3954_v49 }
 0xa27   : > { %v6550_v8 = vpop.f32.mrf.mxu0  ;;  %v6557_v33 = vpop.f32.mrf.mxu1 }
 0xa28   : > { %v4139_v26 = vadd.f32 %v6550_v8, %v4041_v12 }
 0xa29   : > { %v4129_v13 = vpop.f32.mrf.mxu0  ;;  %v4225_v3 = vpop.f32.mrf.mxu1 }
 0xa2a   : > { %v4138_v30 = vadd.f32 %v4129_v13, %v4036_v22  ;;  %v4235_v9 = vadd.f32 %v6557_v33, %v4139_v26 }
 0xa2c   : > { %v4234_v51 = vadd.f32 %v4225_v3, %v4138_v30  ;;  %v6564_v55 = vpop.f32.mrf.mxu0 }
 0xa2d   : > { %v4329_v56 = vadd.f32 %v6564_v55, %v4235_v9  ;;  %v6571_v36 = vpop.f32.mrf.mxu1 }
 0xa2e   : > { %v4319_v44 = vpop.f32.mrf.mxu0 }
 0xa2f   : > { %v4328_v45 = vadd.f32 %v4319_v44, %v4234_v51  ;;  %v4425_v16 = vadd.f32 %v6571_v36, %v4329_v56  ;;  %v4415_v17 = vpop.f32.mrf.mxu1 }
 0xa30   : > { %v6578_v20 = vpop.f32.mrf.mxu0 }
 0xa31   : > { %v4424_v29 = vadd.f32 %v4415_v17, %v4328_v45  ;;  %v4521_v39 = vadd.f32 %v6578_v20, %v4425_v16 }
 0xa32   : > { %v4511_v53 = vpop.f32.mrf.mxu0 }
 0xa33   : > { %v6585_v58 = vpop.f32.mrf.mxu1  ;;  %v4520_v60 = vadd.f32 %v4511_v53, %v4424_v29 }
 0xa34   : > { %v4617_v43 = vadd.f32 %v6585_v58, %v4521_v39 }
 0xa35   : > { %v4607_v2 = vpop.f32.mrf.mxu1 }
 0xa36   : > { %v6592_v52 = vpop.f32.mrf.mxu0  ;;  %v4616_v35 = vadd.f32 %v4607_v2, %v4520_v60 }
 0xa37   : > { %v4713_v42 = vadd.f32 %v6592_v52, %v4617_v43 }
 0xa38   : > { %v4703_v38 = vpop.f32.mrf.mxu0 }
 0xa39   : > { %v4727_v18 = vadd.f32 %v4724_v21, %v4713_v42  ;;  %v4712_v48 = vadd.f32 %v4703_v38, %v4616_v35 }
 0xa3b   : > { %v4729_v15 = vsub.f32 0.0, %v4727_v18  ;;  %v4726_v49 = vadd.f32 %v4719_v34, %v4712_v48 }
 0xa3d   : > { %v4732_v0 = vmul.f32 1.442695, %v4729_v15  ;;  %v4728_v1 = vsub.f32 0.0, %v4726_v49 }
 0xa3f   : > { %6703 = vpow2.f32 %v4732_v0  ;;  %v4730_v12 = vmul.f32 1.442695, %v4728_v1 }
 0xa41   : > { %6705 = vpow2.f32 %v4730_v12 }
 0xa4c   : > { %v6704_v8 = vpop.eup %6703 }
 0xa4d   : > { %v4735_v22 = vadd.f32 1.0, %v6704_v8  ;;  %v8499_v8 = vld [vmem:[#allocation4_spill] sm:$0xff] }
 0xa4e   : > { %v6706_v33 = vpop.eup %6705 }
 0xa4f   : > { %v4734_v26 = vadd.f32 1.0, %v6706_v33 }
 0xa51   : > { %6707 = vrcp.f32 %v4734_v26 }
 0xa52   : > { %6709 = vrcp.f32 %v4735_v22  ;;  %v8500_v22 = vld [vmem:[#allocation5_spill] sm:$0xff] }
 0xa5e   : > { %v6708_v13 = vpop.eup %6707 }
 0xa5f   : > { %v4738_v3 = vmul.f32 %v6708_v13, %v4726_v49  ;;  %v6710_v30 = vpop.eup %6709  ;;  %v8501_v13 = vld [vmem:[#allocation6_spill] sm:$0xff] }
 0xa60   : > { %v4739_v9 = vmul.f32 %v6710_v30, %v4727_v18  ;;  %v8502_v30 = vld [vmem:[#allocation9_spill] sm:$0xff] }
 0xa61   : > { %6168 = vmatmul.mubr.msk.f32.vlgmr.msra.gmra.mxu1 %vm3196_vm3, %v4738_v3 }
 0xa62   : > { %4832 = vmatprep.mubr.f32.mxu1 %v8478_v46 }
 0xa65   : > { %6169 = vmatmul.mubr.msk.f32.gmra.mxu1 %vm3196_vm3, %v4739_v9 }
 0xa66   : > { %5487 = vmatprep.mubr.f32.mxu1 %v8478_v46 }
 0xb21   : > { %v4828_v51 = vpop.f32.mrf.mxu1 }
 0xb22   : > { %4845 = vrot.lane.b32.xlu1 %v4828_v51, %s8482_s27  ;;  %v8503_v51 = vld [vmem:[#allocation10_spill] sm:$0xff] }
 0xb23   : > { %v4830_v55 = vpop.f32.mrf.mxu1 }
 0xb24   : > { %4847 = vrot.lane.b32.xlu0 %v4830_v55, %s8482_s27 }
 0xb25   : > { %v4834_v56 = vpop.f32.mrf.mxu1 }
 0xb26   : > { %4849 = vrot.lane.b32.xlu1 %v4834_v56, %s8482_s27  ;;  %v8505_v56 = vld [vmem:[#allocation8_spill] sm:$0xff] }
 0xb27   : > { %v4836_v36 = vpop.f32.mrf.mxu1 }
 0xb28   : > { %4851 = vrot.lane.b32.xlu0 %v4836_v36, %s8482_s27  ;;  %s8497_s27 = smov 96  }
 0xb94   : > { %v4846_v44 = vpop.permute.xlu1 %4845 }
 0xb95   : > { %4861 = vst.msk [vmem:[#allocation2] sm:$0xff] %vm857_vm6, %v4846_v44 }
 0xb96   : > { %v4848_v45 = vpop.permute.xlu0 %4847 }
 0xb97   : > { %v7959_v16 = vsel %vm845_vm5, %v4846_v44, %v4848_v45  ;;  %4863 = vst.msk [vmem:[#allocation2 + $0x10] sm:$0xff] %vm845_vm5, %v4848_v45 }
 0xb98   : > { %4867 = vst.msk [vmem:[#allocation2 + $0x10] sm:$0xff] %vm861_vm8, %v8478_v46  ;;  %v4850_v17 = vpop.permute.xlu1 %4849  ;;  %v4881_v49 = vmul.f32 %v7959_v16, %v7024_v19  ;;  %v5063_v1 = vmul.f32 %v7959_v16, %v7043_v27  ;;  %v5173_v33 = vmul.f32 %v7959_v16, %v8499_v8  ;;  %v5387_v26 = vmul.f32 %v7959_v16, %v8500_v22 }
 0xb99   : > { %4864 = vst.msk [vmem:[#allocation2 + $0x18] sm:$0xff] %vm857_vm6, %v4850_v17  ;;  %v5497_v3 = vmul.f32 %v7959_v16, %v8501_v13  ;;  %v5607_v9 = vmul.f32 %v7959_v16, %v8502_v30  ;;  %v5717_v55 = vmul.f32 %v7959_v16, %v8503_v51 }
 0xb9a   : > { %v4852_v20 = vpop.permute.xlu0 %4851 }
 0xb9b   : > { %v7966_v29 = vsel %vm845_vm5, %v4850_v17, %v4852_v20  ;;  %4866 = vst.msk [vmem:[#allocation2 + $0x28] sm:$0xff] %vm845_vm5, %v4852_v20  ;;  %vm8509_vm5 = vcmask 1031168  }
 0xb9c   : > { %4868 = vst.msk [vmem:[#allocation2 + $0x28] sm:$0xff] %vm861_vm8, %v8478_v46  ;;  %v7971_v53 = vld [vmem:[#allocation2] sm:$0xff]  ;;  %v5066_v17 = vmul.f32 %v7966_v29, %v7043_v27  ;;  %v5500_v27 = vmul.f32 %v7966_v29, %v8501_v13  ;;  %vm8510_vm6 = vmmov %vm8509_vm5 }
 0xb9d   : > { %5290 = vrot.lane.b32.xlu0 %v7971_v53, %s8489_s6  ;;  %v4880_v58 = vmul.f32 %v7003_v7, %v7971_v53  ;;  %v5062_v43 = vmul.f32 %v7001_v6, %v7971_v53  ;;  %v5172_v52 = vmul.f32 %v7013_v14, %v7971_v53  ;;  %v5386_v42 = vmul.f32 %v7039_v25, %v7971_v53  ;;  %vm8511_vm8 = vmmov %vm8509_vm5 }
 0xb9e   : > { %v5496_v38 = vmul.f32 %v7049_v28, %v7971_v53  ;;  %v5606_v48 = vmul.f32 %v7070_v37, %v7971_v53  ;;  %vm8512_vm14 = vmmov %vm8509_vm5 }
 0xb9f   : > { %v7975_v39 = vld [vmem:[#allocation2 + $0x10] sm:$0xff] }
 0xba0   : > { %5294 = vrot.lane.b32.xlu1 %v7975_v39, %s8489_s6  ;;  %v7982_v60 = vld [vmem:[#allocation2 + $0x18] sm:$0xff]  ;;  %v4882_v2 = vmul.f32 %v7011_v11, %v7975_v39  ;;  %v5064_v35 = vmul.f32 %v7035_v23, %v7975_v39  ;;  %v5174_v21 = vmul.f32 %v7055_v31, %v7975_v39  ;;  %v5388_v18 = vmul.f32 %v7076_v40, %v7975_v39 }
 0xba1   : > { %4894 = vrot.lane.b32.xlu0 %v4880_v58, %s8486_s5  ;;  %v5498_v34 = vmul.f32 %v7078_v41, %v7975_v39  ;;  %v5608_v15 = vmul.f32 %v7101_v50, %v7975_v39  ;;  %v4883_v0 = vmul.f32 %v7003_v7, %v7982_v60  ;;  %v5065_v12 = vmul.f32 %v7001_v6, %v7982_v60 }
 0xba2   : > { %v5175_v7 = vmul.f32 %v7013_v14, %v7982_v60  ;;  %v5389_v6 = vmul.f32 %v7039_v25, %v7982_v60  ;;  %v5499_v14 = vmul.f32 %v7049_v28, %v7982_v60  ;;  %v5609_v25 = vmul.f32 %v7070_v37, %v7982_v60 }
 0xba3   : > { %v5719_v28 = vmul.f32 %v8505_v56, %v7982_v60  ;;  %v4879_v36 = vld [vmem:[#allocation2 + $0x28] sm:$0xff]  ;;  %v4884_v37 = vmul.f32 %v7966_v29, %v7024_v19  ;;  %v5390_v19 = vmul.f32 %v7966_v29, %v8500_v22  ;;  %v5610_v58 = vmul.f32 %v7966_v29, %v8502_v30 }
 0xba4   : > { %5296 = vrot.lane.b32.xlu1 %v7982_v60, %s8489_s6  ;;  %v4885_v44 = vmul.f32 %v7011_v11, %v4879_v36  ;;  %v5067_v45 = vmul.f32 %v7035_v23, %v4879_v36  ;;  %v5177_v20 = vmul.f32 %v7055_v31, %v4879_v36  ;;  %v5176_v11 = vmul.f32 %v7966_v29, %v8499_v8 }
 0xba5   : > { %5076 = vrot.lane.b32.xlu0 %v5062_v43, %s8487_s24  ;;  %v5391_v23 = vmul.f32 %v7076_v40, %v4879_v36  ;;  %v5501_v31 = vmul.f32 %v7078_v41, %v4879_v36  ;;  %v5611_v43 = vmul.f32 %v7101_v50, %v4879_v36  ;;  %v5720_v40 = vmul.f32 %v7966_v29, %v8503_v51  ;;  %v3531_v50 = vld [vmem:[%s8351_s10] sm:$0xff] }
 0xba6   : > { %v5716_v41 = vmul.f32 %v8505_v56, %v7971_v53 }
 0xba8   : > { %4898 = vrot.lane.b32.xlu1 %v4882_v2, %s8486_s5  ;;  %v8506_v2 = vld [vmem:[#allocation7_spill] sm:$0xff] }
 0xba9   : > { %5186 = vrot.lane.b32.xlu0 %v5172_v52, %s8488_s29  ;;  %v5721_v52 = vmul.f32 %v8506_v2, %v4879_v36 }
 0xbac   : > { %5080 = vrot.lane.b32.xlu1 %v5064_v35, %s8487_s24  ;;  %v5718_v35 = vmul.f32 %v8506_v2, %v7975_v39  ;;  %v3532_v39 = vld [vmem:[%s8351_s10 + $0x8] sm:$0xff] }
 0xbad   : > { %5400 = vrot.lane.b32.xlu0 %v5386_v42, %s8490_s0  ;;  %v5826_v42 = vld [vmem:[%s8357_s16] sm:$0xf] }
 0xbb0   : > { %5190 = vrot.lane.b32.xlu1 %v5174_v21, %s8488_s29  ;;  %v3533_v21 = vld [vmem:[%s8351_s10 + $0x10] sm:$0xff] }
 0xbb1   : > { %5510 = vrot.lane.b32.xlu0 %v5496_v38, %s8497_s27  ;;  %v3535_v38 = vld [vmem:[%s8351_s10 + $0x20] sm:$0xff] }
 0xbb4   : > { %5404 = vrot.lane.b32.xlu1 %v5388_v18, %s8490_s0  ;;  %v3534_v18 = vld [vmem:[%s8351_s10 + $0x18] sm:$0xff] }
 0xbb5   : > { %5620 = vrot.lane.b32.xlu0 %v5606_v48, %s8498_s22  ;;  %v3693_v48 = vld [vmem:[%s8353_s12] sm:$0xff] }
 0xbb8   : > { %5514 = vrot.lane.b32.xlu1 %v5498_v34, %s8497_s27  ;;  %v3536_v34 = vld [vmem:[%s8351_s10 + $0x28] sm:$0x1f] }
 0xbb9   : > { %5292 = vrot.lane.b32.xlu0 %v7959_v16, %s8489_s6 }
 0xbbc   : > { %5624 = vrot.lane.b32.xlu1 %v5608_v15, %s8498_s22  ;;  %v3695_v15 = vld [vmem:[%s8353_s12 + $0x10] sm:$0xff] }
 0xbbd   : > { %4896 = vrot.lane.b32.xlu0 %v4881_v49, %s8486_s5  ;;  %v3694_v49 = vld [vmem:[%s8353_s12 + $0x8] sm:$0xff] }
 0xbc0   : > { %4900 = vrot.lane.b32.xlu1 %v4883_v0, %s8486_s5  ;;  %v3697_v0 = vld [vmem:[%s8353_s12 + $0x20] sm:$0xff] }
 0xbc1   : > { %5078 = vrot.lane.b32.xlu0 %v5063_v1, %s8487_s24 }
 0xbc4   : > { %5082 = vrot.lane.b32.xlu1 %v5065_v12, %s8487_s24  ;;  %v3696_v12 = vld [vmem:[%s8353_s12 + $0x18] sm:$0xff] }
 0xbc5   : > { %5188 = vrot.lane.b32.xlu0 %v5173_v33, %s8488_s29 }
 0xbc8   : > { %5192 = vrot.lane.b32.xlu1 %v5175_v7, %s8488_s29  ;;  %v3698_v7 = vld [vmem:[%s8353_s12 + $0x28] sm:$0x1f] }
 0xbc9   : > { %5402 = vrot.lane.b32.xlu0 %v5387_v26, %s8490_s0 }
 0xbcc   : > { %5406 = vrot.lane.b32.xlu1 %v5389_v6, %s8490_s0 }
 0xbcd   : > { %5512 = vrot.lane.b32.xlu0 %v5497_v3, %s8497_s27 }
 0xbd0   : > { %5516 = vrot.lane.b32.xlu1 %v5499_v14, %s8497_s27 }
 0xbd1   : > { %5622 = vrot.lane.b32.xlu0 %v5607_v9, %s8498_s22 }
 0xbd4   : > { %5626 = vrot.lane.b32.xlu1 %v5609_v25, %s8498_s22 }
 0xbd5   : > { %5732 = vrot.lane.b32.xlu0 %v5717_v55, %s8504_s21 }
 0xbd8   : > { %5736 = vrot.lane.b32.xlu1 %v5719_v28, %s8504_s21 }
 0xbd9   : > { %5300 = vrot.lane.b32.xlu0 %v4879_v36, %s8489_s6 }
 0xbdc   : > { %5298 = vrot.lane.b32.xlu1 %v7966_v29, %s8489_s6  ;;  %s8538_s6 = sld [smem:[#allocation23_spill]] }
 0xbdd   : > { %4904 = vrot.lane.b32.xlu0 %v4885_v44, %s8486_s5 }
 0xbe0   : > { %4902 = vrot.lane.b32.xlu1 %v4884_v37, %s8486_s5 }
 0xbe1   : > { %5086 = vrot.lane.b32.xlu0 %v5067_v45, %s8487_s24 }
 0xbe4   : > { %5084 = vrot.lane.b32.xlu1 %v5066_v17, %s8487_s24 }
 0xbe5   : > { %5196 = vrot.lane.b32.xlu0 %v5177_v20, %s8488_s29 }
 0xbe8   : > { %5194 = vrot.lane.b32.xlu1 %v5176_v11, %s8488_s29 }
 0xbe9   : > { %5408 = vrot.lane.b32.xlu0 %v5390_v19, %s8490_s0 }
 0xbec   : > { %5410 = vrot.lane.b32.xlu1 %v5391_v23, %s8490_s0  ;;  %s730_s0 = scalar_lea.vmem %s8538_s6, %s6593_s26 }
 0xbed   : > { %5518 = vrot.lane.b32.xlu0 %v5500_v27, %s8497_s27 }
 0xbf0   : > { %5520 = vrot.lane.b32.xlu1 %v5501_v31, %s8497_s27 }
 0xbf1   : > { %5628 = vrot.lane.b32.xlu0 %v5610_v58, %s8498_s22 }
 0xbf4   : > { %5630 = vrot.lane.b32.xlu1 %v5611_v43, %s8498_s22 }
 0xbf5   : > { %5738 = vrot.lane.b32.xlu0 %v5720_v40, %s8504_s21 }
 0xbf8   : > { %5740 = vrot.lane.b32.xlu1 %v5721_v52, %s8504_s21 }
 0xbf9   : > { %5730 = vrot.lane.b32.xlu0 %v5716_v41, %s8504_s21 }
 0xbfc   : > { %5734 = vrot.lane.b32.xlu1 %v5718_v35, %s8504_s21  ;;  %s8537_s21 = sld [smem:[#allocation22_spill]] }
 0xbfd   : > { %3539 = vperm.xlu0 %6626, %v3531_v50  }
 0xc00   : > { %5829 = vperm.xlu1 %6662, %v5826_v42  }
 0xc01   : > { %3549 = vperm.xlu0 %6626, %v3533_v21  }
 0xc02   : > { %s725_s5 = scalar_lea.vmem %s8537_s21, %s6593_s26 }
 0xc04   : > { %3544 = vperm.xlu1 %6662, %v3532_v39  }
 0xc05   : > { %3559 = vperm.xlu0 %6626, %v3535_v38   ;;  %v6170_v38 = vld [vmem:[%s8356_s15 + $0x4] sm:$0xf] }
 0xc08   : > { %3554 = vperm.xlu1 %6662, %v3534_v18  }
 0xc09   : > { %3701 = vperm.xlu0 %6626, %v3693_v48  }
 0xc0c   : > { %3564 = vperm.xlu1 %6662, %v3536_v34   ;;  %v8507_v34 = vld [vmem:[#allocation11_spill] sm:$0xff] }
 0xc0d   : > { %3711 = vperm.xlu0 %6626, %v3695_v15   ;;  %v4876_v15 = vmul.f32 %v8507_v34, %v7966_v29  ;;  %v4877_v29 = vld [vmem:[%s8356_s15] sm:$0xf] }
 0xc0f   : > { %v8140_v1 = vpop.permute.xlu0 %5290 }
 0xc10   : > { %3706 = vperm.xlu1 %6662, %v3694_v49  }
 0xc11   : > { %3721 = vperm.xlu0 %6626, %v3697_v0   ;;  %v8508_v0 = vld [vmem:[#allocation12_spill] sm:$0xff] }
 0xc12   : > { %v8145_v8 = vpop.permute.xlu1 %5294 }
 0xc13   : > { %v4895_v33 = vpop.permute.xlu0 %4894 }
 0xc14   : > { %3716 = vperm.xlu1 %6662, %v3696_v12   ;;  %v4875_v12 = vmul.f32 %v8508_v0, %v7982_v60 }
 0xc16   : > { %v8150_v22 = vpop.permute.xlu1 %5296 }
 0xc17   : > { %v8152_v26 = vpop.permute.xlu0 %5076 }
 0xc18   : > { %3726 = vperm.xlu1 %6662, %v3698_v7   ;;  %v4874_v7 = vmul.f32 %v8507_v34, %v7959_v16 }
 0xc1a   : > { %v4899_v6 = vpop.permute.xlu1 %4898 }
 0xc1b   : > { %v8154_v13 = vpop.permute.xlu0 %5186 }
 0xc1e   : > { %v5081_v3 = vpop.permute.xlu1 %5080 }
 0xc1f   : > { %v8156_v14 = vpop.permute.xlu0 %5400 }
 0xc22   : > { %v8158_v30 = vpop.permute.xlu1 %5190 }
 0xc23   : > { %v8160_v9 = vpop.permute.xlu0 %5510 }
 0xc26   : > { %v8162_v25 = vpop.permute.xlu1 %5404 }
 0xc27   : > { %v8164_v51 = vpop.permute.xlu0 %5620 }
 0xc2a   : > { %v8166_v55 = vpop.permute.xlu1 %5514 }
 0xc2b   : > { %v8168_v56 = vpop.permute.xlu0 %5292 }
 0xc2e   : > { %v8170_v28 = vpop.permute.xlu1 %5624 }
 0xc2f   : > { %v4897_v36 = vpop.permute.xlu0 %4896 }
 0xc30   : > { %v4907_v39 = vsel %vm917_vm9, %v4897_v36, %v4899_v6  ;;  %v4906_v18 = vsel %vm917_vm9, %v4895_v33, %v4897_v36  ;;  %v4873_v33 = vmul.f32 %v8508_v0, %v7971_v53  ;;  %v6173_v53 = vld [vmem:[%s8356_s15 + $0x8] sm:$0xf] }
 0xc32   : > { %v4901_v44 = vpop.permute.xlu1 %4900 }
 0xc33   : > { %v5079_v37 = vpop.permute.xlu0 %5078 }
 0xc34   : > { %v5089_v16 = vsel %vm8511_vm8, %v5079_v37, %v5081_v3  ;;  %vm8525_vm8 = vcmask 777216  }
 0xc36   : > { %v5083_v45 = vpop.permute.xlu1 %5082 }
 0xc37   : > { %v5189_v17 = vpop.permute.xlu0 %5188 }
 0xc3a   : > { %v5193_v20 = vpop.permute.xlu1 %5192 }
 0xc3b   : > { %v8172_v11 = vpop.permute.xlu0 %5402 }
 0xc3e   : > { %v5407_v19 = vpop.permute.xlu1 %5406 }
 0xc3f   : > { %v8174_v23 = vpop.permute.xlu0 %5512 }
 0xc42   : > { %v8176_v27 = vpop.permute.xlu1 %5516 }
 0xc43   : > { %v8178_v31 = vpop.permute.xlu0 %5622 }
 0xc46   : > { %v8180_v58 = vpop.permute.xlu1 %5626 }
 0xc47   : > { %v8182_v43 = vpop.permute.xlu0 %5732 }
 0xc4a   : > { %v8184_v40 = vpop.permute.xlu1 %5736 }
 0xc4b   : > { %v8186_v2 = vpop.permute.xlu0 %5300 }
 0xc4e   : > { %v8188_v52 = vpop.permute.xlu1 %5298 }
 0xc4f   : > { %v4905_v41 = vpop.permute.xlu0 %4904 }
 0xc52   : > { %v4903_v35 = vpop.permute.xlu1 %4902 }
 0xc53   : > { %v4908_v50 = vsel %vm917_vm9, %v4901_v44, %v4903_v35  ;;  %v5087_v42 = vpop.permute.xlu0 %5086  ;;  %v4909_v21 = vsel %vm917_vm9, %v4903_v35, %v4905_v41  ;;  %v5088_v41 = vsel %vm8512_vm14, %v8152_v26, %v5079_v37  ;;  %vm8513_vm9 = vcmask 916480  }
 0xc54   : > { %4945 = vmatprep.subr.mxu0 %v4909_v21  ;;  %vm8515_vm4 = vmmov %vm8513_vm9  ;;  %vm8526_vm14 = vcmask 785408  }
 0xc55   : > { %4946 = vmatpush1.msra.mxu0 %v4908_v50  ;;  %vm8517_vm15 = vmmov %vm8515_vm4 }
 0xc56   : > { %v5085_v48 = vpop.permute.xlu1 %5084  ;;  %4947 = vmatprep.subr.mxu0 %v4907_v39  ;;  %v5199_v26 = vsel %vm8517_vm15, %v5189_v17, %v8158_v30  ;;  %vm8518_vm0 = vmmov %vm8515_vm4 }
 0xc57   : > { %4948 = vmatpush1.msra.mxu0 %v4906_v18  ;;  %v5197_v49 = vpop.permute.xlu0 %5196  ;;  %v5091_v36 = vsel %vm8509_vm5, %v5085_v48, %v5087_v42  ;;  %v5090_v44 = vsel %vm8510_vm6, %v5083_v45, %v5085_v48  ;;  %v5198_v37 = vsel %vm8518_vm0, %v8154_v13, %v5189_v17  ;;  %v5305_v13 = vsel %vm8521_vm13, %v8188_v52, %v8186_v2  ;;  %vm8523_vm5 = vmmov %vm8522_vm11  ;;  %v6177_v2 = vld [vmem:[%s8356_s15 + $0x10] sm:$0xf] }
 0xc58   : > { %6171 = vmatmul.mubr.msk.f32.vlgmr.msra.gmra.mxu0 %vm1225_vm12, %v6170_v38  ;;  %5019 = vmatprep.subr.mxu0 %v4876_v15  ;;  %v6175_v38 = vld [vmem:[%s8356_s15 + $0xc] sm:$0xf]  ;;  %v5304_v17 = vsel %vm8522_vm11, %v8150_v22, %v8188_v52  ;;  %vm8524_vm6 = vmmov %vm8523_vm5  ;;  %vm8532_vm0 = vcmask 769024  }
 0xc59   : > { %5020 = vmatpush1.msra.mxu0 %v4875_v12  ;;  %5055 = vmatprep.mubr.f32.mxu0 %v8478_v46  ;;  %v5302_v18 = vsel %vm8524_vm6, %v8140_v1, %v8168_v56  ;;  %vm8535_vm13 = vmmov %vm8532_vm0 }
 0xc5a   : > { %v5195_v6 = vpop.permute.xlu1 %5194  ;;  %5021 = vmatprep.subr.mxu0 %v4874_v7  ;;  %vm8536_vm11 = vmmov %vm8532_vm0 }
 0xc5b   : > { %5022 = vmatpush1.msra.mxu0 %v4873_v33  ;;  %v5409_v60 = vpop.permute.xlu0 %5408  ;;  %v5201_v45 = vsel %vm8513_vm9, %v5195_v6, %v5197_v49  ;;  %v5200_v21 = vsel %vm8515_vm4, %v5193_v20, %v5195_v6  ;;  %v5413_v20 = vsel %vm8519_vm1, %v8172_v11, %v8162_v25  ;;  %v6179_v25 = vld [vmem:[%s8356_s15 + $0x14] sm:$0xf]  ;;  %vm8527_vm9 = vmmov %vm8526_vm14 }
 0xc5c   : > { %6172 = vmatmul.mubr.msk.f32.vlgmr.msra.gmra.mxu0 %vm1225_vm12, %v4877_v29  ;;  %5127 = vmatprep.subr.mxu0 %v5091_v36  ;;  %v5414_v3 = vsel %vm8516_vm10, %v5407_v19, %v5409_v60  ;;  %v5412_v19 = vsel %vm8520_vm7, %v8156_v14, %v8172_v11  ;;  %v5303_v11 = vsel %vm8523_vm5, %v8168_v56, %v8145_v8  ;;  %vm8529_vm4 = vmmov %vm8527_vm9  ;;  %vm3685_vm5 = vcmask 520192  }
 0xc5d   : > { %5128 = vmatpush1.msra.mxu0 %v5090_v44  ;;  %5163 = vmatprep.mubr.f32.mxu0 %v8478_v46  ;;  %v5523_v56 = vsel %vm8529_vm4, %v8174_v23, %v8166_v55  ;;  %vm8531_vm15 = vmmov %vm8529_vm4 }
 0xc5e   : > { %v5411_v35 = vpop.permute.xlu1 %5410  ;;  %5129 = vmatprep.subr.mxu0 %v5089_v16  ;;  %vm8534_vm7 = vmmov %vm8532_vm0 }
 0xc5f   : > { %5130 = vmatpush1.msra.mxu0 %v5088_v41  ;;  %v5519_v50 = vpop.permute.xlu0 %5518  ;;  %v5415_v42 = vsel %vm8514_vm2, %v5409_v60, %v5411_v35  ;;  %vm8528_vm2 = vmmov %vm8525_vm8 }
 0xc60   : > { %6174 = vmatmul.mubr.msk.f32.vlgmr.msra.gmra.mxu0 %vm1225_vm12, %v6173_v53  ;;  %5237 = vmatprep.subr.mxu0 %v5201_v45  ;;  %v5524_v8 = vsel %vm8527_vm9, %v8176_v27, %v5519_v50  ;;  %vm8530_vm10 = vmmov %vm8528_vm2  ;;  %v6181_v27 = vld [vmem:[%s8356_s15 + $0x18] sm:$0xf] }
 0xc61   : > { %5451 = vmatprep.subr.mxu1 %v5415_v42  ;;  %5238 = vmatpush1.msra.mxu0 %v5200_v21  ;;  %v5633_v15 = vsel %vm8530_vm10, %v8178_v31, %v8170_v28  ;;  %vm8533_vm1 = vmmov %vm8528_vm2  ;;  %v6183_v28 = vld [vmem:[%s8356_s15 + $0x1c] sm:$0xf] }
 0xc62   : > { %5452 = vmatpush1.msra.mxu1 %v5414_v3  ;;  %v5521_v39 = vpop.permute.xlu1 %5520  ;;  %5239 = vmatprep.subr.mxu0 %v5199_v26  ;;  %v5632_v55 = vsel %vm8533_vm1, %v8164_v51, %v8178_v31  ;;  %v6185_v31 = vld [vmem:[%s8356_s15 + $0x20] sm:$0xf] }
 0xc63   : > { %5453 = vmatprep.subr.mxu1 %v5413_v20  ;;  %5240 = vmatpush1.msra.mxu0 %v5198_v37  ;;  %v5629_v30 = vpop.permute.xlu0 %5628  ;;  %v5525_v48 = vsel %vm8526_vm14, %v5519_v50, %v5521_v39 }
 0xc64   : > { %5273 = vmatprep.mubr.f32.mxu0 %v8478_v46  ;;  %5454 = vmatpush1.msra.mxu1 %v5412_v19  ;;  %v5634_v34 = vsel %vm8528_vm2, %v8180_v58, %v5629_v30  ;;  %v5522_v58 = vsel %vm8531_vm15, %v8160_v9, %v8174_v23 }
 0xc65   : > { %6176 = vmatmul.mubr.msk.f32.vlgmr.msra.gmra.mxu0 %vm1225_vm12, %v6175_v38  ;;  %5341 = vmatprep.subr.mxu0 %v5305_v13 }
 0xc66   : > { %5342 = vmatpush1.msra.mxu0 %v5304_v17  ;;  %v5631_v14 = vpop.permute.xlu1 %5630  ;;  %5377 = vmatprep.mubr.f32.mxu0 %v8478_v46 }
 0xc67   : > { %5343 = vmatprep.subr.mxu0 %v5303_v11  ;;  %v5739_v22 = vpop.permute.xlu0 %5738  ;;  %v5635_v52 = vsel %vm8525_vm8, %v5629_v30, %v5631_v14  ;;  %6180 = vmatmul.mubr.msk.f32.vlgmr.msra.gmra.mxu1 %vm1225_vm12, %v6179_v25 }
 0xc68   : > { %5344 = vmatpush1.msra.mxu0 %v5302_v18  ;;  %5671 = vmatprep.subr.mxu1 %v5635_v52  ;;  %v5744_v9 = vsel %vm8534_vm7, %v8184_v40, %v5739_v22 }
 0xc69   : > { %6178 = vmatmul.mubr.msk.f32.vlgmr.msra.gmra.mxu0 %vm1225_vm12, %v6177_v2  ;;  %5561 = vmatprep.subr.mxu0 %v5525_v48 }
 0xc6a   : > { %5562 = vmatpush1.msra.mxu0 %v5524_v8  ;;  %5672 = vmatpush1.msra.mxu1 %v5634_v34  ;;  %v5741_v1 = vpop.permute.xlu1 %5740 }
 0xc6b   : > { %5563 = vmatprep.subr.mxu0 %v5523_v56  ;;  %5673 = vmatprep.subr.mxu1 %v5633_v15  ;;  %v5745_v49 = vsel %vm8532_vm0, %v5739_v22, %v5741_v1  ;;  %v5731_v0 = vpop.permute.xlu0 %5730 }
 0xc6c   : > { %5564 = vmatpush1.msra.mxu0 %v5522_v58  ;;  %5597 = vmatprep.mubr.f32.mxu0 %v8478_v46  ;;  %v5742_v12 = vsel %vm8536_vm11, %v5731_v0, %v8182_v43 }
 0xc6d   : > { %5674 = vmatpush1.msra.mxu1 %v5632_v55  ;;  %6182 = vmatmul.mubr.msk.f32.vlgmr.msra.gmra.mxu0 %vm1225_vm12, %v6181_v27 }
 0xc6e   : > { %5781 = vmatprep.subr.mxu0 %v5745_v49  ;;  %5707 = vmatprep.mubr.f32.mxu1 %v8478_v46  ;;  %v5735_v23 = vpop.permute.xlu1 %5734 }
 0xc6f   : > { %5782 = vmatpush1.msra.mxu0 %v5744_v9  ;;  %6184 = vmatmul.mubr.msk.f32.vlgmr.msra.gmra.mxu1 %vm1225_vm12, %v6183_v28  ;;  %v5743_v51 = vsel %vm8535_vm13, %v8182_v43, %v5735_v23 }
 0xc70   : > { %5783 = vmatprep.subr.mxu0 %v5743_v51  ;;  %5817 = vmatprep.mubr.f32.mxu0 %v8478_v46 }
 0xc71   : > { %5784 = vmatpush1.msra.mxu0 %v5742_v12 }
 0xc72   : > { %6186 = vmatmul.mubr.msk.f32.vlgmr.msra.gmra.mxu0 %vm1225_vm12, %v6185_v31 }
 0xc78   : > { %v3540_v40 = vpop.permute.xlu0 %3539 }
 0xc79   : > { %v3652_v7 = vadd.f32 %v7927_v63, %v3540_v40 }
 0xc7b   : > { %3680 = vst.msk [vmem:[%s725_s5] sm:$0xff] %vm3196_vm3, %v3652_v7  ;;  %v8307_v33 = vpop.permute.xlu1 %5829 }
 0xc7c   : > { %v3550_v29 = vpop.permute.xlu0 %3549 }
 0xc7d   : > { %v3662_v43 = vadd.f32 %v7933_v59, %v3550_v29 }
 0xc7f   : > { %3682 = vst.msk [vmem:[%s725_s5 + $0x10] sm:$0xff] %vm3196_vm3, %v3662_v43  ;;  %v3545_v46 = vpop.permute.xlu1 %3544 }
 0xc80   : > { %v3657_v6 = vadd.f32 %v7925_v62, %v3545_v46  ;;  %v3560_v60 = vpop.permute.xlu0 %3559 }
 0xc81   : > { %v3672_v36 = vadd.f32 %v7941_v54, %v3560_v60 }
 0xc82   : > { %3681 = vst.msk [vmem:[%s725_s5 + $0x8] sm:$0xff] %vm3196_vm3, %v3657_v6 }
 0xc83   : > { %3684 = vst.msk [vmem:[%s725_s5 + $0x20] sm:$0xff] %vm3196_vm3, %v3672_v36  ;;  %v3555_v63 = vpop.permute.xlu1 %3554 }
 0xc84   : > { %v3667_v44 = vadd.f32 %v7929_v61, %v3555_v63  ;;  %v3702_v59 = vpop.permute.xlu0 %3701 }
 0xc85   : > { %v3814_v16 = vadd.f32 %v7935_v10, %v3702_v59 }
 0xc86   : > { %3683 = vst.msk [vmem:[%s725_s5 + $0x18] sm:$0xff] %vm3196_vm3, %v3667_v44  ;;  %vm3847_vm3 = vcmask 126976  }
 0xc87   : > { %3842 = vst.msk [vmem:[%s730_s0] sm:$0xff] %vm1225_vm12, %v3814_v16  ;;  %v3565_v62 = vpop.permute.xlu1 %3564 }
 0xc88   : > { %v3677_v54 = vadd.f32 %v7937_v57, %v3565_v62  ;;  %v3712_v53 = vpop.permute.xlu0 %3711 }
 0xc89   : > { %v3824_v41 = vadd.f32 %v7943_v24, %v3712_v53 }
 0xc8a   : > { %3686 = vst.msk [vmem:[%s725_s5 + $0x28] sm:$0x1f] %vm3685_vm5, %v3677_v54 }
 0xc8b   : > { %3844 = vst.msk [vmem:[%s730_s0 + $0x10] sm:$0xff] %vm1225_vm12, %v3824_v41  ;;  %v3707_v61 = vpop.permute.xlu1 %3706 }
 0xc8c   : > { %v3819_v35 = vadd.f32 %v7931_v47, %v3707_v61  ;;  %v3722_v50 = vpop.permute.xlu0 %3721 }
 0xc8d   : > { %v3834_v10 = vadd.f32 %v7947_v32, %v3722_v50 }
 0xc8e   : > { %3843 = vst.msk [vmem:[%s730_s0 + $0x8] sm:$0xff] %vm1225_vm12, %v3819_v35 }
 0xc8f   : > { %3846 = vst.msk [vmem:[%s730_s0 + $0x20] sm:$0xff] %vm1225_vm12, %v3834_v10  ;;  %v3717_v45 = vpop.permute.xlu1 %3716 }
 0xc90   : > { %v3829_v42 = vadd.f32 %v7939_v5, %v3717_v45 }
 0xc92   : > { %3845 = vst.msk [vmem:[%s730_s0 + $0x18] sm:$0xff] %vm1225_vm12, %v3829_v42 }
 0xc93   : > { %v3727_v57 = vpop.permute.xlu1 %3726 }
 0xc94   : > { %v3839_v24 = vadd.f32 %v7945_v4, %v3727_v57 }
 0xc96   : > { %3848 = vst.msk [vmem:[%s730_s0 + $0x28] sm:$0x1f] %vm3847_vm3, %v3839_v24 }
 0xd18   : > { %v4983_v21 = vpop.f32.mrf.mxu0 }
 0xd1a   : > { %v4985_v3 = vpop.f32.mrf.mxu0 }
 0xd1c   : > { %v5057_v47 = vpop.f32.mrf.mxu0 }
 0xd1d   : > { %v5058_v39 = vadd.f32 %v5057_v47, %v4983_v21 }
 0xd1e   : > { %v5059_v26 = vpop.f32.mrf.mxu0 }
 0xd1f   : > { %v5060_v38 = vadd.f32 %v5059_v26, %v4985_v3 }
 0xd20   : > { %v5165_v37 = vpop.f32.mrf.mxu0 }
 0xd21   : > { %v5170_v19 = vadd.f32 %v5165_v37, %v5058_v39 }
 0xd22   : > { %v5167_v32 = vpop.f32.mrf.mxu0 }
 0xd23   : > { %v5171_v5 = vadd.f32 %v5167_v32, %v5060_v38 }
 0xd25   : > { %v5275_v20 = vpop.f32.mrf.mxu0 }
 0xd26   : > { %v5280_v25 = vadd.f32 %v5275_v20, %v5170_v19 }
 0xd27   : > { %v5277_v30 = vpop.f32.mrf.mxu0  ;;  %v5489_v13 = vpop.f32.mrf.mxu1 }
 0xd28   : > { %v5281_v14 = vadd.f32 %v5277_v30, %v5171_v5 }
 0xd29   : > { %v5379_v17 = vpop.f32.mrf.mxu0  ;;  %v5491_v4 = vpop.f32.mrf.mxu1 }
 0xd2a   : > { %v5384_v11 = vadd.f32 %v5379_v17, %v5280_v25 }
 0xd2b   : > { %v5381_v2 = vpop.f32.mrf.mxu0 }
 0xd2c   : > { %v5385_v18 = vadd.f32 %v5381_v2, %v5281_v14  ;;  %v5494_v22 = vadd.f32 %v5489_v13, %v5384_v11 }
 0xd2d   : > { %v5599_v52 = vpop.f32.mrf.mxu0 }
 0xd2e   : > { %v5495_v48 = vadd.f32 %v5491_v4, %v5385_v18  ;;  %v5604_v8 = vadd.f32 %v5599_v52, %v5494_v22 }
 0xd2f   : > { %v5601_v34 = vpop.f32.mrf.mxu0  ;;  %v5709_v1 = vpop.f32.mrf.mxu1 }
 0xd30   : > { %v5605_v56 = vadd.f32 %v5601_v34, %v5495_v48  ;;  %v5714_v15 = vadd.f32 %v5709_v1, %v5604_v8 }
 0xd31   : > { %v5711_v27 = vpop.f32.mrf.mxu1 }
 0xd32   : > { %v5819_v58 = vpop.f32.mrf.mxu0  ;;  %v5715_v49 = vadd.f32 %v5711_v27, %v5605_v56 }
 0xd33   : > { %v5824_v55 = vadd.f32 %v5819_v58, %v5714_v15 }
 0xd34   : > { %v5821_v28 = vpop.f32.mrf.mxu0 }
 0xd35   : > { %v5832_v0 = vadd.f32 %v8307_v33, %v5824_v55  ;;  %v5825_v9 = vadd.f32 %v5821_v28, %v5715_v49 }
 0xd37   : > { %v5834_v23 = vsub.f32 0.0, %v5832_v0  ;;  %v5833_v51 = vadd.f32 %v8307_v33, %v5825_v9 }
 0xd39   : > { %v5836_v31 = vmul.f32 1.442695, %v5834_v23  ;;  %v5835_v12 = vsub.f32 0.0, %v5833_v51 }
 0xd3b   : > { %6711 = vpow2.f32 %v5836_v31  ;;  %v5838_v40 = vmul.f32 1.442695, %v5835_v12 }
 0xd3d   : > { %6713 = vpow2.f32 %v5838_v40 }
 0xd48   : > { %v6712_v7 = vpop.eup %6711 }
 0xd49   : > { %v5840_v29 = vadd.f32 1.0, %v6712_v7 }
 0xd4a   : > { %v6714_v43 = vpop.eup %6713 }
 0xd4b   : > { %v5841_v46 = vadd.f32 1.0, %v6714_v43  ;;  %6715 = vrcp.f32 %v5840_v29 }
 0xd4d   : > { %6717 = vrcp.f32 %v5841_v46 }
 0xd58   : > { %v6716_v6 = vpop.eup %6715 }
 0xd5a   : > { %v6718_v60 = vpop.eup %6717 }
 0xd5b   : > { %v5848_v36 = vcombine.low %v6716_v6, %v6718_v60 }
 0xd5d   : > { %5850 = vst [vmem:[%s735_s1] sm:$0xff] %v5848_v36 }
 0xd5e PF: > { %s8540_s3 = sld [smem:[#allocation3_spill]] }
 0xd64   : > { %s34_s4 = sadd.s32 1, %s8540_s3  }
 0xd65   : > { %p31_p4 = scmp.ge.s32.totalorder %s34_s4, 4  }
 0xd67   :  { %33 = sbr.rel (!%p31_p4) target bundleno = 13 (0xd), region = 190 }

</bundles_post_ra>
